<compile_context>
chip_gen: v7x
topology: tpu7x:2x2x1
jax: 0.10.0
libtpu: 0.0.40
codegen_flags: <defaults>
</compile_context>

<pallas_src>
import jax
import jax.numpy as jnp
from jax.experimental import pallas as pl
from jax.experimental.pallas import tpu as pltpu


def _pick_row_block(H, W, row_block=None):
    """Rows per grid step: smallest divisor of H giving matmul M = TH*W >= ~256
    (capped so per-step f32 temporaries stay small); whole map for tiny inputs."""
    if row_block is not None:
        assert H % row_block == 0, "row_block must divide H"
        return row_block
    target, cap = 256, 4096
    divisors = [d for d in range(1, H + 1) if H % d == 0]
    good = [d for d in divisors if target <= d * W <= cap]
    if good:
        return min(good)
    fit = [d for d in divisors if d * W <= cap]
    return max(fit) if fit else 1


def bottleneck_kernel(x_ref, w1_ref, s1_ref, b1_ref,
                      w2_ref, s2_ref, b2_ref,
                      w3_ref, s3_ref, b3_ref,
                      o_ref, hs_ref):
    """Grid = (B, H // TH).

    x_ref  : (1, H, W, Cin)    bf16 full NHWC map of the current batch element
    w1_ref : (Cin, WP)         bf16 1x1 conv #1 (WP = width padded to 128 lanes)
    w2_ref : (3, 3*WP, WP)     bf16 3x3 conv; the 3 kx taps stacked along K
    w3_ref : (WP, Cout)        bf16 1x1 conv #2
    s*_ref / b*_ref : (1, C)   f32 folded BatchNorm scale / bias
    o_ref  : (1, TH, W, Cout)  bf16 output row block
    hs_ref : (TH+2, W, 3*WP)   bf16 scratch: kx-shifted conv1 rows (1-row halo)
    """
    H, W, Cin = x_ref.shape[1], x_ref.shape[2], x_ref.shape[3]
    TH = o_ref.shape[1]
    WP = w1_ref.shape[1]
    Cout = w3_ref.shape[1]
    f32 = jnp.float32
    bf16 = jnp.bfloat16

    r = pl.program_id(1)
    n_rb = pl.num_programs(1)
    r0 = pl.multiple_of(r * TH, TH)

    # ------------------------------------------------ conv1 (1x1) + bn1 + relu
    # Recompute conv1 for this block's TH rows plus a 1-row halo.  Halo rows are
    # loaded clamped; rows that fall outside the image are zeroed *after*
    # bn1/relu, which is exactly conv2's SAME zero padding of its input.
    xc = x_ref[0, pl.ds(r0, TH)]                               # (TH, W, Cin)
    top = x_ref[0, pl.ds(jnp.maximum(r0 - 1, 0), 1)]           # (1, W, Cin)
    bot = x_ref[0, pl.ds(jnp.minimum(r0 + TH, H - 1), 1)]      # (1, W, Cin)
    xh = jnp.concatenate([top, xc, bot], axis=0)               # (TH+2, W, Cin)

    h1 = jnp.dot(xh.reshape((TH + 2) * W, Cin), w1_ref[...],
                 preferred_element_type=f32)
    h1 = jnp.maximum(h1 * s1_ref[...] + b1_ref[...], 0.0).reshape(TH + 2, W, WP)

    rowi = jax.lax.broadcasted_iota(jnp.int32, (TH + 2, W, 1), 0)
    h1 = jnp.where((rowi == 0) & (r == 0), 0.0, h1)
    h1 = jnp.where((rowi == TH + 1) & (r == n_rb - 1), 0.0, h1)

    # --------------------------------------------- stage kx-shifted conv1 rows
    # hs[..., 0:WP]     = h1[y, x-1]   (kx = 0 source)
    # hs[..., WP:2WP]   = h1[y, x]     (kx = 1 source)
    # hs[..., 2WP:3WP]  = h1[y, x+1]   (kx = 2 source)
    col = jax.lax.broadcasted_iota(jnp.int32, (TH + 2, W, 1), 1)
    right = jnp.where(col == 0, 0.0, pltpu.roll(h1, shift=1, axis=1))
    left = jnp.where(col == W - 1, 0.0, pltpu.roll(h1, shift=W - 1, axis=1))
    hs_ref[:, :, 0:WP] = right.astype(bf16)        # lane-dense, unmasked stores
    hs_ref[:, :, WP:2 * WP] = h1.astype(bf16)
    hs_ref[:, :, 2 * WP:3 * WP] = left.astype(bf16)

    # ------------------------------------------------ conv2 (3x3) + bn2 + relu
    # 3 MXU matmuls with K = 3*WP (full systolic depth) instead of 9 with K=WP;
    # the ky row windows are free leading-dim slices of the scratch.
    p0 = hs_ref[pl.ds(0, TH)].reshape(TH * W, 3 * WP)
    p1 = hs_ref[pl.ds(1, TH)].reshape(TH * W, 3 * WP)
    p2 = hs_ref[pl.ds(2, TH)].reshape(TH * W, 3 * WP)
    acc = jnp.dot(p0, w2_ref[0], preferred_element_type=f32)
    acc = acc + jnp.dot(p1, w2_ref[1], preferred_element_type=f32)
    acc = acc + jnp.dot(p2, w2_ref[2], preferred_element_type=f32)
    h2 = jnp.maximum(acc * s2_ref[...] + b2_ref[...], 0.0)

    # ------------------------------------- conv3 (1x1) + bn3 + residual + relu
    h3 = jnp.dot(h2.astype(bf16), w3_ref[...], preferred_element_type=f32)
    h3 = h3 * s3_ref[...] + b3_ref[...]
    identity = xc.reshape(TH * W, Cout).astype(f32)
    out = jnp.maximum(h3 + identity, 0.0)
    o_ref[0] = out.reshape(TH, W, Cout).astype(o_ref.dtype)


def bottleneck_pallas_nhwc(x_nhwc, params, *, row_block=None):
    """x_nhwc: (B, H, W, Cin) NHWC (any float dtype; cast to bf16 at the boundary).
    Returns (B, H, W, Cout) NHWC bf16."""
    (w1, s1, b1, w2, s2, b2, w3, s3, b3) = params
    B, H, W, Cin = x_nhwc.shape
    width = w1.shape[1]
    Cout = w3.shape[1]
    assert Cin == Cout, "identity path requires inplanes == planes * expansion"
    assert W % 8 == 0, "W must be a multiple of 8 so (H,W,C)->(H*W,C) reshapes are free"

    # Lane-dense intermediate width: pad `width` up to a multiple of 128 lanes.
    # Padded bn biases are zero, so padded conv1/conv2 channels stay exactly 0.
    WP = ((width + 127) // 128) * 128
    pad = WP - width
    if pad:
        w1 = jnp.pad(w1, ((0, 0), (0, pad)))
        s1 = jnp.pad(s1, ((0, 0), (0, pad)))
        b1 = jnp.pad(b1, ((0, 0), (0, pad)))
        w2 = jnp.pad(w2, ((0, 0), (0, 0), (0, pad), (0, pad)))
        s2 = jnp.pad(s2, ((0, 0), (0, pad)))
        b2 = jnp.pad(b2, ((0, 0), (0, pad)))
        w3 = jnp.pad(w3, ((0, pad), (0, 0)))

    TH = _pick_row_block(H, W, row_block)
    n_rb = H // TH

    # bf16 operands for the MXU (accumulation stays f32); BN scale/bias stay f32.
    xb = x_nhwc.astype(jnp.bfloat16)
    w1b = w1.astype(jnp.bfloat16)
    # (3, 3, WP, WP) HWIO -> (ky, kx*WP + ci, co): kx taps stacked along K.
    w2b = w2.astype(jnp.bfloat16).reshape(3, 3 * WP, WP)
    w3b = w3.astype(jnp.bfloat16)

    # TODO(synk): pl.Buffered(1) pipeline_mode on the constant weight/scale specs
    # would halve their VMEM footprint; left at default double-buffering here.
    full = lambda s: pl.BlockSpec(s, lambda b, r: (0,) * len(s))

    flops = int(2 * B * W * ((H + 2 * n_rb) * Cin * WP
                             + H * (9 * WP * WP + WP * Cout)))
    bytes_accessed = int(
        xb.size * 2 + B * H * W * Cout * 2
        + 2 * (w1b.size + w2b.size + w3b.size)
        + 4 * (s1.size + b1.size + s2.size + b2.size + s3.size + b3.size))

    # VMEM budget: double-buffered blocks + weights + scratch + live temporaries,
    # capped generation-aware below physical VMEM (64 MiB on v7x, 128 on v5e/v6e).
    vmem_est = (
        2 * H * W * Cin * 2                      # double-buffered bf16 input block
        + 2 * TH * W * Cout * 2                  # double-buffered bf16 output block
        + 4 * (w1b.size + w2b.size + w3b.size)   # double-buffered bf16 weights
        + 8 * (s1.size + b1.size + s2.size + b2.size + s3.size + b3.size)
        + (TH + 2) * W * 3 * WP * 2              # bf16 shifted-conv1 scratch
        + (TH + 2) * W * WP * 4 * 3              # live f32 h1 / right / left
        + TH * W * (WP + Cout) * 4 * 2)          # acc / h2 / h3 / out headroom
    try:
        phys = pltpu.get_tpu_info().vmem_capacity_bytes
    except Exception:
        phys = 64 * 2 ** 20
    vmem_limit = int(min(phys - 8 * 2 ** 20, max(32 * 2 ** 20, 2 * vmem_est)))

    return pl.pallas_call(
        bottleneck_kernel,
        out_shape=jax.ShapeDtypeStruct((B, H, W, Cout), jnp.bfloat16),
        grid_spec=pltpu.PrefetchScalarGridSpec(
            num_scalar_prefetch=0,
            grid=(B, n_rb),
            in_specs=[
                pl.BlockSpec((1, H, W, Cin), lambda b, r: (b, 0, 0, 0)),
                full(w1b.shape), full(s1.shape), full(b1.shape),
                full(w2b.shape), full(s2.shape), full(b2.shape),
                full(w3b.shape), full(s3.shape), full(b3.shape),
            ],
            out_specs=pl.BlockSpec((1, TH, W, Cout), lambda b, r: (b, r, 0, 0)),
            scratch_shapes=[pltpu.VMEM((TH + 2, W, 3 * WP), jnp.bfloat16)],
        ),
        compiler_params=pltpu.CompilerParams(
            dimension_semantics=("parallel", "parallel"),
            vmem_limit_bytes=vmem_limit),
        cost_estimate=pl.CostEstimate(
            flops=flops, transcendentals=0, bytes_accessed=bytes_accessed),
    )(xb, w1b, s1, b1, w2b, s2, b2, w3b, s3, b3)


def bottleneck_pallas(x_nchw, params, *, row_block=None):
    """PyTorch-style NCHW/f32 wrapper.  In a full network keep activations NHWC
    bf16 end-to-end and call bottleneck_pallas_nhwc directly (avoids the two
    HBM transposes and the output upcast)."""
    x_nhwc = jnp.transpose(x_nchw.astype(jnp.bfloat16), (0, 2, 3, 1))
    out = bottleneck_pallas_nhwc(x_nhwc, params, row_block=row_block)
    return jnp.transpose(out, (0, 3, 1, 2)).astype(x_nchw.dtype)


# -----------------------------------------------------------------------------
# Deterministic synthetic parameters (shapes follow Bottleneck.__init__).
# -----------------------------------------------------------------------------
def make_params(key, inplanes, planes, base_width=64, groups=1, eps=1e-5):
    expansion = 4
    width = int(planes * (base_width / 64.0)) * groups
    out_planes = planes * expansion

    ks = jax.random.split(key, 12)

    def bn_fold(kg, kb, km, kv, c):
        gamma = 1.0 + 0.1 * jax.random.normal(kg, (c,), jnp.float32)
        beta = 0.1 * jax.random.normal(kb, (c,), jnp.float32)
        mean = 0.1 * jax.random.normal(km, (c,), jnp.float32)
        var = jnp.abs(jax.random.normal(kv, (c,), jnp.float32)) + 0.5
        scale = gamma / jnp.sqrt(var + eps)
        bias = beta - mean * scale
        return scale.reshape(1, c), bias.reshape(1, c)

    w1 = 0.1 * jax.random.normal(ks[0], (inplanes, width), jnp.float32)
    s1, b1 = bn_fold(ks[1], ks[2], ks[3], ks[4], width)
    w2 = 0.1 * jax.random.normal(ks[5], (3, 3, width, width), jnp.float32)  # HWIO
    s2, b2 = bn_fold(ks[6], ks[7], ks[8], ks[9], width)
    w3 = 0.1 * jax.random.normal(ks[10], (width, out_planes), jnp.float32)
    s3, b3 = bn_fold(ks[11], ks[0], ks[1], ks[2], out_planes)
    return (w1, s1, b1, w2, s2, b2, w3, s3, b3)


def bottleneck_reference(x_nchw, params):
    """Pure-JAX f32 reference (eval-mode BN folded, same as kernel)."""
    (w1, s1, b1, w2, s2, b2, w3, s3, b3) = params
    x = jnp.transpose(x_nchw, (0, 2, 3, 1))           # NHWC
    h = jnp.einsum("bhwc,co->bhwo", x, w1)
    h = jax.nn.relu(h * s1[0] + b1[0])
    h = jax.lax.conv_general_dilated(
        h, w2, window_strides=(1, 1), padding="SAME",
        dimension_numbers=("NHWC", "HWIO", "NHWC"))
    h = jax.nn.relu(h * s2[0] + b2[0])
    h = jnp.einsum("bhwc,co->bhwo", h, w3)
    h = h * s3[0] + b3[0]
    out = jax.nn.relu(h + x)
    return jnp.transpose(out, (0, 3, 1, 2))


if __name__ == "__main__":
    key = jax.random.PRNGKey(0)
    B, H, W = 2, 16, 16

    # (inplanes, planes, row_block): lane-dense single-block, multi-row-block
    # (halo recompute path), and lane-sparse Cin/Cout with width padded 16->128.
    configs = [(128, 32, None), (128, 32, 8), (64, 16, 4)]

    for inplanes, planes, rb in configs:
        kx, kp = jax.random.split(jax.random.fold_in(key, inplanes + planes))
        x = jax.random.normal(kx, (B, inplanes, H, W), jnp.float32)
        params = make_params(kp, inplanes, planes)

        out = bottleneck_pallas(x, params, row_block=rb)
        jax.block_until_ready(out)

        ref = bottleneck_reference(x, params)
        assert out.shape == (B, planes * 4, H, W)
        max_err = jnp.max(jnp.abs(out - ref))
        # bf16 activations + bf16 MXU operands (f32 accumulation) -> loosened
        # tolerance vs the pure-f32 reference.
        assert jnp.allclose(out, ref, rtol=5e-2, atol=8e-2), \
            f"config ({inplanes},{planes},rb={rb}) max abs err {max_err}"

    print("KERNEL_OK")
</pallas_src>

<mosaic_0001>
module attributes {stable_mosaic.version = 11 : i64} {
  func.func @bottleneck_kernel(%arg0: i32, %arg1: i32, %arg2: memref<1x16x16x128xbf16, #tpu.memory_space<vmem>>, %arg3: memref<128x128xbf16, #tpu.memory_space<vmem>>, %arg4: memref<1x128xf32, #tpu.memory_space<vmem>>, %arg5: memref<1x128xf32, #tpu.memory_space<vmem>>, %arg6: memref<3x384x128xbf16, #tpu.memory_space<vmem>>, %arg7: memref<1x128xf32, #tpu.memory_space<vmem>>, %arg8: memref<1x128xf32, #tpu.memory_space<vmem>>, %arg9: memref<128x128xbf16, #tpu.memory_space<vmem>>, %arg10: memref<1x128xf32, #tpu.memory_space<vmem>>, %arg11: memref<1x128xf32, #tpu.memory_space<vmem>>, %arg12: memref<1x16x16x128xbf16, #tpu.memory_space<vmem>>, %arg13: memref<18x16x384xbf16, #tpu.memory_space<vmem>>) attributes {dimension_semantics = [#tpu.dimension_semantics<parallel>, #tpu.dimension_semantics<parallel>], iteration_bounds = array<i64: 2, 1>, scalar_prefetch = 0 : i64, scratch_operands = 1 : i64, tpu.core_type = #tpu.core_type<tc>, window_params = [{transform_indices = @transform_0, window_bounds = array<i64: 1, 16, 16, 128>}, {pipeline_mode = #tpu.pipeline_mode<synchronous>, transform_indices = @transform_1, window_bounds = array<i64: 128, 128>}, {pipeline_mode = #tpu.pipeline_mode<synchronous>, transform_indices = @transform_2, window_bounds = array<i64: 1, 128>}, {pipeline_mode = #tpu.pipeline_mode<synchronous>, transform_indices = @transform_3, window_bounds = array<i64: 1, 128>}, {pipeline_mode = #tpu.pipeline_mode<synchronous>, transform_indices = @transform_4, window_bounds = array<i64: 3, 384, 128>}, {pipeline_mode = #tpu.pipeline_mode<synchronous>, transform_indices = @transform_5, window_bounds = array<i64: 1, 128>}, {pipeline_mode = #tpu.pipeline_mode<synchronous>, transform_indices = @transform_6, window_bounds = array<i64: 1, 128>}, {pipeline_mode = #tpu.pipeline_mode<synchronous>, transform_indices = @transform_7, window_bounds = array<i64: 128, 128>}, {pipeline_mode = #tpu.pipeline_mode<synchronous>, transform_indices = @transform_8, window_bounds = array<i64: 1, 128>}, {pipeline_mode = #tpu.pipeline_mode<synchronous>, transform_indices = @transform_9, window_bounds = array<i64: 1, 128>}, {transform_indices = @transform_10, window_bounds = array<i64: 1, 16, 16, 128>}]} {
    %c16_i32 = arith.constant 16 : i32
    %0 = arith.muli %arg1, %c16_i32 : i32
    %1 = tpu.assume_multiple %0, 16 : i32
    %c0 = arith.constant 0 : index
    %2 = arith.index_cast %1 : i32 to index
    %c0_0 = arith.constant 0 : index
    %c0_1 = arith.constant 0 : index
    %3 = vector.load %arg2[%c0, %2, %c0_0, %c0_1] : memref<1x16x16x128xbf16, #tpu.memory_space<vmem>>, vector<1x16x16x128xbf16>
    %4 = vector.shape_cast %3 : vector<1x16x16x128xbf16> to vector<16x16x128xbf16>
    %c1_i32 = arith.constant 1 : i32
    %5 = arith.subi %1, %c1_i32 : i32
    %c0_i32 = arith.constant 0 : i32
    %6 = arith.maxsi %5, %c0_i32 : i32
    %c0_2 = arith.constant 0 : index
    %7 = arith.index_cast %6 : i32 to index
    %c0_3 = arith.constant 0 : index
    %c0_4 = arith.constant 0 : index
    %8 = vector.load %arg2[%c0_2, %7, %c0_3, %c0_4] : memref<1x16x16x128xbf16, #tpu.memory_space<vmem>>, vector<1x1x16x128xbf16>
    %9 = vector.shape_cast %8 : vector<1x1x16x128xbf16> to vector<1x16x128xbf16>
    %c16_i32_5 = arith.constant 16 : i32
    %10 = arith.addi %1, %c16_i32_5 : i32
    %c15_i32 = arith.constant 15 : i32
    %11 = arith.minsi %10, %c15_i32 : i32
    %c0_6 = arith.constant 0 : index
    %12 = arith.index_cast %11 : i32 to index
    %c0_7 = arith.constant 0 : index
    %c0_8 = arith.constant 0 : index
    %13 = vector.load %arg2[%c0_6, %12, %c0_7, %c0_8] : memref<1x16x16x128xbf16, #tpu.memory_space<vmem>>, vector<1x1x16x128xbf16>
    %14 = vector.shape_cast %13 : vector<1x1x16x128xbf16> to vector<1x16x128xbf16>
    %15 = tpu.concatenate %9, %4, %14 in 0 : vector<1x16x128xbf16>, vector<16x16x128xbf16>, vector<1x16x128xbf16> -> vector<18x16x128xbf16>
    %16 = vector.shape_cast %15 : vector<18x16x128xbf16> to vector<288x128xbf16>
    %c0_9 = arith.constant 0 : index
    %c0_10 = arith.constant 0 : index
    %17 = vector.load %arg3[%c0_9, %c0_10] : memref<128x128xbf16, #tpu.memory_space<vmem>>, vector<128x128xbf16>
    %cst = arith.constant dense<0.000000e+00> : vector<288x128xf32>
    %18 = tpu.matmul %16, %17, %cst {dimension_numbers = #tpu.dot_dimension_numbers<[1], [0], [0], [1], [0, 0, 1, 1], [], []>} : vector<288x128xbf16>, vector<128x128xbf16>, vector<288x128xf32> -> vector<288x128xf32>
    %c0_11 = arith.constant 0 : index
    %c0_12 = arith.constant 0 : index
    %19 = vector.load %arg4[%c0_11, %c0_12] : memref<1x128xf32, #tpu.memory_space<vmem>>, vector<1x128xf32>
    %20 = vector.broadcast %19 : vector<1x128xf32> to vector<288x128xf32>
    %21 = arith.mulf %18, %20 : vector<288x128xf32>
    %c0_13 = arith.constant 0 : index
    %c0_14 = arith.constant 0 : index
    %22 = vector.load %arg5[%c0_13, %c0_14] : memref<1x128xf32, #tpu.memory_space<vmem>>, vector<1x128xf32>
    %23 = vector.broadcast %22 : vector<1x128xf32> to vector<288x128xf32>
    %24 = arith.addf %21, %23 : vector<288x128xf32>
    %cst_15 = arith.constant 0.000000e+00 : f32
    %25 = vector.broadcast %cst_15 : f32 to vector<288x128xf32>
    %26 = arith.maximumf %24, %25 : vector<288x128xf32>
    %27 = vector.shape_cast %26 : vector<288x128xf32> to vector<18x16x128xf32>
    %28 = tpu.iota {dimensions = array<i32: 0>} : vector<18x16x1xi32>
    %c0_i32_16 = arith.constant 0 : i32
    %29 = vector.broadcast %c0_i32_16 : i32 to vector<18x16x1xi32>
    %30 = arith.cmpi eq, %28, %29 : vector<18x16x1xi32>
    %c0_i32_17 = arith.constant 0 : i32
    %31 = arith.cmpi eq, %arg1, %c0_i32_17 : i32
    %32 = vector.broadcast %31 : i1 to vector<18x16x1xi1>
    %33 = arith.andi %30, %32 : vector<18x16x1xi1>
    %cst_18 = arith.constant 0.000000e+00 : f32
    %34 = vector.shape_cast %33 : vector<18x16x1xi1> to vector<18x16x1xi1>
    %35 = vector.broadcast %34 : vector<18x16x1xi1> to vector<18x16x128xi1>
    %36 = vector.broadcast %cst_18 : f32 to vector<18x16x128xf32>
    %37 = arith.select %35, %36, %27 : vector<18x16x128xi1>, vector<18x16x128xf32>
    %c17_i32 = arith.constant 17 : i32
    %38 = vector.broadcast %c17_i32 : i32 to vector<18x16x1xi32>
    %39 = arith.cmpi eq, %28, %38 : vector<18x16x1xi32>
    %c0_i32_19 = arith.constant 0 : i32
    %40 = arith.cmpi eq, %arg1, %c0_i32_19 : i32
    %41 = vector.broadcast %40 : i1 to vector<18x16x1xi1>
    %42 = arith.andi %39, %41 : vector<18x16x1xi1>
    %cst_20 = arith.constant 0.000000e+00 : f32
    %43 = vector.shape_cast %42 : vector<18x16x1xi1> to vector<18x16x1xi1>
    %44 = vector.broadcast %43 : vector<18x16x1xi1> to vector<18x16x128xi1>
    %45 = vector.broadcast %cst_20 : f32 to vector<18x16x128xf32>
    %46 = arith.select %44, %45, %37 : vector<18x16x128xi1>, vector<18x16x128xf32>
    %47 = tpu.iota {dimensions = array<i32: 1>} : vector<18x16x1xi32>
    %c0_i32_21 = arith.constant 0 : i32
    %48 = vector.broadcast %c0_i32_21 : i32 to vector<18x16x1xi32>
    %49 = arith.cmpi eq, %47, %48 : vector<18x16x1xi32>
    %c1_i32_22 = arith.constant 1 : i32
    %50 = tpu.dynamic_rotate %46 by %c1_i32_22 dim 1 : vector<18x16x128xf32>, i32 -> vector<18x16x128xf32>
    %cst_23 = arith.constant 0.000000e+00 : f32
    %51 = vector.shape_cast %49 : vector<18x16x1xi1> to vector<18x16x1xi1>
    %52 = vector.broadcast %51 : vector<18x16x1xi1> to vector<18x16x128xi1>
    %53 = vector.broadcast %cst_23 : f32 to vector<18x16x128xf32>
    %54 = arith.select %52, %53, %50 : vector<18x16x128xi1>, vector<18x16x128xf32>
    %c15_i32_24 = arith.constant 15 : i32
    %55 = vector.broadcast %c15_i32_24 : i32 to vector<18x16x1xi32>
    %56 = arith.cmpi eq, %47, %55 : vector<18x16x1xi32>
    %c15_i32_25 = arith.constant 15 : i32
    %57 = tpu.dynamic_rotate %46 by %c15_i32_25 dim 1 : vector<18x16x128xf32>, i32 -> vector<18x16x128xf32>
    %cst_26 = arith.constant 0.000000e+00 : f32
    %58 = vector.shape_cast %56 : vector<18x16x1xi1> to vector<18x16x1xi1>
    %59 = vector.broadcast %58 : vector<18x16x1xi1> to vector<18x16x128xi1>
    %60 = vector.broadcast %cst_26 : f32 to vector<18x16x128xf32>
    %61 = arith.select %59, %60, %57 : vector<18x16x128xi1>, vector<18x16x128xf32>
    %62 = arith.truncf %54 : vector<18x16x128xf32> to vector<18x16x128xbf16>
    %c0_27 = arith.constant 0 : index
    %c0_28 = arith.constant 0 : index
    %c0_29 = arith.constant 0 : index
    %63 = vector.load %arg13[%c0_27, %c0_28, %c0_29] : memref<18x16x384xbf16, #tpu.memory_space<vmem>>, vector<18x16x128xbf16>
    tpu.vector_store %arg13[%c0_27, %c0_28, %c0_29], %62 {strides = array<i32>} : memref<18x16x384xbf16, #tpu.memory_space<vmem>>, vector<18x16x128xbf16>,
    %64 = arith.truncf %46 : vector<18x16x128xf32> to vector<18x16x128xbf16>
    %c0_30 = arith.constant 0 : index
    %c0_31 = arith.constant 0 : index
    %c128 = arith.constant 128 : index
    %65 = vector.load %arg13[%c0_30, %c0_31, %c128] : memref<18x16x384xbf16, #tpu.memory_space<vmem>>, vector<18x16x128xbf16>
    tpu.vector_store %arg13[%c0_30, %c0_31, %c128], %64 {strides = array<i32>} : memref<18x16x384xbf16, #tpu.memory_space<vmem>>, vector<18x16x128xbf16>,
    %66 = arith.truncf %61 : vector<18x16x128xf32> to vector<18x16x128xbf16>
    %c0_32 = arith.constant 0 : index
    %c0_33 = arith.constant 0 : index
    %c256 = arith.constant 256 : index
    %67 = vector.load %arg13[%c0_32, %c0_33, %c256] : memref<18x16x384xbf16, #tpu.memory_space<vmem>>, vector<18x16x128xbf16>
    tpu.vector_store %arg13[%c0_32, %c0_33, %c256], %66 {strides = array<i32>} : memref<18x16x384xbf16, #tpu.memory_space<vmem>>, vector<18x16x128xbf16>,
    %c0_34 = arith.constant 0 : index
    %c0_35 = arith.constant 0 : index
    %c0_36 = arith.constant 0 : index
    %68 = vector.load %arg13[%c0_34, %c0_35, %c0_36] : memref<18x16x384xbf16, #tpu.memory_space<vmem>>, vector<16x16x384xbf16>
    %69 = vector.shape_cast %68 : vector<16x16x384xbf16> to vector<256x384xbf16>
    %c1 = arith.constant 1 : index
    %c0_37 = arith.constant 0 : index
    %c0_38 = arith.constant 0 : index
    %70 = vector.load %arg13[%c1, %c0_37, %c0_38] : memref<18x16x384xbf16, #tpu.memory_space<vmem>>, vector<16x16x384xbf16>
    %71 = vector.shape_cast %70 : vector<16x16x384xbf16> to vector<256x384xbf16>
    %c2 = arith.constant 2 : index
    %c0_39 = arith.constant 0 : index
    %c0_40 = arith.constant 0 : index
    %72 = vector.load %arg13[%c2, %c0_39, %c0_40] : memref<18x16x384xbf16, #tpu.memory_space<vmem>>, vector<16x16x384xbf16>
    %73 = vector.shape_cast %72 : vector<16x16x384xbf16> to vector<256x384xbf16>
    %c0_41 = arith.constant 0 : index
    %c0_42 = arith.constant 0 : index
    %c0_43 = arith.constant 0 : index
    %74 = vector.load %arg6[%c0_41, %c0_42, %c0_43] : memref<3x384x128xbf16, #tpu.memory_space<vmem>>, vector<1x384x128xbf16>
    %75 = vector.shape_cast %74 : vector<1x384x128xbf16> to vector<384x128xbf16>
    %cst_44 = arith.constant dense<0.000000e+00> : vector<256x128xf32>
    %76 = tpu.matmul %69, %75, %cst_44 {dimension_numbers = #tpu.dot_dimension_numbers<[1], [0], [0], [1], [0, 0, 1, 1], [], []>} : vector<256x384xbf16>, vector<384x128xbf16>, vector<256x128xf32> -> vector<256x128xf32>
    %c1_45 = arith.constant 1 : index
    %c0_46 = arith.constant 0 : index
    %c0_47 = arith.constant 0 : index
    %77 = vector.load %arg6[%c1_45, %c0_46, %c0_47] : memref<3x384x128xbf16, #tpu.memory_space<vmem>>, vector<1x384x128xbf16>
    %78 = vector.shape_cast %77 : vector<1x384x128xbf16> to vector<384x128xbf16>
    %cst_48 = arith.constant dense<0.000000e+00> : vector<256x128xf32>
    %79 = tpu.matmul %71, %78, %cst_48 {dimension_numbers = #tpu.dot_dimension_numbers<[1], [0], [0], [1], [0, 0, 1, 1], [], []>} : vector<256x384xbf16>, vector<384x128xbf16>, vector<256x128xf32> -> vector<256x128xf32>
    %80 = arith.addf %76, %79 : vector<256x128xf32>
    %c2_49 = arith.constant 2 : index
    %c0_50 = arith.constant 0 : index
    %c0_51 = arith.constant 0 : index
    %81 = vector.load %arg6[%c2_49, %c0_50, %c0_51] : memref<3x384x128xbf16, #tpu.memory_space<vmem>>, vector<1x384x128xbf16>
    %82 = vector.shape_cast %81 : vector<1x384x128xbf16> to vector<384x128xbf16>
    %cst_52 = arith.constant dense<0.000000e+00> : vector<256x128xf32>
    %83 = tpu.matmul %73, %82, %cst_52 {dimension_numbers = #tpu.dot_dimension_numbers<[1], [0], [0], [1], [0, 0, 1, 1], [], []>} : vector<256x384xbf16>, vector<384x128xbf16>, vector<256x128xf32> -> vector<256x128xf32>
    %84 = arith.addf %80, %83 : vector<256x128xf32>
    %c0_53 = arith.constant 0 : index
    %c0_54 = arith.constant 0 : index
    %85 = vector.load %arg7[%c0_53, %c0_54] : memref<1x128xf32, #tpu.memory_space<vmem>>, vector<1x128xf32>
    %86 = vector.broadcast %85 : vector<1x128xf32> to vector<256x128xf32>
    %87 = arith.mulf %84, %86 : vector<256x128xf32>
    %c0_55 = arith.constant 0 : index
    %c0_56 = arith.constant 0 : index
    %88 = vector.load %arg8[%c0_55, %c0_56] : memref<1x128xf32, #tpu.memory_space<vmem>>, vector<1x128xf32>
    %89 = vector.broadcast %88 : vector<1x128xf32> to vector<256x128xf32>
    %90 = arith.addf %87, %89 : vector<256x128xf32>
    %cst_57 = arith.constant 0.000000e+00 : f32
    %91 = vector.broadcast %cst_57 : f32 to vector<256x128xf32>
    %92 = arith.maximumf %90, %91 : vector<256x128xf32>
    %93 = arith.truncf %92 : vector<256x128xf32> to vector<256x128xbf16>
    %c0_58 = arith.constant 0 : index
    %c0_59 = arith.constant 0 : index
    %94 = vector.load %arg9[%c0_58, %c0_59] : memref<128x128xbf16, #tpu.memory_space<vmem>>, vector<128x128xbf16>
    %cst_60 = arith.constant dense<0.000000e+00> : vector<256x128xf32>
    %95 = tpu.matmul %93, %94, %cst_60 {dimension_numbers = #tpu.dot_dimension_numbers<[1], [0], [0], [1], [0, 0, 1, 1], [], []>} : vector<256x128xbf16>, vector<128x128xbf16>, vector<256x128xf32> -> vector<256x128xf32>
    %c0_61 = arith.constant 0 : index
    %c0_62 = arith.constant 0 : index
    %96 = vector.load %arg10[%c0_61, %c0_62] : memref<1x128xf32, #tpu.memory_space<vmem>>, vector<1x128xf32>
    %97 = vector.broadcast %96 : vector<1x128xf32> to vector<256x128xf32>
    %98 = arith.mulf %95, %97 : vector<256x128xf32>
    %c0_63 = arith.constant 0 : index
    %c0_64 = arith.constant 0 : index
    %99 = vector.load %arg11[%c0_63, %c0_64] : memref<1x128xf32, #tpu.memory_space<vmem>>, vector<1x128xf32>
    %100 = vector.broadcast %99 : vector<1x128xf32> to vector<256x128xf32>
    %101 = arith.addf %98, %100 : vector<256x128xf32>
    %102 = vector.shape_cast %4 : vector<16x16x128xbf16> to vector<256x128xbf16>
    %103 = arith.extf %102 : vector<256x128xbf16> to vector<256x128xf32>
    %104 = arith.addf %101, %103 : vector<256x128xf32>
    %cst_65 = arith.constant 0.000000e+00 : f32
    %105 = vector.broadcast %cst_65 : f32 to vector<256x128xf32>
    %106 = arith.maximumf %104, %105 : vector<256x128xf32>
    %107 = vector.shape_cast %106 : vector<256x128xf32> to vector<16x16x128xf32>
    %108 = arith.truncf %107 : vector<16x16x128xf32> to vector<16x16x128xbf16>
    %c0_66 = arith.constant 0 : index
    %c0_67 = arith.constant 0 : index
    %c0_68 = arith.constant 0 : index
    %c0_69 = arith.constant 0 : index
    %109 = vector.load %arg12[%c0_66, %c0_67, %c0_68, %c0_69] : memref<1x16x16x128xbf16, #tpu.memory_space<vmem>>, vector<1x16x16x128xbf16>
    %110 = vector.shape_cast %109 : vector<1x16x16x128xbf16> to vector<16x16x128xbf16>
    %111 = vector.shape_cast %108 : vector<16x16x128xbf16> to vector<1x16x16x128xbf16>
    tpu.vector_store %arg12[%c0_66, %c0_67, %c0_68, %c0_69], %111 {strides = array<i32>} : memref<1x16x16x128xbf16, #tpu.memory_space<vmem>>, vector<1x16x16x128xbf16>,
    return
  }
  func.func @transform_0(%arg0: i32, %arg1: i32) -> (i32, i32, i32, i32) {
    %c0_i32 = arith.constant 0 : i32
    %c0_i32_0 = arith.constant 0 : i32
    %c0_i32_1 = arith.constant 0 : i32
    %c0_i32_2 = arith.constant 0 : i32
    return %arg0, %c0_i32, %c0_i32_0, %c0_i32_1 : i32, i32, i32, i32
  }
  func.func @transform_1(%arg0: i32, %arg1: i32) -> (i32, i32) {
    %c0_i32 = arith.constant 0 : i32
    %c0_i32_0 = arith.constant 0 : i32
    %c0_i32_1 = arith.constant 0 : i32
    return %c0_i32, %c0_i32_0 : i32, i32
  }
  func.func @transform_2(%arg0: i32, %arg1: i32) -> (i32, i32) {
    %c0_i32 = arith.constant 0 : i32
    %c0_i32_0 = arith.constant 0 : i32
    %c0_i32_1 = arith.constant 0 : i32
    return %c0_i32, %c0_i32_0 : i32, i32
  }
  func.func @transform_3(%arg0: i32, %arg1: i32) -> (i32, i32) {
    %c0_i32 = arith.constant 0 : i32
    %c0_i32_0 = arith.constant 0 : i32
    %c0_i32_1 = arith.constant 0 : i32
    return %c0_i32, %c0_i32_0 : i32, i32
  }
  func.func @transform_4(%arg0: i32, %arg1: i32) -> (i32, i32, i32) {
    %c0_i32 = arith.constant 0 : i32
    %c0_i32_0 = arith.constant 0 : i32
    %c0_i32_1 = arith.constant 0 : i32
    %c0_i32_2 = arith.constant 0 : i32
    return %c0_i32, %c0_i32_0, %c0_i32_1 : i32, i32, i32
  }
  func.func @transform_5(%arg0: i32, %arg1: i32) -> (i32, i32) {
    %c0_i32 = arith.constant 0 : i32
    %c0_i32_0 = arith.constant 0 : i32
    %c0_i32_1 = arith.constant 0 : i32
    return %c0_i32, %c0_i32_0 : i32, i32
  }
  func.func @transform_6(%arg0: i32, %arg1: i32) -> (i32, i32) {
    %c0_i32 = arith.constant 0 : i32
    %c0_i32_0 = arith.constant 0 : i32
    %c0_i32_1 = arith.constant 0 : i32
    return %c0_i32, %c0_i32_0 : i32, i32
  }
  func.func @transform_7(%arg0: i32, %arg1: i32) -> (i32, i32) {
    %c0_i32 = arith.constant 0 : i32
    %c0_i32_0 = arith.constant 0 : i32
    %c0_i32_1 = arith.constant 0 : i32
    return %c0_i32, %c0_i32_0 : i32, i32
  }
  func.func @transform_8(%arg0: i32, %arg1: i32) -> (i32, i32) {
    %c0_i32 = arith.constant 0 : i32
    %c0_i32_0 = arith.constant 0 : i32
    %c0_i32_1 = arith.constant 0 : i32
    return %c0_i32, %c0_i32_0 : i32, i32
  }
  func.func @transform_9(%arg0: i32, %arg1: i32) -> (i32, i32) {
    %c0_i32 = arith.constant 0 : i32
    %c0_i32_0 = arith.constant 0 : i32
    %c0_i32_1 = arith.constant 0 : i32
    return %c0_i32, %c0_i32_0 : i32, i32
  }
  func.func @transform_10(%arg0: i32, %arg1: i32) -> (i32, i32, i32, i32) {
    %c0_i32 = arith.constant 0 : i32
    %c0_i32_0 = arith.constant 0 : i32
    %c0_i32_1 = arith.constant 0 : i32
    return %arg0, %arg1, %c0_i32, %c0_i32_0 : i32, i32, i32, i32
  }
}

</mosaic_0001>

<bundles_post_ra>
// kernel: tpu_custom_call.1
= control target key start
LH: loop header
LB: loop body
LE: loop exit
PB: predicated region body
PF: predicated region fallthrough
CT: control target
= control target key end

     0   :  { %s7650_s0 = inlined_call_operand.hbm [shape: bf16[2,16,16,128], index: 0, kind: input, shape index: {}]   ;;  %s7651_s1 = inlined_call_operand.hbm [shape: bf16[128,128], index: 1, kind: input, shape index: {}]   ;;  %s7652_s2 = inlined_call_operand.vmem [shape: f32[1,128], index: 2, kind: input, shape index: {}]   ;;  %s7653_s3 = inlined_call_operand.vmem [shape: f32[1,128], index: 3, kind: input, shape index: {}]   ;;  %s7654_s4 = inlined_call_operand.hbm [shape: bf16[3,384,128], index: 4, kind: input, shape index: {}]   ;;  %s7655_s5 = inlined_call_operand.vmem [shape: f32[1,128], index: 5, kind: input, shape index: {}]   ;;  %s7656_s6 = inlined_call_operand.vmem [shape: f32[1,128], index: 6, kind: input, shape index: {}]   ;;  %s7657_s7 = inlined_call_operand.hbm [shape: bf16[128,128], index: 7, kind: input, shape index: {}]   ;;  %s7658_s8 = inlined_call_operand.vmem [shape: f32[1,128], index: 8, kind: input, shape index: {}]   ;;  %s7659_s9 = inlined_call_operand.vmem [shape: f32[1,128], index: 9, kind: input, shape index: {}]   ;;  %s7660_s10 = inlined_call_operand.hbm [shape: bf16[2,16,16,128], index: 10, kind: output, shape index: {}]  }
   0x1   :  { %7674 = sst [smem:[#allocation22_spill]] %s7656_s6 }
   0x2   :  { %7675 = sst [smem:[#allocation23_spill]] %s7658_s8 }
   0x3   :  { %7676 = sst [smem:[#allocation24_spill]] %s7659_s9 }
   0x4   :  { %7677 = sst [smem:[#allocation25_spill]] %s7660_s10 }
   0x5   :  { %15 = vsyncpa [#allocation4], 0 }
   0x6   :  { %17 = vsyncpa [#allocation4 + $0x1], 0 }
   0x7   :  { %18 = vsyncpa [#allocation7], 0 }
   0x8   :  { %19 = vsyncpa [#allocation10], 0 }
   0x9   :  { %20 = vsyncpa [#allocation5], 0 }
   0xa   :  { %22 = vsyncpa [#allocation5 + $0x1], 0  ;;  %s5994_s13 = smov 0   ;;  %s5996_s14 = smov 0  }
   0xb   :  { %s5998_s15 = smov 0   ;;  %s6000_s16 = smov 0  }
   0xc   :  { %s6002_s17 = smov 0   ;;  %s6004_s18 = smov 0  }
   0xd LB: > { %7678 = sst [smem:[#allocation16_spill]] %s5905_s13  ;;  %s3923_s19 = sadd.s32 4294967295, %s5925_s18   ;;  %s5925_s18 = sphi %s6004_s18, %s28_s18   ;;  %s5921_s17 = sphi %s6002_s17, %s7767_s17   ;;  %s5917_s16 = sphi %s6000_s16, %s7766_s16   ;;  %s5913_s15 = sphi %s5998_s15, %s7765_s15   ;;  %s5909_s14 = sphi %s5996_s14, %s7764_s14   ;;  %s5905_s13 = sphi %s5994_s13, %s7763_s13  }
   0xe   : > { %7679 = sst [smem:[#allocation17_spill]] %s5917_s16  ;;  %s3924_s20 = sadd.s32 4294967294, %s5925_s18  }
   0xf   : > { %p60_p0 = scmp.ne.s32.totalorder %s5909_s14, %s5905_s13  ;;  %p6028_p1 = scmp.eq.s32.totalorder %s3923_s19, 0 }
  0x10   : > { %p6032_p2 = scmp.eq.s32.totalorder %s3923_s19, 1  ;;  %p281_p3 = scmp.eq.s32.totalorder %s3924_s20, 1 }
  0x11   : > { %s7680_s21 = scalar_select %p6028_p1, 1, 0 }
  0x12   : > { %s7681_s22 = scalar_select %p6032_p2, 1, 0 }
  0x13   : > { %p6038_p4 = por %p6028_p1, %p60_p0  ;;  %p3925_p5 = scmp.ge.s32.totalorder %s5925_s18, 1 }
  0x14   : > { %p6043_p6 = por %p281_p3, %p60_p0  ;;  %p288_p7 = scmp.lt.s32.totalorder %s5925_s18, 3 }
  0x15   : > { %s7682_s23 = scalar_select %p6038_p4, 1, 0 }
  0x16   : > { %s7683_s24 = scalar_select %p6043_p6, 1, 0 }
  0x17   : > { %p6048_p8 = pnand %p3925_p5, %p288_p7  ;;  %s5927_s26 = smov [#allocation6]  }
  0x18   : > { %7684 = sst [smem:[#allocation18_spill]] %s7683_s24  ;;  %s300_s27 = sshll.u32 %s5927_s26, 4  ;;  %s6052_s27 = int_to_ptr.vmem [resolvable:$true] %s300_s27 }
  0x19   : > { %s7685_s25 = scalar_select %p6048_p8, 1, 0 }
  0x1a   : > { %p5497_p9 = pneg %p6048_p8  ;;  %s5928_s29 = smov [#allocation8]  }
  0x1b   : > { %s319_s30 = sshll.u32 %s5928_s29, 4  ;;  %s5929_s11 = smov [#allocation9]   ;;  %s6063_s30 = int_to_ptr.vmem [resolvable:$true] %s319_s30 }
  0x1c   : > { %p6059_p11 = pnand %p5497_p9, %p6028_p1  ;;  %s6065_s12 = sshll.u32 %s5929_s11, 4  ;;  %s339_s12 = int_to_ptr.vmem [resolvable:$true] %s6065_s12 }
  0x1d   : > { %s5721_s26 = scalar_lea.hbm %s7651_s1, 1024 }
  0x1e   : > { %p5722_p12 = scmp.ne.s32.totalorder %s7651_s1, %s5721_s26  ;;  %p6075_p13 = pneg %p6059_p11 }
  0x1f   : > { %p5728_p5 = scmp.lt.u32.totalorder %s5721_s26, %s7651_s1 }
  0x20   : > { %p5724_p0 = pnand %p6075_p13, %p5722_p12 }
  0x22   : > { %p5725_p3 = pneg %p5724_p0 }
  0x24   : > { %p5730_p7 = pnand %p5728_p5, %p5725_p3 }
  0x26   : > { %5733 = shalt.err (!%p5730_p7)
}
  0x27   : > { %s5734_s13 = scalar_lea.vmem %s6052_s27, 1024  ;;  %p5742_p1 = scmp.lt.s32.totalorder %s6052_s27, %s6052_s27 }
  0x28   : > { %p5735_p9 = scmp.ne.s32.totalorder %s6052_s27, %s5734_s13  ;;  %p5743_p4 = scmp.lt.s32.totalorder %s5734_s13, %s5734_s13 }
  0x2a   : > { %p5737_p10 = pnand %p5735_p9, %p6075_p13  ;;  %p5744_p12 = por %p5743_p4, %p5742_p1 }
  0x2c   : > { %p5738_p6 = pneg %p5737_p10 }
  0x2e   : > { %p5745_p0 = pnand %p5744_p12, %p5738_p6 }
  0x30   : > { %5748 = shalt.err (!%p5745_p0)
}
  0x31   : > { %s5930_s24 = smov 64   ;;  %s5931_s19 = smov 4  }
  0x32   : > { %5500 = dma.hbm_to_vmem [thread:$0]  (!%p6059_p11), %s7651_s1, 1024, %s6052_s27, [#allocation7], %s5930_s24, %s5930_s24, %s5931_s19  }
  0x33   : > { %s5749_s13 = scalar_lea.hbm %s7654_s4, 9216 }
  0x34   : > { %p5750_p1 = scmp.ne.s32.totalorder %s7654_s4, %s5749_s13  ;;  %p5756_p10 = scmp.lt.u32.totalorder %s5749_s13, %s7654_s4 }
  0x36   : > { %p5752_p4 = pnand %p5750_p1, %p6075_p13 }
  0x38   : > { %p5753_p6 = pneg %p5752_p4 }
  0x3a   : > { %p5758_p3 = pnand %p5756_p10, %p5753_p6 }
  0x3c   : > { %5761 = shalt.err (!%p5758_p3)
}
  0x3d   : > { %s5762_s27 = scalar_lea.vmem %s6063_s30, 9216  ;;  %p5770_p12 = scmp.lt.s32.totalorder %s6063_s30, %s6063_s30 }
  0x3e   : > { %p5763_p5 = scmp.ne.s32.totalorder %s6063_s30, %s5762_s27  ;;  %p5771_p0 = scmp.lt.s32.totalorder %s5762_s27, %s5762_s27 }
  0x40   : > { %p5765_p7 = pnand %p5763_p5, %p6075_p13  ;;  %p5772_p1 = por %p5771_p0, %p5770_p12 }
  0x42   : > { %p5766_p9 = pneg %p5765_p7 }
  0x44   : > { %p5773_p4 = pnand %p5772_p1, %p5766_p9 }
  0x46   : > { %5776 = shalt.err (!%p5773_p4)
}
  0x47   : > { %5503 = dma.hbm_to_vmem [thread:$0]  (!%p6059_p11), %s7654_s4, 9216, %s6063_s30, [#allocation7], %s5930_s24, %s5930_s24, %s5931_s19  }
  0x48   : > { %s5777_s20 = scalar_lea.hbm %s7657_s7, 1024 }
  0x49   : > { %p5778_p6 = scmp.ne.s32.totalorder %s7657_s7, %s5777_s20  ;;  %p5784_p5 = scmp.lt.u32.totalorder %s5777_s20, %s7657_s7 }
  0x4b   : > { %p5780_p10 = pnand %p5778_p6, %p6075_p13 }
  0x4d   : > { %p5781_p3 = pneg %p5780_p10 }
  0x4f   : > { %p5786_p7 = pnand %p5784_p5, %p5781_p3 }
  0x51   : > { %5789 = shalt.err (!%p5786_p7)
}
  0x52   : > { %s5790_s27 = scalar_lea.vmem %s339_s12, 1024  ;;  %p5798_p1 = scmp.lt.s32.totalorder %s339_s12, %s339_s12 }
  0x53   : > { %p5791_p9 = scmp.ne.s32.totalorder %s339_s12, %s5790_s27  ;;  %p5799_p4 = scmp.lt.s32.totalorder %s5790_s27, %s5790_s27 }
  0x55   : > { %p5793_p12 = pnand %p5791_p9, %p6075_p13  ;;  %p5800_p8 = por %p5799_p4, %p5798_p1 }
  0x57   : > { %p5794_p0 = pneg %p5793_p12 }
  0x59   : > { %p5801_p2 = pnand %p5800_p8, %p5794_p0 }
  0x5b   : > { %5804 = shalt.err (!%p5801_p2)
}
  0x5c   : > { %5506 = dma.hbm_to_vmem [thread:$0]  (!%p6059_p11), %s7657_s7, 1024, %s339_s12, [#allocation10], %s5930_s24, %s5930_s24, %s5931_s19  }
  0x5d   : > { %s47_s10 = sadd.s32 1, %s5913_s15  ;;  %s40_s28 = sadd.s32 1, %s5921_s17 }
  0x5e   : > { %p54_p2 = scmp.ne.s32.totalorder %s5913_s15, %s5909_s14  ;;  %p42_p8 = scmp.ge.s32.totalorder %s40_s28, 2 }
  0x5f   : > { %p55_p13 = scmp.eq.s32.totalorder %s5925_s18, 0  ;;  %p7688_p6 = scmp.ne.s32.totalorder %s7681_s22, 0 }
  0x60   : > { %p5518_p3 = scmp.lt.s32.totalorder %s5925_s18, 2  ;;  %s7769_s28 = smov (%p42_p8, %s40_s28), 0 }
  0x61   : > { %p6154_p10 = por %p7688_p6, %p54_p2  ;;  %p56_p5 = por %p55_p13, %p54_p2 }
  0x62   : > { %s358_s9 = sand.u32 1, %s5913_s15   ;;  %s44_s16 = ssub.s32 %s5921_s17, %s7769_s28 }
  0x63   : > { %p45_p7 = scmp.eq.s32.totalorder %s44_s16, 0  ;;  %s3930_s12 = sshll.u32 %s358_s9, 7 }
  0x64   : > { %s4090_s20 = sshll.u32 %s5921_s17, 11  ;;  %s362_s13 = scalar_lea.vmem [#allocation3], %s3930_s12 }
  0x65   : > { %s6166_s26 = scalar_select %p45_p7, %s5913_s15, %s47_s10  }
  0x66   : > { %s6171_s22 = scalar_lea.hbm %s7650_s0, %s4090_s20  ;;  %s369_s27 = sshll.u32 %s362_s13, 4  ;;  %s6173_s27 = int_to_ptr.vmem [resolvable:$true] %s369_s27 }
  0x67   : > { %p6177_p11 = pnand %p5518_p3, %p56_p5  ;;  %s6181_s6 = scalar_lea.sflag [#allocation4], %s358_s9 }
  0x68   : > { %s5805_s10 = scalar_lea.hbm %s6171_s22, 2048  ;;  %s5810_s20 = scalar_lea.hbm %s7650_s0, 4096 }
  0x69   : > { %p5806_p9 = scmp.ne.s32.totalorder %s6171_s22, %s5805_s10  ;;  %p5807_p12 = pneg %p6177_p11 }
  0x6a   : > { %p5811_p4 = scmp.lt.u32.totalorder %s6171_s22, %s7650_s0  ;;  %p5812_p2 = scmp.lt.u32.totalorder %s5810_s20, %s5805_s10 }
  0x6b   : > { %p5808_p0 = pnand %p5807_p12, %p5806_p9  ;;  %p5814_p13 = scmp.lt.u32.totalorder %s5805_s10, %s6171_s22 }
  0x6c   : > { %p5813_p8 = por %p5812_p2, %p5811_p4 }
  0x6d   : > { %p5809_p1 = pneg %p5808_p0 }
  0x6e   : > { %p5815_p6 = por %p5814_p13, %p5813_p8 }
  0x70   : > { %p5816_p3 = pnand %p5815_p6, %p5809_p1 }
  0x72   : > { %5819 = shalt.err (!%p5816_p3)
}
  0x73   : > { %s5820_s9 = scalar_lea.vmem %s6173_s27, 2048  ;;  %s5932_s13 = smov [#allocation3]  }
  0x74   : > { %p5821_p5 = scmp.ne.s32.totalorder %s6173_s27, %s5820_s9  ;;  %s5825_s16 = sshll.u32 %s5932_s13, 4  ;;  %s5826_s16 = int_to_ptr.vmem [resolvable:$false] %s5825_s16 }
  0x75   : > { %s5827_s12 = scalar_lea.vmem %s5826_s16, 4096  ;;  %p5828_p0 = scmp.lt.s32.totalorder %s6173_s27, %s5826_s16 }
  0x76   : > { %p5823_p7 = pnand %p5821_p5, %p5807_p12  ;;  %p5829_p4 = scmp.lt.s32.totalorder %s5827_s12, %s5820_s9 }
  0x78   : > { %p5824_p9 = pneg %p5823_p7  ;;  %p5830_p2 = por %p5829_p4, %p5828_p0 }
  0x7a   : > { %p5831_p8 = pnand %p5830_p2, %p5824_p9 }
  0x7c   : > { %5834 = shalt.err (!%p5831_p8)
}
  0x7d   : > { %5510 = dma.hbm_to_vmem [thread:$0]  (!%p6177_p11), %s6171_s22, 2048, %s6173_s27, %s6181_s6, %s5930_s24, %s5930_s24, %s5931_s19  }
  0x7e   : > { %p7691_p12 = scmp.ne.s32.totalorder %s7685_s25, 0 }
  0x80   : > { %381 = sbr.rel (%p7691_p12) target bundleno = 1189 (0x4a5), region = 60 }
  0x87   : > { %s6215_s10 = sand.u32 1, %s5909_s14   ;;  %p7692_p1 = scmp.ne.s32.totalorder %s7682_s23, 0 }
  0x88   : > { %s3934_s20 = sshll.u32 %s6215_s10, 7  ;;  %s384_s29 = scalar_lea.sflag [#allocation4], %s6215_s10 }
  0x89   : > { %s6221_s30 = scalar_lea.vmem [#allocation3], %s3934_s20 }
  0x8a   : > { %5888 = dma.done.wait (%p7692_p1), %s384_s29, 2048  }
  0x8b   : > { %5890 = vsyncadd (%p7692_p1), %s384_s29, 4294965248  ;;  %p7693_p11 = scmp.ne.s32.totalorder %s7680_s21, 0 }
  0x8d   : > { %5892 = dma.done.wait (%p7693_p11), [#allocation7], 10240  }
  0x8e   : > { %5894 = vsyncadd (%p7693_p11), [#allocation7], 4294957056 }
  0x8f   : > { %5896 = dma.done.wait (%p7693_p11), [#allocation10], 1024  }
  0x90   : > { %5898 = vsyncadd (%p7693_p11), [#allocation10], 4294966272  ;;  %v5583_v0 = vld [vmem:[#allocation6] sm:$0xff]   ;;  %v5584_v1 = vld [vmem:[#allocation6 + $0x8] sm:$0xff]   ;;  %v1039_v45 = vlaneseq  ;;  %vm5933_vm4 = vmmov 1   ;;  %s7754_s11 = sld [smem:[#allocation22_spill]] }
  0x91   : > { %5061 = vmatprep.subr.bf16.mxu0 %v5583_v0  ;;  %5305 = vmatprep.subr.bf16.mxu1 %v5583_v0  ;;  %v5585_v2 = vld [vmem:[#allocation6 + $0x10] sm:$0xff]   ;;  %v5586_v3 = vld [vmem:[#allocation6 + $0x18] sm:$0xff]   ;;  %v5591_v4 = vld [vmem:[%s6221_s30] sm:$0xff]   ;;  %s7755_s16 = sld [smem:[#allocation23_spill]]  ;;  %s7756_s21 = sld [smem:[#allocation24_spill]] }
  0x92   : > { %5062 = vmatpush3.bf16.msra.mxu0 %v5583_v0  ;;  %5313 = vmatpush3.bf16.msra.mxu1 %v5583_v0  ;;  %v5587_v5 = vld [vmem:[#allocation6 + $0x20] sm:$0xff]   ;;  %v456_v6 = vld [vmem:[%s6221_s30 + $0x38] sm:$0xff]   ;;  %v5588_v7 = vld [vmem:[#allocation6 + $0x28] sm:$0xff]   ;;  %v6253_v46 = vshrl.u32 %v1039_v45, 7  ;;  %s7514_s23 = scalar_lea.vmem [#allocation11], %s3934_s20  ;;  %s7757_s20 = sld [smem:[#allocation17_spill]] }
  0x93   : > { %5063 = vmatprep.subr.bf16.mxu0 %v5584_v1  ;;  %5306 = vmatprep.subr.bf16.mxu1 %v5584_v1  ;;  %v5589_v8 = vld [vmem:[#allocation6 + $0x30] sm:$0xff]   ;;  %v5590_v9 = vld [vmem:[#allocation6 + $0x38] sm:$0xff]   ;;  %v442_v10 = vld [vmem:[%s6221_s30] sm:$0xff]   ;;  %s3804_s25 = sshll.u32 %s7514_s23, 4  ;;  %s7758_s22 = sld [smem:[#allocation25_spill]]  ;;  %s7599_s25 = int_to_ptr.vmem [resolvable:$true] %s3804_s25 }
  0x94   : > { %5077 = vmatprep.mubr.bf16.mxu0 %v5591_v4  ;;  %5093 = vmatprep.mubr.bf16.mxu1 %v456_v6  ;;  %v458_v11 = vld [vmem:[%s6221_s30 + $0x40] sm:$0xff]   ;;  %v444_v12 = vld [vmem:[%s6221_s30 + $0x8] sm:$0xff]   ;;  %v446_v19 = vld [vmem:[%s6221_s30 + $0x10] sm:$0xff]   ;;  %v6256_v50 = vadd.s32 8, %v6253_v46  ;;  %vm1080_vm0 = vcmp.lt.s32.totalorder %v6253_v46, 1  ;;  %vm1195_vm1 = vcmp.lt.s32.totalorder %v6253_v46, 7 }
  0x95   : > { %v460_v13 = vld [vmem:[%s6221_s30 + $0x48] sm:$0xff]   ;;  %v5609_v14 = vld [vmem:[#allocation8 + $0x100] sm:$0xff]   ;;  %v462_v20 = vld [vmem:[%s6221_s30 + $0x50] sm:$0xff]   ;;  %vm5522_vm2 = vcmp.ne.s32.totalorder %v6253_v46, 0  ;;  %s3788_s6 = scalar_lea.sflag [#allocation5], %s6215_s10  ;;  %s5936_s9 = smov [#allocation11]  }
  0x96   : > { %5064 = vmatpush3.bf16.msra.mxu0 %v5584_v1  ;;  %5314 = vmatpush3.bf16.msra.mxu1 %v5584_v1  ;;  %v5614_v15 = vld [vmem:[#allocation8 + $0x140] sm:$0xff]   ;;  %v5611_v17 = vld [vmem:[#allocation8 + $0x108] sm:$0xff]   ;;  %v448_v21 = vld [vmem:[%s6221_s30 + $0x18] sm:$0xff]   ;;  %vm5523_vm3 = vcmp.ne.s32.totalorder %v6256_v50, 15  ;;  %s5839_s13 = sshll.u32 %s5936_s9, 4  ;;  %s5840_s13 = int_to_ptr.vmem [resolvable:$false] %s5839_s13 }
  0x97   : > { %5065 = vmatprep.subr.bf16.mxu0 %v5585_v2  ;;  %5307 = vmatprep.subr.bf16.mxu1 %v5585_v2  ;;  %v5610_v16 = vld [vmem:[#allocation8 + $0xc0] sm:$0xff]   ;;  %v5617_v18 = vld [vmem:[#allocation8 + $0x148] sm:$0xff]   ;;  %v464_v22 = vld [vmem:[%s6221_s30 + $0x58] sm:$0xff]   ;;  %p5842_p5 = scmp.lt.s32.totalorder %s7599_s25, %s5840_s13 }
  0x98   : > { %v5612_v23 = vld [vmem:[#allocation8 + $0xc8] sm:$0xff]   ;;  %v5613_v24 = vld [vmem:[#allocation8 + $0x110] sm:$0xff]   ;;  %v5616_v27 = vld [vmem:[#allocation8 + $0x118] sm:$0xff]  }
  0x99   : > { %v5620_v25 = vld [vmem:[#allocation8 + $0x150] sm:$0xff]   ;;  %v450_v28 = vld [vmem:[%s6221_s30 + $0x20] sm:$0xff]   ;;  %v452_v30 = vld [vmem:[%s6221_s30 + $0x28] sm:$0xff]  }
  0x9a   : > { %5066 = vmatpush3.bf16.msra.mxu0 %v5585_v2  ;;  %5315 = vmatpush3.bf16.msra.mxu1 %v5585_v2  ;;  %v5615_v26 = vld [vmem:[#allocation8 + $0xd0] sm:$0xff]   ;;  %v466_v29 = vld [vmem:[%s6221_s30 + $0x60] sm:$0xff]   ;;  %v468_v31 = vld [vmem:[%s6221_s30 + $0x68] sm:$0xff]  }
  0x9b   : > { %5067 = vmatprep.subr.bf16.mxu0 %v5586_v3  ;;  %5308 = vmatprep.subr.bf16.mxu1 %v5586_v3  ;;  %v5618_v32 = vld [vmem:[#allocation8 + $0xd8] sm:$0xff]   ;;  %v5619_v33 = vld [vmem:[#allocation8 + $0x120] sm:$0xff]   ;;  %v454_v35 = vld [vmem:[%s6221_s30 + $0x30] sm:$0xff]  }
  0x9c   : > { %v5621_v34 = vld [vmem:[#allocation8 + $0xe0] sm:$0xff]   ;;  %v470_v36 = vld [vmem:[%s6221_s30 + $0x70] sm:$0xff]   ;;  %v472_v37 = vld [vmem:[%s6221_s30 + $0x78] sm:$0xff]  }
  0x9d   : > { %v5608_v38 = vld [vmem:[%s6221_s30 + $0x78] sm:$0xff]   ;;  %v5622_v39 = vld [vmem:[#allocation8 + $0x128] sm:$0xff]   ;;  %v5625_v42 = vld [vmem:[#allocation8 + $0x130] sm:$0xff]  }
  0x9e   : > { %5068 = vmatpush3.bf16.msra.mxu0 %v5586_v3  ;;  %5316 = vmatpush3.bf16.msra.mxu1 %v5586_v3  ;;  %v5623_v40 = vld [vmem:[#allocation8 + $0x158] sm:$0xff]   ;;  %v5624_v41 = vld [vmem:[#allocation8 + $0xe8] sm:$0xff]   ;;  %v5626_v43 = vld [vmem:[#allocation8 + $0x160] sm:$0xff]  }
  0x9f   : > { %5069 = vmatprep.subr.bf16.mxu0 %v5587_v5  ;;  %5309 = vmatprep.subr.bf16.mxu1 %v5587_v5  ;;  %v5627_v44 = vld [vmem:[#allocation8 + $0xf0] sm:$0xff]   ;;  %v5628_v47 = vld [vmem:[#allocation8 + $0x138] sm:$0xff]   ;;  %v5629_v48 = vld [vmem:[#allocation8 + $0x168] sm:$0xff]  }
  0xa0   : > { %v5630_v49 = vld [vmem:[#allocation8 + $0xf8] sm:$0xff]   ;;  %v5631_v51 = vld [vmem:[#allocation8 + $0x170] sm:$0xff]   ;;  %v6258_v53 = vld [vmem:[#allocation8 + $0x80] sm:$0xff]  }
  0xa1   : > { %v5632_v52 = vld [vmem:[#allocation8 + $0x178] sm:$0xff]   ;;  %v5641_v54 = vld [vmem:[#allocation8 + $0x40] sm:$0xff]   ;;  %vm6317_vm5 = vmpackc.low %vm5933_vm4, %vm5522_vm2 }
  0xa2   : > { %5070 = vmatpush3.bf16.msra.mxu0 %v5587_v5  ;;  %5317 = vmatpush3.bf16.msra.mxu1 %v5587_v5  ;;  %v6264_v55 = vld [vmem:[%s7652_s2] ss:$0 sm:$0xff]  ;;  %vm6334_vm6 = vmpackc.low %vm5523_vm3, %vm5933_vm4 }
  0xa3   : > { %5071 = vmatprep.subr.bf16.mxu0 %v5588_v7  ;;  %5310 = vmatprep.subr.bf16.mxu1 %v5588_v7  ;;  %v6269_v57 = vld [vmem:[%s7653_s3] ss:$0 sm:$0xff] }
  0xa4   : > { %v5644_v46 = vld [vmem:[#allocation8 + $0x180] sm:$0xff]  }
  0xa6   : > { %5072 = vmatpush3.bf16.msra.mxu0 %v5588_v7  ;;  %5318 = vmatpush3.bf16.msra.mxu1 %v5588_v7 }
  0xa7   : > { %5073 = vmatprep.subr.bf16.mxu0 %v5589_v8  ;;  %5311 = vmatprep.subr.bf16.mxu1 %v5589_v8 }
  0xaa   : > { %5074 = vmatpush3.bf16.msra.mxu0 %v5589_v8  ;;  %5319 = vmatpush3.bf16.msra.mxu1 %v5589_v8 }
  0xab   : > { %5075 = vmatprep.subr.bf16.mxu0 %v5590_v9  ;;  %5312 = vmatprep.subr.bf16.mxu1 %v5590_v9 }
  0xae   : > { %5076 = vmatpush3.bf16.msra.mxu0 %v5590_v9  ;;  %5320 = vmatpush3.bf16.msra.mxu1 %v5590_v9 }
  0xaf   : > { %4629 = vmatprep.subr.bf16.mxu1 %v5609_v14  ;;  %5113 = vmatprep.subr.bf16.mxu0 %v5614_v15 }
  0xb1   : > { %5078 = vmatmul.mubr.bf16.vlgmr.msra.gmra.mrb[0].mxu0 %v442_v10  ;;  %5094 = vmatmul.mubr.bf16.vlgmr.msra.gmra.mrb[0].mxu1 %v458_v11 }
  0xb2   : > { %5081 = vmatprep.mubr.bf16.mxu0 %v444_v12  ;;  %5097 = vmatprep.mubr.bf16.mxu1 %v460_v13 }
  0xb3   : > { %4630 = vmatpush3.bf16.msra.mxu1 %v5610_v16  ;;  %5114 = vmatpush3.bf16.msra.mxu0 %v5614_v15 }
  0xb4   : > { %4631 = vmatprep.subr.bf16.mxu1 %v5611_v17  ;;  %5115 = vmatprep.subr.bf16.mxu0 %v5617_v18 }
  0xb7   : > { %4632 = vmatpush3.bf16.msra.mxu1 %v5612_v23  ;;  %5116 = vmatpush3.bf16.msra.mxu0 %v5617_v18 }
  0xb8   : > { %4633 = vmatprep.subr.bf16.mxu1 %v5613_v24  ;;  %5117 = vmatprep.subr.bf16.mxu0 %v5620_v25 }
  0xb9   : > { %5082 = vmatmul.mubr.bf16.gmra.mrb[4].mxu0 %v446_v19  ;;  %5098 = vmatmul.mubr.bf16.gmra.mrb[4].mxu1 %v462_v20 }
  0xba   : > { %5085 = vmatprep.mubr.bf16.mxu0 %v448_v21  ;;  %5101 = vmatprep.mubr.bf16.mxu1 %v464_v22 }
  0xbb   : > { %4634 = vmatpush3.bf16.msra.mxu1 %v5615_v26  ;;  %5118 = vmatpush3.bf16.msra.mxu0 %v5620_v25 }
  0xbc   : > { %4635 = vmatprep.subr.bf16.mxu1 %v5616_v27  ;;  %5119 = vmatprep.subr.bf16.mxu0 %v5623_v40 }
  0xbf   : > { %4636 = vmatpush3.bf16.msra.mxu1 %v5618_v32  ;;  %5120 = vmatpush3.bf16.msra.mxu0 %v5623_v40 }
  0xc0   : > { %4637 = vmatprep.subr.bf16.mxu1 %v5619_v33  ;;  %5121 = vmatprep.subr.bf16.mxu0 %v5626_v43 }
  0xc1   : > { %5086 = vmatmul.mubr.bf16.gmra.mrb[8].mxu0 %v450_v28  ;;  %5102 = vmatmul.mubr.bf16.gmra.mrb[8].mxu1 %v466_v29 }
  0xc2   : > { %5089 = vmatprep.mubr.bf16.mxu0 %v452_v30  ;;  %5105 = vmatprep.mubr.bf16.mxu1 %v468_v31 }
  0xc3   : > { %4638 = vmatpush3.bf16.msra.mxu1 %v5621_v34  ;;  %5122 = vmatpush3.bf16.msra.mxu0 %v5626_v43 }
  0xc4   : > { %4639 = vmatprep.subr.bf16.mxu1 %v5622_v39  ;;  %5123 = vmatprep.subr.bf16.mxu0 %v5629_v48 }
  0xc7   : > { %4640 = vmatpush3.bf16.msra.mxu1 %v5624_v41  ;;  %5124 = vmatpush3.bf16.msra.mxu0 %v5629_v48 }
  0xc8   : > { %4641 = vmatprep.subr.bf16.mxu1 %v5625_v42  ;;  %5125 = vmatprep.subr.bf16.mxu0 %v5631_v51  ;;  %v5683_v42 = vld [vmem:[#allocation9 + $0x10] sm:$0xff]  }
  0xc9   : > { %5090 = vmatmul.mubr.bf16.gmra.mrb[12].mxu0 %v454_v35  ;;  %5106 = vmatmul.mubr.bf16.gmra.mrb[12].mxu1 %v470_v36 }
  0xca   : > { %5109 = vmatprep.mubr.bf16.mxu1 %v472_v37 }
  0xcb   : > { %4642 = vmatpush3.bf16.msra.mxu1 %v5627_v44  ;;  %5126 = vmatpush3.bf16.msra.mxu0 %v5631_v51  ;;  %v5642_v44 = vld [vmem:[#allocation8] sm:$0xff]   ;;  %v5647_v51 = vld [vmem:[#allocation8 + $0x48] sm:$0xff]  }
  0xcc   : > { %4643 = vmatprep.subr.bf16.mxu1 %v5628_v47  ;;  %5127 = vmatprep.subr.bf16.mxu0 %v5632_v52 }
  0xcf   : > { %4644 = vmatpush3.bf16.msra.mxu1 %v5630_v49  ;;  %5128 = vmatpush3.bf16.msra.mxu0 %v5632_v52 }
  0xd0   : > { %5161 = vmatprep.subr.bf16.mxu0 %v6258_v53  ;;  %4765 = vmatprep.subr.bf16.mxu1 %v5641_v54 }
  0xd1   : > { %5110 = vmatmul.mubr.bf16.gmra.mrb[16].mxu1 %v5608_v38 }
 0x184   : > { %v5079_v56 = vpop.f32.mrb[0].mxu0  ;;  %v5095_v58 = vpop.f32.mrb[0].mxu1 }
 0x185   : > { %v848_v59 = vmul.f32 %v5079_v56, %v6264_v55  ;;  %v696_v60 = vpop.f32.mrb[1].mxu0  ;;  %v864_v61 = vmul.f32 %v5095_v58, %v6264_v55  ;;  %v760_v62 = vpop.f32.mrb[1].mxu1 }
 0x186   : > { %v5080_v63 = vpop.f32.mrb[2].mxu0  ;;  %v862_v0 = vmul.f32 %v6264_v55, %v760_v62  ;;  %v5096_v1 = vpop.f32.mrb[2].mxu1 }
 0x187   : > { %v891_v2 = vadd.f32 %v6269_v57, %v848_v59  ;;  %v849_v3 = vmul.f32 %v5080_v63, %v6264_v55  ;;  %v699_v4 = vpop.f32.mrb[3].mxu0  ;;  %v907_v5 = vadd.f32 %v6269_v57, %v864_v61  ;;  %v865_v6 = vmul.f32 %v5096_v1, %v6264_v55  ;;  %v763_v7 = vpop.f32.mrb[3].mxu1  ;;  %v5668_v59 = vld [vmem:[#allocation8 + $0x30] sm:$0xff]  }
 0x188   : > { %v905_v8 = vadd.f32 %v6269_v57, %v862_v0  ;;  %v863_v9 = vmul.f32 %v6264_v55, %v763_v7 }
 0x189   : > { %v927_v10 = vmax.f32 %v891_v2, 0.0  ;;  %v892_v11 = vadd.f32 %v6269_v57, %v849_v3  ;;  %v6284_v12 = vmax.f32 %v907_v5, 0.0  ;;  %v908_v13 = vadd.f32 %v6269_v57, %v865_v6  ;;  %v5648_v3 = vld [vmem:[#allocation8 + $0x8] sm:$0xff]  }
 0x18a   : > { %v6288_v14 = vmax.f32 %v905_v8, 0.0  ;;  %v906_v15 = vadd.f32 %v6269_v57, %v863_v9 }
 0x18b   : > { %v1045_v16 = vrot.slane %v927_v10, 7  ;;  %v1160_v17 = vrot.slane %v927_v10, 1  ;;  %v928_v18 = vmax.f32 %v892_v11, 0.0  ;;  %v6294_v23 = vmax.f32 %v908_v13, 0.0 }
 0x18c   : > { %v5083_v19 = vpop.f32.mrb[4].mxu0  ;;  %v5099_v24 = vpop.f32.mrb[4].mxu1  ;;  %v6304_v35 = vmax.f32 %v906_v15, 0.0 }
 0x18d   : > { %v1063_v25 = vrot.slane %v928_v18, 7  ;;  %v1178_v26 = vrot.slane %v928_v18, 1  ;;  %v852_v27 = vmul.f32 %v5083_v19, %v6264_v55  ;;  %v712_v28 = vpop.f32.mrb[5].mxu0  ;;  %v6297_v29 = vpack.c.bf16 %v928_v18, %v927_v10  ;;  %v6299_v30 = vpop.f32.mrb[5].mxu1  ;;  %v5653_v18 = vld [vmem:[#allocation8 + $0x50] sm:$0xff]  }
 0x18e   : > { %v850_v31 = vmul.f32 %v6264_v55, %v712_v28  ;;  %v5084_v32 = vpop.f32.mrb[6].mxu0  ;;  %v6306_v36 = vpop.f32.mrb[6].mxu1  ;;  %v1185_v2 = vrot.slane %v6304_v35, 1  ;;  %v6357_v8 = vmul.f32 %v5099_v24, %v6264_v55 }
 0x18f   : > { %v1082_v37 = vsel %vm1080_vm0, %v1045_v16, %v1063_v25  ;;  %v1100_v38 = vsel %vm1080_vm0, %v1063_v25, %v1045_v16  ;;  %v895_v39 = vadd.f32 %v6269_v57, %v852_v27  ;;  %v853_v40 = vmul.f32 %v5084_v32, %v6264_v55  ;;  %v715_v41 = vpop.f32.mrb[7].mxu0  ;;  %1799 = vmatprep.mubr.bf16.mxu1 %v6297_v29  ;;  %v6321_v43 = vpop.f32.mrb[7].mxu1 }
 0x190   : > { %v6323_v45 = vpack.c.bf16 %v1082_v37, %v1100_v38  ;;  %v893_v47 = vadd.f32 %v6269_v57, %v850_v31  ;;  %v851_v48 = vmul.f32 %v6264_v55, %v715_v41  ;;  %v1197_v49 = vsel %vm1195_vm1, %v1160_v17, %v1178_v26  ;;  %v5654_v41 = vld [vmem:[#allocation8 + $0x10] sm:$0xff]  }
 0x191   : > { %v6329_v52 = vmax.f32 %v895_v39, 0.0  ;;  %v896_v54 = vadd.f32 %v6269_v57, %v853_v40  ;;  %v1215_v58 = vsel %vm1195_vm1, %v1178_v26, %v1160_v17 }
 0x192   : > { %v929_v60 = vmax.f32 %v893_v47, 0.0  ;;  %v894_v61 = vadd.f32 %v6269_v57, %v851_v48  ;;  %4222 = vmatmul.mubr.msk.bf16.vlgmr.msra.gmra.mrb[20].mxu1 %vm6317_vm5, %v6323_v45  ;;  %v6345_v62 = vpack.c.bf16 %v1215_v58, %v1197_v49 }
 0x193   : > { %v1047_v63 = vrot.slane %v6329_v52, 7  ;;  %v1162_v0 = vrot.slane %v6329_v52, 1  ;;  %v6350_v1 = vmax.f32 %v896_v54, 0.0  ;;  %4766 = vmatpush3.bf16.msra.mxu1 %v5642_v44 }
 0x194   : > { %v1046_v4 = vrot.slane %v929_v60, 7  ;;  %v1161_v5 = vrot.slane %v929_v60, 1  ;;  %v930_v6 = vmax.f32 %v894_v61, 0.0  ;;  %5129 = vmatprep.mubr.msk.bf16.mxu0 %vm6334_vm6, %v6345_v62  ;;  %v5087_v7 = vpop.f32.mrb[8].mxu0  ;;  %v6359_v9 = vpop.f32.mrb[8].mxu1  ;;  %4767 = vmatprep.subr.bf16.mxu1 %v5647_v51  ;;  %v5634_v61 = vld [vmem:[#allocation8 + $0x88] sm:$0xff]  }
 0x195   : > { %v1065_v10 = vrot.slane %v6350_v1, 7  ;;  %v1180_v11 = vrot.slane %v6350_v1, 1  ;;  %v856_v13 = vmul.f32 %v5087_v7, %v6264_v55  ;;  %v728_v15 = vpop.f32.mrb[9].mxu0  ;;  %v6366_v16 = vpack.c.bf16 %v6350_v1, %v6329_v52  ;;  %v6368_v17 = vpop.f32.mrb[9].mxu1 }
 0x196   : > { %v1064_v19 = vrot.slane %v930_v6, 7  ;;  %v1179_v24 = vrot.slane %v930_v6, 1  ;;  %v854_v25 = vmul.f32 %v6264_v55, %v728_v15  ;;  %v5088_v26 = vpop.f32.mrb[10].mxu0  ;;  %v6371_v27 = vpack.c.bf16 %v930_v6, %v929_v60  ;;  %v6373_v28 = vpop.f32.mrb[10].mxu1  ;;  %v5657_v6 = vld [vmem:[#allocation8 + $0x58] sm:$0xff]  }
 0x197   : > { %v899_v31 = vadd.f32 %v6269_v57, %v856_v13  ;;  %v857_v32 = vmul.f32 %v5088_v26, %v6264_v55  ;;  %v731_v37 = vpop.f32.mrb[11].mxu0  ;;  %v1199_v38 = vsel %vm1195_vm1, %v1162_v0, %v1180_v11  ;;  %v1217_v39 = vsel %vm1195_vm1, %v1180_v11, %v1162_v0  ;;  %v6381_v40 = vpop.f32.mrb[11].mxu1  ;;  %4768 = vmatpush3.bf16.msra.mxu1 %v5648_v3 }
 0x198   : > { %v1198_v44 = vsel %vm1195_vm1, %v1161_v5, %v1179_v24  ;;  %v1216_v47 = vsel %vm1195_vm1, %v1179_v24, %v1161_v5  ;;  %v897_v48 = vadd.f32 %v6269_v57, %v854_v25  ;;  %v855_v49 = vmul.f32 %v6264_v55, %v731_v37  ;;  %1807 = vmatprep.mubr.bf16.mxu1 %v6371_v27 }
 0x199   : > { %v6390_v51 = vpack.c.bf16 %v1216_v47, %v1198_v44  ;;  %v6392_v54 = vmax.f32 %v899_v31, 0.0  ;;  %v900_v58 = vadd.f32 %v6269_v57, %v857_v32  ;;  %v1083_v60 = vsel %vm1080_vm0, %v1046_v4, %v1064_v19  ;;  %4769 = vmatprep.subr.bf16.mxu1 %v5653_v18  ;;  %v5658_v18 = vld [vmem:[#allocation8 + $0x18] sm:$0xff]   ;;  %v5660_v44 = vld [vmem:[#allocation8 + $0x60] sm:$0xff]  }
 0x19a   : > { %v6397_v0 = vmax.f32 %v897_v48, 0.0  ;;  %v898_v1 = vadd.f32 %v6269_v57, %v855_v49  ;;  %v1101_v3 = vsel %vm1080_vm0, %v1064_v19, %v1046_v4  ;;  %v6402_v5 = vpack.c.bf16 %v1217_v39, %v1199_v38  ;;  %v5635_v39 = vld [vmem:[#allocation8 + $0x90] sm:$0xff]  }
 0x19b   : > { %v1049_v7 = vrot.slane %v6392_v54, 7  ;;  %v6405_v11 = vmax.f32 %v900_v58, 0.0  ;;  %v6407_v13 = vpack.c.bf16 %v1083_v60, %v1101_v3  ;;  %5130 = vmatmul.mubr.msk.bf16.vlgmr.msra.gmra.mrb[16].mxu0 %vm6334_vm6, %v6390_v51  ;;  %v866_v15 = vmul.f32 %v6264_v55, %v6299_v30  ;;  %4770 = vmatpush3.bf16.msra.mxu1 %v5654_v41 }
 0x19c   : > { %v1164_v4 = vrot.slane %v6392_v54, 1  ;;  %v1048_v19 = vrot.slane %v6397_v0, 7  ;;  %v6416_v24 = vmax.f32 %v898_v1, 0.0  ;;  %5162 = vmatpush3.bf16.msra.mxu0 %v6258_v53  ;;  %v5091_v25 = vpop.f32.mrb[12].mxu0  ;;  %5133 = vmatprep.mubr.msk.bf16.mxu0 %vm6334_vm6, %v6402_v5  ;;  %v1084_v30 = vsel %vm1080_vm0, %v1047_v63, %v1065_v10  ;;  %v6426_v26 = vpop.f32.mrb[12].mxu1 }
 0x19d   : > { %v1163_v31 = vrot.slane %v6397_v0, 1  ;;  %v1182_v32 = vrot.slane %v6405_v11, 1  ;;  %4226 = vmatmul.mubr.msk.bf16.gmra.mrb[24].mxu1 %vm6317_vm5, %v6407_v13  ;;  %v860_v53 = vmul.f32 %v5091_v25, %v6264_v55  ;;  %v744_v37 = vpop.f32.mrb[13].mxu0  ;;  %5163 = vmatprep.subr.bf16.mxu0 %v5634_v61  ;;  %v1102_v38 = vsel %vm1080_vm0, %v1065_v10, %v1047_v63  ;;  %v6438_v41 = vpop.f32.mrb[13].mxu1 }
 0x19e   : > { %v1067_v47 = vrot.slane %v6405_v11, 7  ;;  %v1181_v48 = vrot.slane %v6416_v24, 1  ;;  %1815 = vmatprep.mubr.bf16.mxu1 %v6366_v16  ;;  %v858_v49 = vmul.f32 %v6264_v55, %v744_v37  ;;  %v5092_v58 = vpop.f32.mrb[14].mxu0  ;;  %v6444_v60 = vpack.c.bf16 %v1084_v30, %v1102_v38  ;;  %v6446_v1 = vpop.f32.mrb[14].mxu1  ;;  %4771 = vmatprep.subr.bf16.mxu1 %v5657_v6  ;;  %v5662_v30 = vld [vmem:[#allocation8 + $0x20] sm:$0xff]  }
 0x19f   : > { %v903_v52 = vadd.f32 %v6269_v57, %v860_v53  ;;  %v861_v63 = vmul.f32 %v5092_v58, %v6264_v55  ;;  %v747_v10 = vpop.f32.mrb[15].mxu0  ;;  %v6452_v3 = vpack.c.bf16 %v6416_v24, %v6397_v0  ;;  %v1201_v25 = vsel %vm1195_vm1, %v1164_v4, %v1182_v32  ;;  %v6456_v20 = vpop.f32.mrb[15].mxu1  ;;  %4772 = vmatpush3.bf16.msra.mxu1 %v5658_v18 }
 0x1a0   : > { %v901_v37 = vadd.f32 %v6269_v57, %v858_v49  ;;  %v859_v6 = vmul.f32 %v6264_v55, %v747_v10  ;;  %v1200_v53 = vsel %vm1195_vm1, %v1163_v31, %v1181_v48  ;;  %v1218_v38 = vsel %vm1195_vm1, %v1181_v48, %v1163_v31  ;;  %5164 = vmatpush3.bf16.msra.mxu0 %v5634_v61  ;;  %v5636_v49 = vld [vmem:[#allocation8 + $0x98] sm:$0xff]   ;;  %v5663_v31 = vld [vmem:[#allocation8 + $0x68] sm:$0xff]  }
 0x1a1   : > { %v6464_v58 = vmax.f32 %v903_v52, 0.0  ;;  %v904_v34 = vadd.f32 %v6269_v57, %v861_v63  ;;  %v6467_v22 = vpack.c.bf16 %v1218_v38, %v1200_v53  ;;  %v1219_v18 = vsel %vm1195_vm1, %v1182_v32, %v1164_v4  ;;  %5165 = vmatprep.subr.bf16.mxu0 %v5635_v39  ;;  %4773 = vmatprep.subr.bf16.mxu1 %v5660_v44  ;;  %v5664_v32 = vld [vmem:[#allocation8 + $0x28] sm:$0xff]   ;;  %v5666_v38 = vld [vmem:[#allocation8 + $0x70] sm:$0xff]  }
 0x1a2   : > { %v6471_v10 = vmax.f32 %v901_v37, 0.0  ;;  %v902_v50 = vadd.f32 %v6269_v57, %v859_v6  ;;  %v6474_v21 = vpack.c.bf16 %v1219_v18, %v1201_v25  ;;  %v911_v61 = vadd.f32 %v6269_v57, %v6357_v8  ;;  %v5637_v6 = vld [vmem:[#allocation8 + $0xa0] sm:$0xff]  }
 0x1a3   : > { %v1066_v48 = vrot.slane %v6416_v24, 7  ;;  %v6480_v63 = vmax.f32 %v904_v34, 0.0  ;;  %5134 = vmatmul.mubr.msk.bf16.gmra.mrb[20].mxu0 %vm6334_vm6, %v6467_v22  ;;  %v909_v4 = vadd.f32 %v6269_v57, %v866_v15  ;;  %4774 = vmatpush3.bf16.msra.mxu1 %v5662_v30  ;;  %v1166_v44 = vrot.slane %v6464_v58, 1 }
 0x1a4   : > { %v6488_v8 = vmax.f32 %v902_v50, 0.0  ;;  %5137 = vmatprep.mubr.msk.bf16.mxu0 %vm6334_vm6, %v6474_v21  ;;  %v6493_v34 = vmax.f32 %v911_v61, 0.0  ;;  %5166 = vmatpush3.bf16.msra.mxu0 %v5635_v39  ;;  %v5111_v24 = vpop.f32.mrb[16].mxu1  ;;  %v1165_v37 = vrot.slane %v6471_v10, 1  ;;  %v869_v50 = vmul.f32 %v6306_v36, %v6264_v55  ;;  %v5669_v36 = vld [vmem:[#allocation8 + $0x78] sm:$0xff]  }
 0x1a5   : > { %4230 = vmatmul.mubr.msk.bf16.gmra.mrb[28].mxu1 %vm6317_vm5, %v6444_v60  ;;  %v6500_v30 = vmax.f32 %v909_v4, 0.0  ;;  %5167 = vmatprep.subr.bf16.mxu0 %v5636_v49  ;;  %v6504_v53 = vpop.f32.mrb[17].mxu1  ;;  %v1184_v39 = vrot.slane %v6480_v63, 1  ;;  %v1085_v25 = vsel %vm1080_vm0, %v1048_v19, %v1066_v48  ;;  %v867_v24 = vmul.f32 %v6264_v55, %v6321_v43 }
 0x1a6   : > { %v1183_v61 = vrot.slane %v6488_v8, 1  ;;  %1823 = vmatprep.mubr.bf16.mxu1 %v6452_v3  ;;  %v5112_v4 = vpop.f32.mrb[18].mxu1  ;;  %4775 = vmatprep.subr.bf16.mxu1 %v5663_v31  ;;  %v912_v15 = vadd.f32 %v6269_v57, %v869_v50  ;;  %v1103_v31 = vsel %vm1080_vm0, %v1066_v48, %v1048_v19  ;;  %v6538_v0 = vpack.c.bf16 %v6405_v11, %v6392_v54 }
 0x1a7   : > { %v6518_v18 = vpop.f32.mrb[19].mxu1  ;;  %4776 = vmatpush3.bf16.msra.mxu1 %v5664_v32  ;;  %v6532_v32 = vpack.c.bf16 %v1085_v25, %v1103_v31  ;;  %v910_v19 = vadd.f32 %v6269_v57, %v867_v24  ;;  %v1203_v48 = vsel %vm1195_vm1, %v1166_v44, %v1184_v39  ;;  %v1221_v43 = vsel %vm1195_vm1, %v1184_v39, %v1166_v44  ;;  %v5638_v25 = vld [vmem:[#allocation8 + $0xa8] sm:$0xff]   ;;  %v5670_v24 = vld [vmem:[#allocation8 + $0x38] sm:$0xff]  }
 0x1a8   : > { %v1202_v4 = vsel %vm1195_vm1, %v1165_v37, %v1183_v61  ;;  %v1220_v50 = vsel %vm1195_vm1, %v1183_v61, %v1165_v37  ;;  %5168 = vmatpush3.bf16.msra.mxu0 %v5636_v49  ;;  %v6530_v52 = vmax.f32 %v912_v15, 0.0  ;;  %4777 = vmatprep.subr.bf16.mxu1 %v5666_v38  ;;  %v872_v49 = vmul.f32 %v6359_v9, %v6264_v55 }
 0x1a9   : > { %v6534_v33 = vpack.c.bf16 %v1220_v50, %v1202_v4  ;;  %5169 = vmatprep.subr.bf16.mxu0 %v5637_v6  ;;  %v1169_v37 = vrot.slane %v6500_v30, 1  ;;  %v6552_v38 = vpack.c.bf16 %v1221_v43, %v1203_v48  ;;  %v870_v61 = vmul.f32 %v6264_v55, %v6368_v17  ;;  %v5639_v4 = vld [vmem:[#allocation8 + $0xb0] sm:$0xff]  }
 0x1aa   : > { %v6556_v44 = vmax.f32 %v910_v19, 0.0  ;;  %v915_v9 = vadd.f32 %v6269_v57, %v872_v49  ;;  %v873_v39 = vmul.f32 %v6373_v28, %v6264_v55  ;;  %v1086_v31 = vsel %vm1080_vm0, %v1049_v7, %v1067_v47 }
 0x1ab   : > { %5138 = vmatmul.mubr.msk.bf16.gmra.mrb[24].mxu0 %vm6334_vm6, %v6534_v33  ;;  %4778 = vmatpush3.bf16.msra.mxu1 %v5668_v59  ;;  %v1188_v17 = vrot.slane %v6530_v52, 1  ;;  %v913_v59 = vadd.f32 %v6269_v57, %v870_v61  ;;  %v1104_v28 = vsel %vm1080_vm0, %v1067_v47, %v1049_v7  ;;  %v871_v49 = vmul.f32 %v6264_v55, %v6381_v40 }
 0x1ac   : > { %5170 = vmatpush3.bf16.msra.mxu0 %v5637_v6  ;;  %4779 = vmatprep.subr.bf16.mxu1 %v5669_v36  ;;  %v7698_v6 = vrot.slane %v6288_v14, 1  ;;  %v1187_v19 = vrot.slane %v6556_v44, 1  ;;  %v6590_v54 = vmax.f32 %v915_v9, 0.0  ;;  %v916_v11 = vadd.f32 %v6269_v57, %v873_v39 }
 0x1ad   : > { %4234 = vmatmul.mubr.msk.bf16.gmra.mrb[32].mxu1 %vm6317_vm5, %v6532_v32  ;;  %5141 = vmatprep.mubr.msk.bf16.mxu0 %vm6334_vm6, %v6552_v38  ;;  %v6593_v7 = vmax.f32 %v913_v59, 0.0  ;;  %v6595_v47 = vpack.c.bf16 %v1086_v31, %v1104_v28  ;;  %v876_v31 = vmul.f32 %v6426_v26, %v6264_v55  ;;  %v877_v15 = vmul.f32 %v6446_v1, %v6264_v55 }
 0x1ae   : > { %v1204_v36 = vsel %vm1195_vm1, %v7698_v6, %v1185_v2  ;;  %1831 = vmatprep.mubr.bf16.mxu1 %v6538_v0  ;;  %5171 = vmatprep.subr.bf16.mxu0 %v5638_v25  ;;  %v7699_v48 = vmov %v7698_v6  ;;  %v6607_v39 = vmax.f32 %v916_v11, 0.0  ;;  %v914_v6 = vadd.f32 %v6269_v57, %v871_v49 }
 0x1af   : > { %v1222_v43 = vsel %vm1195_vm1, %v1185_v2, %v7699_v48  ;;  %4780 = vmatpush3.bf16.msra.mxu1 %v5670_v24  ;;  %v1171_v28 = vrot.slane %v6593_v7, 1  ;;  %v6616_v2 = vpack.c.bf16 %v6488_v8, %v6471_v10  ;;  %v7701_v11 = vrot.slane %v6294_v23, 1 }
 0x1b0   : > { %v6609_v59 = vpack.c.bf16 %v1222_v43, %v1204_v36  ;;  %5172 = vmatpush3.bf16.msra.mxu0 %v5638_v25  ;;  %v7702_v36 = vrot.slane %v6284_v12, 1  ;;  %v6635_v61 = vmax.f32 %v914_v6, 0.0  ;;  %v875_v1 = vmul.f32 %v6264_v55, %v6456_v20 }
 0x1b1   : > { %7700 = vst [vmem:[#allocation19_spill] sm:$0xff] %v6616_v2  ;;  %5173 = vmatprep.subr.bf16.mxu0 %v5639_v4  ;;  %v7704_v43 = vmov %v7701_v11  ;;  %v6689_v9 = vpack.c.bf16 %v6480_v63, %v6464_v58 }
 0x1b2   : > { %v1205_v25 = vsel %vm1195_vm1, %v7702_v36, %v7701_v11  ;;  %v7703_v48 = vmov %v7702_v36  ;;  %v874_v11 = vmul.f32 %v6264_v55, %v6438_v41  ;;  %v5640_v36 = vld [vmem:[#allocation8 + $0xb8] sm:$0xff]   ;;  %v1206_v41 = vsel %vm1195_vm1, %v1169_v37, %v1187_v19 }
 0x1b3   : > { %v1223_v49 = vsel %vm1195_vm1, %v7704_v43, %v7703_v48  ;;  %5142 = vmatmul.mubr.msk.bf16.gmra.mrb[28].mxu0 %vm6334_vm6, %v6609_v59  ;;  %v7705_v48 = vrot.slane %v6488_v8, 7  ;;  %v7706_v43 = vrot.slane %v6471_v10, 7  ;;  %v919_v10 = vadd.f32 %v6269_v57, %v876_v31  ;;  %7710 = vst [vmem:[#allocation21_spill] sm:$0xff] %v6689_v9 }
 0x1b4   : > { %v6637_v40 = vpack.c.bf16 %v1223_v49, %v1205_v25  ;;  %5174 = vmatpush3.bf16.msra.mxu0 %v5639_v4  ;;  %v917_v8 = vadd.f32 %v6269_v57, %v874_v11  ;;  %v920_v4 = vadd.f32 %v6269_v57, %v877_v15 }
 0x1b5   : > { %v1087_v6 = vsel %vm1080_vm0, %v7706_v43, %v7705_v48  ;;  %v7707_v25 = vmov %v7706_v43  ;;  %v7708_v49 = vmov %v7705_v48  ;;  %4238 = vmatmul.mubr.msk.bf16.gmra.mrb[36].mxu1 %vm6317_vm5, %v6595_v47  ;;  %v1189_v48 = vrot.slane %v6635_v61, 1  ;;  %v5643_v43 = vld [vmem:[#allocation8 + $0x1c0] sm:$0xff]   ;;  %5175 = vmatprep.subr.bf16.mxu0 %v5640_v36 }
 0x1b6   : > { %v1105_v26 = vsel %vm1080_vm0, %v7708_v49, %v7707_v25  ;;  %5145 = vmatprep.mubr.msk.bf16.mxu0 %vm6334_vm6, %v6637_v40  ;;  %1839 = vmatprep.mubr.bf16.mxu1 %v6616_v2  ;;  %v1224_v49 = vsel %vm1195_vm1, %v1187_v19, %v1169_v37  ;;  %v6681_v50 = vmax.f32 %v919_v10, 0.0  ;;  %v6683_v31 = vmax.f32 %v917_v8, 0.0 }
 0x1b7   : > { %v6673_v25 = vpack.c.bf16 %v1087_v6, %v1105_v26  ;;  %v6685_v11 = vpack.c.bf16 %v1224_v49, %v1206_v41  ;;  %v6691_v15 = vmax.f32 %v920_v4, 0.0  ;;  %v918_v6 = vadd.f32 %v6269_v57, %v875_v1 }
 0x1b8   : > { %v7711_v37 = vrot.slane %v6493_v34, 1  ;;  %5176 = vmatpush3.bf16.msra.mxu0 %v5640_v36  ;;  %v1174_v10 = vrot.slane %v6681_v50, 1  ;;  %v1173_v8 = vrot.slane %v6683_v31, 1  ;;  %v7713_v36 = vrot.slane %v6480_v63, 7 }
 0x1b9   : > { %7709 = vst [vmem:[#allocation20_spill] sm:$0xff] %v6673_v25  ;;  %4901 = vmatprep.subr.bf16.mxu0 %v5643_v43  ;;  %v1192_v49 = vrot.slane %v6691_v15, 1 }
 0x1ba   : > { %v1207_v20 = vsel %vm1195_vm1, %v7711_v37, %v1188_v17  ;;  %v7712_v19 = vmov %v7711_v37  ;;  %v6712_v37 = vmax.f32 %v918_v6, 0.0  ;;  %v7716_v6 = vmov %v7713_v36 }
 0x1bb   : > { %v1225_v26 = vsel %vm1195_vm1, %v1188_v17, %v7712_v19  ;;  %5146 = vmatmul.mubr.msk.bf16.gmra.mrb[32].mxu0 %vm6334_vm6, %v6685_v11  ;;  %v878_v17 = vmul.f32 %v6264_v55, %v6504_v53  ;;  %v7714_v19 = vrot.slane %v6464_v58, 7  ;;  %v1226_v58 = vsel %vm1195_vm1, %v1189_v48, %v1171_v28 }
 0x1bc   : > { %v6714_v24 = vpack.c.bf16 %v1225_v26, %v1207_v20  ;;  %v1208_v26 = vsel %vm1195_vm1, %v1171_v28, %v1189_v48  ;;  %v1076_v4 = vrot.slane %v6712_v37, 7  ;;  %v1191_v53 = vrot.slane %v6712_v37, 1 }
 0x1bd   : > { %v1088_v43 = vsel %vm1080_vm0, %v7714_v19, %v7713_v36  ;;  %v7715_v41 = vmov %v7714_v19  ;;  %4242 = vmatmul.mubr.msk.bf16.gmra.mrb[40].mxu1 %vm6317_vm5, %v6673_v25  ;;  %v921_v63 = vadd.f32 %v6269_v57, %v878_v17  ;;  %v879_v36 = vmul.f32 %v6264_v55, %v6518_v18 }
 0x1be   : > { %v1106_v20 = vsel %vm1080_vm0, %v7716_v6, %v7715_v41  ;;  %5149 = vmatprep.mubr.msk.bf16.mxu0 %vm6334_vm6, %v6714_v24  ;;  %v6748_v41 = vpack.c.bf16 %v1226_v58, %v1208_v26  ;;  %v6754_v19 = vpack.c.bf16 %v6304_v35, %v6288_v14  ;;  %1847 = vmatprep.mubr.bf16.mxu1 %v6689_v9  ;;  %v7718_v28 = vrot.slane %v6590_v54, 1 }
 0x1bf   : > { %v6740_v1 = vpack.c.bf16 %v1088_v43, %v1106_v20  ;;  %v7717_v43 = vrot.slane %v6607_v39, 1  ;;  %v7721_v18 = vrot.slane %v6304_v35, 7  ;;  %v7722_v20 = vrot.slane %v6288_v14, 7 }
 0x1c0   : > { %v7719_v17 = vmov %v7718_v28  ;;  %v922_v25 = vadd.f32 %v6269_v57, %v879_v36  ;;  %v6792_v14 = vpack.c.bf16 %v6294_v23, %v6284_v12  ;;  %v1211_v35 = vsel %vm1195_vm1, %v1174_v10, %v1192_v49 }
 0x1c1   : > { %v1209_v48 = vsel %vm1195_vm1, %v7718_v28, %v7717_v43  ;;  %v7720_v6 = vmov %v7717_v43  ;;  %v1089_v26 = vsel %vm1080_vm0, %v7722_v20, %v7721_v18  ;;  %v7723_v58 = vmov %v7722_v20 }
 0x1c2   : > { %v1227_v55 = vsel %vm1195_vm1, %v7720_v6, %v7719_v17  ;;  %v7724_v9 = vmov %v7721_v18  ;;  %v957_v28 = vmax.f32 %v921_v63, 0.0  ;;  %v1210_v6 = vsel %vm1195_vm1, %v1173_v8, %v1191_v53 }
 0x1c3   : > { %v1107_v43 = vsel %vm1080_vm0, %v7724_v9, %v7723_v58  ;;  %v6782_v2 = vpack.c.bf16 %v1227_v55, %v1209_v48  ;;  %v1228_v18 = vsel %vm1195_vm1, %v1191_v53, %v1173_v8  ;;  %v958_v57 = vmax.f32 %v922_v25, 0.0  ;;  %5150 = vmatmul.mubr.msk.bf16.gmra.mrb[36].mxu0 %vm6334_vm6, %v6748_v41 }
 0x1c4   : > { %v6784_v17 = vpack.c.bf16 %v1089_v26, %v1107_v43  ;;  %v1060_v9 = vrot.slane %v957_v28, 7  ;;  %v1175_v63 = vrot.slane %v957_v28, 1  ;;  %v6796_v36 = vpack.c.bf16 %v1228_v18, %v1210_v6 }
 0x1c5   : > { %v1229_v48 = vsel %vm1195_vm1, %v1192_v49, %v1174_v10  ;;  %v7725_v55 = vrot.slane %v6294_v23, 7  ;;  %v7726_v20 = vrot.slane %v6284_v12, 7  ;;  %v6814_v25 = vpack.c.bf16 %v6556_v44, %v6500_v30  ;;  %5153 = vmatprep.mubr.msk.bf16.mxu0 %vm6334_vm6, %v6782_v2  ;;  %4246 = vmatmul.mubr.msk.bf16.gmra.mrb[44].mxu1 %vm6317_vm5, %v6740_v1 }
 0x1c6   : > { %v1078_v10 = vrot.slane %v958_v57, 7  ;;  %v1193_v49 = vrot.slane %v958_v57, 1  ;;  %v6819_v43 = vpack.c.bf16 %v1229_v48, %v1211_v35  ;;  %v7729_v12 = vrot.slane %v6556_v44, 7  ;;  %1855 = vmatprep.mubr.bf16.mxu1 %v6754_v19 }
 0x1c7   : > { %v1090_v8 = vsel %vm1080_vm0, %v7726_v20, %v7725_v55  ;;  %v7727_v53 = vmov %v7726_v20  ;;  %v7728_v26 = vmov %v7725_v55  ;;  %v7730_v23 = vrot.slane %v6500_v30, 7 }
 0x1c8   : > { %v1108_v58 = vsel %vm1080_vm0, %v7728_v26, %v7727_v53  ;;  %v7732_v20 = vmov %v7729_v12  ;;  %v6840_v48 = vpack.c.bf16 %v6530_v52, %v6493_v34  ;;  %v7734_v53 = vrot.slane %v6493_v34, 7 }
 0x1c9   : > { %v6821_v6 = vpack.c.bf16 %v1090_v8, %v1108_v58  ;;  %v1091_v18 = vsel %vm1080_vm0, %v7730_v23, %v7729_v12  ;;  %v7731_v55 = vmov %v7730_v23  ;;  %v7733_v8 = vrot.slane %v6530_v52, 7 }
 0x1ca   : > { %v1109_v35 = vsel %vm1080_vm0, %v7732_v20, %v7731_v55  ;;  %v1212_v30 = vsel %vm1195_vm1, %v1175_v63, %v1193_v49  ;;  %v1230_v44 = vsel %vm1195_vm1, %v1193_v49, %v1175_v63  ;;  %v7735_v12 = vmov %v7734_v53 }
 0x1cb   : > { %v1092_v26 = vsel %vm1080_vm0, %v7734_v53, %v7733_v8  ;;  %v6855_v58 = vpack.c.bf16 %v1091_v18, %v1109_v35  ;;  %v7736_v23 = vmov %v7733_v8  ;;  %v6864_v20 = vpack.c.bf16 %v1230_v44, %v1212_v30  ;;  %5154 = vmatmul.mubr.msk.bf16.gmra.mrb[40].mxu0 %vm6334_vm6, %v6796_v36 }
 0x1cc   : > { %v1110_v55 = vsel %vm1080_vm0, %v7736_v23, %v7735_v12  ;;  %v6870_v53 = vpack.c.bf16 %v6635_v61, %v6593_v7  ;;  %v7737_v63 = vrot.slane %v6635_v61, 7  ;;  %v7738_v49 = vrot.slane %v6593_v7, 7  ;;  %5157 = vmatprep.mubr.msk.bf16.mxu0 %vm6334_vm6, %v6819_v43 }
 0x1cd   : > { %v6866_v8 = vpack.c.bf16 %v1092_v26, %v1110_v55  ;;  %v6886_v26 = vpack.c.bf16 %v6607_v39, %v6590_v54  ;;  %v7741_v30 = vrot.slane %v6607_v39, 7  ;;  %v7742_v44 = vrot.slane %v6590_v54, 7  ;;  %4250 = vmatmul.mubr.msk.bf16.gmra.mrb[48].mxu1 %vm6317_vm5, %v6784_v17 }
 0x1ce   : > { %v1093_v52 = vsel %vm1080_vm0, %v7738_v49, %v7737_v63  ;;  %v7739_v34 = vmov %v7738_v49  ;;  %v7740_v18 = vmov %v7737_v63  ;;  %v6906_v49 = vpack.c.bf16 %v6712_v37, %v6683_v31  ;;  %1863 = vmatprep.mubr.bf16.mxu1 %v6792_v14 }
 0x1cf   : > { %v1111_v35 = vsel %vm1080_vm0, %v7740_v18, %v7739_v34  ;;  %v1094_v12 = vsel %vm1080_vm0, %v7742_v44, %v7741_v30  ;;  %v7743_v23 = vmov %v7742_v44  ;;  %v7744_v7 = vmov %v7741_v30 }
 0x1d0   : > { %v1112_v61 = vsel %vm1080_vm0, %v7744_v7, %v7743_v23  ;;  %v6900_v55 = vpack.c.bf16 %v1093_v52, %v1111_v35  ;;  %v7745_v34 = vrot.slane %v6683_v31, 7  ;;  %v6918_v52 = vpack.c.bf16 %v6691_v15, %v6681_v50 }
 0x1d1   : > { %v6902_v63 = vpack.c.bf16 %v1094_v12, %v1112_v61  ;;  %v7747_v35 = vrot.slane %v6691_v15, 7  ;;  %v7748_v30 = vrot.slane %v6681_v50, 7  ;;  %v6936_v7 = vpack.c.bf16 %v958_v57, %v957_v28  ;;  %v5646_v57 = vld [vmem:[#allocation8 + $0x188] sm:$0xff]  }
 0x1d2   : > { %v1095_v18 = vsel %vm1080_vm0, %v7745_v34, %v1076_v4  ;;  %v7746_v54 = vmov %v7745_v34  ;;  %v1097_v61 = vsel %vm1080_vm0, %v1060_v9, %v1078_v10  ;;  %v1115_v50 = vsel %vm1080_vm0, %v1078_v10, %v1060_v9  ;;  %v5645_v9 = vld [vmem:[#allocation8 + $0x1c8] sm:$0xff]   ;;  %v5649_v10 = vld [vmem:[#allocation8 + $0x1d0] sm:$0xff]  }
 0x1d3   : > { %v1113_v39 = vsel %vm1080_vm0, %v1076_v4, %v7746_v54  ;;  %v1096_v37 = vsel %vm1080_vm0, %v7748_v30, %v7747_v35  ;;  %v7749_v44 = vmov %v7748_v30  ;;  %v7750_v12 = vmov %v7747_v35  ;;  %5158 = vmatmul.mubr.msk.bf16.gmra.mrb[44].mxu0 %vm6334_vm6, %v6864_v20  ;;  %v5650_v54 = vld [vmem:[#allocation8 + $0x190] sm:$0xff]   ;;  %v5655_v35 = vld [vmem:[#allocation8 + $0x1e0] sm:$0xff]  }
 0x1d4   : > { %v1114_v31 = vsel %vm1080_vm0, %v7750_v12, %v7749_v44  ;;  %v6932_v23 = vpack.c.bf16 %v1095_v18, %v1113_v39  ;;  %v5934_v15 = vmov 0.0   ;;  %v6949_v18 = vpack.c.bf16 %v1097_v61, %v1115_v50  ;;  %v5651_v39 = vld [vmem:[#allocation8 + $0x1d8] sm:$0xff]   ;;  %v5656_v30 = vld [vmem:[#allocation8 + $0x1a0] sm:$0xff]   ;;  %v5661_v44 = vld [vmem:[#allocation8 + $0x1a8] sm:$0xff]  }
 0x1d5   : > { %v6934_v4 = vpack.c.bf16 %v1096_v37, %v1114_v31  ;;  %v1159_v34 = vrot.slane %v5934_v15, 1  ;;  %4254 = vmatmul.mubr.msk.bf16.gmra.mrb[52].mxu1 %vm6317_vm5, %v6821_v6  ;;  %v5659_v37 = vld [vmem:[#allocation8 + $0x1e8] sm:$0xff]   ;;  %v5665_v12 = vld [vmem:[#allocation8 + $0x1f0] sm:$0xff]   ;;  %v5671_v61 = vld [vmem:[#allocation8 + $0x1f8] sm:$0xff]  }
 0x1d6   : > { %1871 = vmatprep.mubr.bf16.mxu1 %v6814_v25  ;;  %v5667_v31 = vld [vmem:[#allocation8 + $0x1b0] sm:$0xff]   ;;  %v5672_v50 = vld [vmem:[#allocation8 + $0x1b8] sm:$0xff]  }
 0x1d7   : > { %v6955_v28 = vpack.c.bf16 %v1159_v34, %v1159_v34  ;;  %v5673_v34 = vld [vmem:[#allocation8 + $0x200] sm:$0xff]  }
 0x1d9   : > { %5177 = vmatprep.mubr.msk.bf16.mxu0 %vm6334_vm6, %v6955_v28 }
 0x1db   : > { %5178 = vmatmul.mubr.msk.bf16.vlgmr.msra.gmra.mrb[16].mxu0 %vm6334_vm6, %v6345_v62  ;;  %v5652_v62 = vld [vmem:[#allocation8 + $0x198] sm:$0xff]  }
 0x1dc   : > { %4902 = vmatpush3.bf16.msra.mxu0 %v5644_v46  ;;  %5181 = vmatprep.mubr.msk.bf16.mxu0 %vm6334_vm6, %v6390_v51  ;;  %v1044_v46 = vrot.slane %v5934_v15, 7  ;;  %v5674_v15 = vld [vmem:[#allocation8 + $0x208] sm:$0xff]  }
 0x1dd   : > { %4258 = vmatmul.mubr.msk.bf16.gmra.mrb[56].mxu1 %vm6317_vm5, %v6855_v58  ;;  %4903 = vmatprep.subr.bf16.mxu0 %v5645_v9  ;;  %v5935_v9 = vmov 0.0|0.0  }
 0x1de   : > { %1879 = vmatprep.mubr.bf16.mxu1 %v6840_v48 }
 0x1e0   : > { %4904 = vmatpush3.bf16.msra.mxu0 %v5646_v57  ;;  %v7038_v57 = vpack.c.bf16 %v1044_v46, %v1044_v46 }
 0x1e1   : > { %4905 = vmatprep.subr.bf16.mxu0 %v5649_v10  ;;  %v5675_v10 = vld [vmem:[#allocation8 + $0x210] sm:$0xff]  }
 0x1e3   : > { %5182 = vmatmul.mubr.msk.bf16.gmra.mrb[20].mxu0 %vm6334_vm6, %v6402_v5 }
 0x1e4   : > { %5185 = vmatprep.mubr.msk.bf16.mxu0 %vm6334_vm6, %v6467_v22  ;;  %4906 = vmatpush3.bf16.msra.mxu0 %v5650_v54  ;;  %v5676_v54 = vld [vmem:[#allocation8 + $0x218] sm:$0xff]  }
 0x1e5   : > { %4262 = vmatmul.mubr.msk.bf16.gmra.mrb[60].mxu1 %vm6317_vm5, %v6866_v8  ;;  %4907 = vmatprep.subr.bf16.mxu0 %v5651_v39 }
 0x1e6   : > { %1887 = vmatprep.mubr.bf16.mxu1 %v6870_v53 }
 0x1e8   : > { %4908 = vmatpush3.bf16.msra.mxu0 %v5652_v62 }
 0x1e9   : > { %4909 = vmatprep.subr.bf16.mxu0 %v5655_v35 }
 0x1eb   : > { %5186 = vmatmul.mubr.msk.bf16.gmra.mrb[24].mxu0 %vm6334_vm6, %v6474_v21 }
 0x1ec   : > { %5189 = vmatprep.mubr.msk.bf16.mxu0 %vm6334_vm6, %v6534_v33  ;;  %4910 = vmatpush3.bf16.msra.mxu0 %v5656_v30 }
 0x1ed   : > { %4266 = vmatmul.mubr.msk.bf16.gmra.mrb[64].mxu1 %vm6317_vm5, %v6900_v55  ;;  %4911 = vmatprep.subr.bf16.mxu0 %v5659_v37 }
 0x1ee   : > { %1895 = vmatprep.mubr.bf16.mxu1 %v6886_v26 }
 0x1f0   : > { %4912 = vmatpush3.bf16.msra.mxu0 %v5661_v44 }
 0x1f1   : > { %4913 = vmatprep.subr.bf16.mxu0 %v5665_v12 }
 0x1f3   : > { %5190 = vmatmul.mubr.msk.bf16.gmra.mrb[28].mxu0 %vm6334_vm6, %v6552_v38 }
 0x1f4   : > { %5193 = vmatprep.mubr.msk.bf16.mxu0 %vm6334_vm6, %v6609_v59  ;;  %4914 = vmatpush3.bf16.msra.mxu0 %v5667_v31 }
 0x1f5   : > { %4270 = vmatmul.mubr.msk.bf16.gmra.mrb[68].mxu1 %vm6317_vm5, %v6902_v63  ;;  %4915 = vmatprep.subr.bf16.mxu0 %v5671_v61 }
 0x1f6   : > { %1903 = vmatprep.mubr.bf16.mxu1 %v6906_v49 }
 0x1f8   : > { %4916 = vmatpush3.bf16.msra.mxu0 %v5672_v50 }
 0x1f9   : > { %5209 = vmatprep.subr.bf16.mxu0 %v5673_v34 }
 0x1fb   : > { %5194 = vmatmul.mubr.msk.bf16.gmra.mrb[32].mxu0 %vm6334_vm6, %v6637_v40 }
 0x1fc   : > { %5197 = vmatprep.mubr.msk.bf16.mxu0 %vm6334_vm6, %v6685_v11 }
 0x1fd   : > { %4274 = vmatmul.mubr.msk.bf16.gmra.mrb[72].mxu1 %vm6317_vm5, %v6932_v23 }
 0x1fe   : > { %1911 = vmatprep.mubr.bf16.mxu1 %v6918_v52 }
 0x203   : > { %5198 = vmatmul.mubr.msk.bf16.gmra.mrb[36].mxu0 %vm6334_vm6, %v6714_v24 }
 0x204   : > { %5201 = vmatprep.mubr.msk.bf16.mxu0 %vm6334_vm6, %v6748_v41 }
 0x205   : > { %4278 = vmatmul.mubr.msk.bf16.gmra.mrb[76].mxu1 %vm6317_vm5, %v6934_v4 }
 0x206   : > { %1919 = vmatprep.mubr.bf16.mxu1 %v6936_v7 }
 0x20b   : > { %5202 = vmatmul.mubr.msk.bf16.gmra.mrb[40].mxu0 %vm6334_vm6, %v6782_v2 }
 0x20c   : > { %5205 = vmatprep.mubr.msk.bf16.mxu0 %vm6334_vm6, %v6796_v36 }
 0x20d   : > { %4282 = vmatmul.mubr.msk.bf16.gmra.mrb[80].mxu1 %vm6317_vm5, %v6949_v18 }
 0x20e   : > { %2265 = vmatprep.mubr.bf16.mxu1 %v5935_v9 }
 0x213   : > { %5206 = vmatmul.mubr.msk.bf16.gmra.mrb[44].mxu0 %vm6334_vm6, %v6819_v43 }
 0x214   : > { %2780 = vmatprep.mubr.bf16.mxu0 %v6371_v27 }
 0x215   : > { %4350 = vmatmul.mubr.msk.bf16.vlgmr.msra.gmra.mrb[84].mxu1 %vm6317_vm5, %v7038_v57 }
 0x216   : > { %2273 = vmatprep.mubr.bf16.mxu1 %v6297_v29  ;;  %v5677_v29 = vld [vmem:[#allocation8 + $0x220] sm:$0xff]  }
 0x21b   : > { %4478 = vmatmul.mubr.msk.bf16.vlgmr.msra.gmra.mrb[48].mxu0 %vm6317_vm5, %v6407_v13 }
 0x21c   : > { %5210 = vmatpush3.bf16.msra.mxu0 %v5673_v34  ;;  %2788 = vmatprep.mubr.bf16.mxu0 %v6366_v16 }
 0x21d   : > { %4354 = vmatmul.mubr.msk.bf16.gmra.mrb[88].mxu1 %vm6317_vm5, %v6323_v45  ;;  %5211 = vmatprep.subr.bf16.mxu0 %v5674_v15  ;;  %v5678_v45 = vld [vmem:[#allocation8 + $0x228] sm:$0xff]  }
 0x21e   : > { %2281 = vmatprep.mubr.bf16.mxu1 %v6371_v27  ;;  %v5679_v27 = vld [vmem:[#allocation8 + $0x230] sm:$0xff]  }
 0x220   : > { %5212 = vmatpush3.bf16.msra.mxu0 %v5674_v15 }
 0x221   : > { %5213 = vmatprep.subr.bf16.mxu0 %v5675_v10 }
 0x223   : > { %4482 = vmatmul.mubr.msk.bf16.gmra.mrb[52].mxu0 %vm6317_vm5, %v6444_v60 }
 0x224   : > { %2796 = vmatprep.mubr.bf16.mxu0 %v6452_v3  ;;  %5214 = vmatpush3.bf16.msra.mxu0 %v5675_v10 }
 0x225   : > { %4358 = vmatmul.mubr.msk.bf16.gmra.mrb[92].mxu1 %vm6317_vm5, %v6407_v13  ;;  %5215 = vmatprep.subr.bf16.mxu0 %v5676_v54  ;;  %v7751_v13 = vld [vmem:[#allocation19_spill] sm:$0xff] }
 0x226   : > { %2289 = vmatprep.mubr.bf16.mxu1 %v6366_v16  ;;  %v5680_v16 = vld [vmem:[#allocation8 + $0x238] sm:$0xff]  }
 0x228   : > { %5216 = vmatpush3.bf16.msra.mxu0 %v5676_v54 }
 0x229   : > { %5217 = vmatprep.subr.bf16.mxu0 %v5677_v29 }
 0x22b   : > { %4486 = vmatmul.mubr.msk.bf16.gmra.mrb[56].mxu0 %vm6317_vm5, %v6532_v32 }
 0x22c   : > { %2804 = vmatprep.mubr.bf16.mxu0 %v6538_v0  ;;  %5218 = vmatpush3.bf16.msra.mxu0 %v5677_v29 }
 0x22d   : > { %4362 = vmatmul.mubr.msk.bf16.gmra.mrb[96].mxu1 %vm6317_vm5, %v6444_v60  ;;  %5219 = vmatprep.subr.bf16.mxu0 %v5678_v45  ;;  %v7752_v60 = vld [vmem:[#allocation20_spill] sm:$0xff] }
 0x22e   : > { %2297 = vmatprep.mubr.bf16.mxu1 %v6452_v3  ;;  %v7753_v3 = vld [vmem:[#allocation21_spill] sm:$0xff] }
 0x230   : > { %5220 = vmatpush3.bf16.msra.mxu0 %v5678_v45 }
 0x231   : > { %5221 = vmatprep.subr.bf16.mxu0 %v5679_v27 }
 0x233   : > { %4490 = vmatmul.mubr.msk.bf16.gmra.mrb[60].mxu0 %vm6317_vm5, %v6595_v47 }
 0x234   : > { %2812 = vmatprep.mubr.bf16.mxu0 %v7751_v13  ;;  %5222 = vmatpush3.bf16.msra.mxu0 %v5679_v27 }
 0x235   : > { %4366 = vmatmul.mubr.msk.bf16.gmra.mrb[100].mxu1 %vm6317_vm5, %v6532_v32  ;;  %5223 = vmatprep.subr.bf16.mxu0 %v5680_v16 }
 0x236   : > { %2305 = vmatprep.mubr.bf16.mxu1 %v6538_v0 }
 0x238   : > { %5224 = vmatpush3.bf16.msra.mxu0 %v5680_v16 }
 0x23b   : > { %4494 = vmatmul.mubr.msk.bf16.gmra.mrb[64].mxu0 %vm6317_vm5, %v7752_v60 }
 0x23c   : > { %2820 = vmatprep.mubr.bf16.mxu0 %v7753_v3 }
 0x23d   : > { %4370 = vmatmul.mubr.msk.bf16.gmra.mrb[104].mxu1 %vm6317_vm5, %v6595_v47 }
 0x23e   : > { %2313 = vmatprep.mubr.bf16.mxu1 %v7751_v13 }
 0x243   : > { %4498 = vmatmul.mubr.msk.bf16.gmra.mrb[68].mxu0 %vm6317_vm5, %v6740_v1 }
 0x244   : > { %2828 = vmatprep.mubr.bf16.mxu0 %v6754_v19 }
 0x245   : > { %4374 = vmatmul.mubr.msk.bf16.gmra.mrb[108].mxu1 %vm6317_vm5, %v7752_v60 }
 0x246   : > { %2321 = vmatprep.mubr.bf16.mxu1 %v7753_v3 }
 0x24b   : > { %4502 = vmatmul.mubr.msk.bf16.gmra.mrb[72].mxu0 %vm6317_vm5, %v6784_v17 }
 0x24c   : > { %2836 = vmatprep.mubr.bf16.mxu0 %v6792_v14 }
 0x24d   : > { %4378 = vmatmul.mubr.msk.bf16.gmra.mrb[112].mxu1 %vm6317_vm5, %v6740_v1 }
 0x24e   : > { %2329 = vmatprep.mubr.bf16.mxu1 %v6754_v19 }
 0x253   : > { %4506 = vmatmul.mubr.msk.bf16.gmra.mrb[76].mxu0 %vm6317_vm5, %v6821_v6 }
 0x254   : > { %2844 = vmatprep.mubr.bf16.mxu0 %v6814_v25 }
 0x255   : > { %4382 = vmatmul.mubr.msk.bf16.gmra.mrb[116].mxu1 %vm6317_vm5, %v6784_v17 }
 0x256   : > { %2337 = vmatprep.mubr.bf16.mxu1 %v6792_v14 }
 0x25b   : > { %4510 = vmatmul.mubr.msk.bf16.gmra.mrb[80].mxu0 %vm6317_vm5, %v6855_v58 }
 0x25c   : > { %2852 = vmatprep.mubr.bf16.mxu0 %v6840_v48 }
 0x25d   : > { %4386 = vmatmul.mubr.msk.bf16.gmra.mrb[120].mxu1 %vm6317_vm5, %v6821_v6 }
 0x25e   : > { %2345 = vmatprep.mubr.bf16.mxu1 %v6814_v25 }
 0x263   : > { %4514 = vmatmul.mubr.msk.bf16.gmra.mrb[84].mxu0 %vm6317_vm5, %v6866_v8 }
 0x264   : > { %2860 = vmatprep.mubr.bf16.mxu0 %v6870_v53 }
 0x265   : > { %4390 = vmatmul.mubr.msk.bf16.gmra.mrb[124].mxu1 %vm6317_vm5, %v6855_v58  ;;  %v4645_v32 = vpop.f32.mrb[20].mxu1 }
 0x266   : > { %2353 = vmatprep.mubr.bf16.mxu1 %v6840_v48  ;;  %v4646_v0 = vpop.f32.mrb[21].mxu1 }
 0x267   : > { %v7128_v47 = vadd.f32 %v4646_v0, %v4645_v32  ;;  %v4648_v1 = vpop.f32.mrb[22].mxu1 }
 0x268   : > { %v4649_v19 = vpop.f32.mrb[23].mxu1 }
 0x269   : > { %v7130_v17 = vadd.f32 %v4649_v19, %v4648_v1 }
 0x26b   : > { %4518 = vmatmul.mubr.msk.bf16.gmra.mrb[88].mxu0 %vm6317_vm5, %v6900_v55 }
 0x26c   : > { %2868 = vmatprep.mubr.bf16.mxu0 %v6886_v26 }
 0x26d   : > { %4394 = vmatmul.mubr.msk.bf16.gmra.mrb[128].mxu1 %vm6317_vm5, %v6866_v8 }
 0x26e   : > { %2361 = vmatprep.mubr.bf16.mxu1 %v6870_v53 }
 0x270   : > { %v4651_v14 = vpop.f32.mrb[24].mxu1 }
 0x271   : > { %v4652_v25 = vpop.f32.mrb[25].mxu1 }
 0x272   : > { %v7140_v6 = vadd.f32 %v4652_v25, %v4651_v14  ;;  %v4654_v48 = vpop.f32.mrb[26].mxu1 }
 0x273   : > { %v4655_v58 = vpop.f32.mrb[27].mxu1  ;;  %4522 = vmatmul.mubr.msk.bf16.gmra.mrb[92].mxu0 %vm6317_vm5, %v6902_v63 }
 0x274   : > { %v7145_v39 = vadd.f32 %v4655_v58, %v4654_v48  ;;  %2876 = vmatprep.mubr.bf16.mxu0 %v6906_v49 }
 0x275   : > { %4398 = vmatmul.mubr.msk.bf16.gmra.mrb[132].mxu1 %vm6317_vm5, %v6900_v55 }
 0x276   : > { %2369 = vmatprep.mubr.bf16.mxu1 %v6886_v26  ;;  %v5681_v26 = vld [vmem:[#allocation9] sm:$0xff]  }
 0x277   : > { %5257 = vmatprep.subr.bf16.mxu1 %v5681_v26 }
 0x278   : > { %v4657_v8 = vpop.f32.mrb[28].mxu1  ;;  %5258 = vmatpush3.bf16.msra.mxu1 %v5681_v26 }
 0x279   : > { %v4658_v53 = vpop.f32.mrb[29].mxu1 }
 0x27a   : > { %v7152_v62 = vadd.f32 %v4658_v53, %v4657_v8  ;;  %v4660_v35 = vpop.f32.mrb[30].mxu1 }
 0x27b   : > { %v4661_v30 = vpop.f32.mrb[31].mxu1  ;;  %4526 = vmatmul.mubr.msk.bf16.gmra.mrb[96].mxu0 %vm6317_vm5, %v6932_v23 }
 0x27c   : > { %v7157_v37 = vadd.f32 %v4661_v30, %v4660_v35  ;;  %2884 = vmatprep.mubr.bf16.mxu0 %v6918_v52 }
 0x27d   : > { %4402 = vmatmul.mubr.msk.bf16.gmra.mrb[136].mxu1 %vm6317_vm5, %v6902_v63 }
 0x27e   : > { %2377 = vmatprep.mubr.bf16.mxu1 %v6906_v49 }
 0x280   : > { %v4663_v55 = vpop.f32.mrb[32].mxu1 }
 0x281   : > { %v4664_v44 = vpop.f32.mrb[33].mxu1 }
 0x282   : > { %v7164_v12 = vadd.f32 %v4664_v44, %v4663_v55  ;;  %v4666_v31 = vpop.f32.mrb[34].mxu1 }
 0x283   : > { %v4667_v61 = vpop.f32.mrb[35].mxu1  ;;  %4530 = vmatmul.mubr.msk.bf16.gmra.mrb[100].mxu0 %vm6317_vm5, %v6934_v4 }
 0x284   : > { %v7169_v50 = vadd.f32 %v4667_v61, %v4666_v31  ;;  %2892 = vmatprep.mubr.bf16.mxu0 %v6936_v7 }
 0x285   : > { %4406 = vmatmul.mubr.msk.bf16.gmra.mrb[140].mxu1 %vm6317_vm5, %v6932_v23  ;;  %v5682_v23 = vld [vmem:[#allocation9 + $0x8] sm:$0xff]  }
 0x286   : > { %2385 = vmatprep.mubr.bf16.mxu1 %v6918_v52  ;;  %5259 = vmatprep.subr.bf16.mxu1 %v5682_v23 }
 0x287   : > { %5260 = vmatpush3.bf16.msra.mxu1 %v5682_v23 }
 0x288   : > { %v4669_v63 = vpop.f32.mrb[36].mxu1  ;;  %5261 = vmatprep.subr.bf16.mxu1 %v5683_v42 }
 0x289   : > { %v4670_v49 = vpop.f32.mrb[37].mxu1 }
 0x28a   : > { %v7176_v34 = vadd.f32 %v4670_v49, %v4669_v63  ;;  %v4672_v46 = vpop.f32.mrb[38].mxu1 }
 0x28b   : > { %v4673_v15 = vpop.f32.mrb[39].mxu1  ;;  %4534 = vmatmul.mubr.msk.bf16.gmra.mrb[104].mxu0 %vm6317_vm5, %v6949_v18  ;;  %5262 = vmatpush3.bf16.msra.mxu1 %v5683_v42 }
 0x28c   : > { %v7181_v10 = vadd.f32 %v4673_v15, %v4672_v46  ;;  %2900 = vmatprep.mubr.bf16.mxu0 %v5935_v9 }
 0x28d   : > { %4410 = vmatmul.mubr.msk.bf16.gmra.mrb[144].mxu1 %vm6317_vm5, %v6934_v4 }
 0x290   : > { %v4675_v52 = vpop.f32.mrb[40].mxu1 }
 0x291   : > { %v4676_v7 = vpop.f32.mrb[41].mxu1 }
 0x292   : > { %v7187_v54 = vadd.f32 %v4676_v7, %v4675_v52  ;;  %v4678_v29 = vpop.f32.mrb[42].mxu1 }
 0x293   : > { %v4679_v45 = vpop.f32.mrb[43].mxu1  ;;  %4538 = vmatmul.mubr.msk.bf16.gmra.mrb[108].mxu0 %vm6317_vm5, %v7038_v57 }
 0x294   : > { %v7192_v18 = vadd.f32 %v4679_v45, %v4678_v29  ;;  %5225 = vmatprep.mubr.msk.bf16.mxu0 %vm6334_vm6, %v6390_v51 }
 0x298   : > { %v4681_v4 = vpop.f32.mrb[44].mxu1 }
 0x299   : > { %v4682_v9 = vpop.f32.mrb[45].mxu1 }
 0x29a   : > { %v7197_v27 = vadd.f32 %v4682_v9, %v4681_v4  ;;  %v4684_v16 = vpop.f32.mrb[46].mxu1 }
 0x29b   : > { %v4685_v13 = vpop.f32.mrb[47].mxu1  ;;  %5226 = vmatmul.mubr.msk.bf16.vlgmr.msra.gmra.mrb[16].mxu0 %vm6334_vm6, %v6402_v5 }
 0x29c   : > { %v7202_v60 = vadd.f32 %v4685_v13, %v4684_v16  ;;  %5229 = vmatprep.mubr.msk.bf16.mxu0 %vm6334_vm6, %v6467_v22 }
 0x2a0   : > { %v4687_v57 = vpop.f32.mrb[48].mxu1 }
 0x2a1   : > { %v4688_v51 = vpop.f32.mrb[49].mxu1 }
 0x2a2   : > { %v7207_v3 = vadd.f32 %v4688_v51, %v4687_v57  ;;  %v4690_v32 = vpop.f32.mrb[50].mxu1 }
 0x2a3   : > { %v4691_v0 = vpop.f32.mrb[51].mxu1  ;;  %5230 = vmatmul.mubr.msk.bf16.gmra.mrb[20].mxu0 %vm6334_vm6, %v6474_v21  ;;  %v5684_v21 = vld [vmem:[#allocation9 + $0x18] sm:$0xff]  }
 0x2a4   : > { %v7212_v5 = vadd.f32 %v4691_v0, %v4690_v32  ;;  %5233 = vmatprep.mubr.msk.bf16.mxu0 %vm6334_vm6, %v6534_v33  ;;  %5263 = vmatprep.subr.bf16.mxu1 %v5684_v21  ;;  %v5687_v0 = vld [vmem:[#allocation9 + $0x30] sm:$0xff]  }
 0x2a5   : > { %5264 = vmatpush3.bf16.msra.mxu1 %v5684_v21 }
 0x2a8   : > { %v4693_v22 = vpop.f32.mrb[52].mxu1 }
 0x2a9   : > { %v4694_v1 = vpop.f32.mrb[53].mxu1 }
 0x2aa   : > { %v7217_v19 = vadd.f32 %v4694_v1, %v4693_v22  ;;  %v4696_v14 = vpop.f32.mrb[54].mxu1 }
 0x2ab   : > { %v4697_v25 = vpop.f32.mrb[55].mxu1  ;;  %5234 = vmatmul.mubr.msk.bf16.gmra.mrb[24].mxu0 %vm6334_vm6, %v6552_v38 }
 0x2ac   : > { %v7222_v48 = vadd.f32 %v4697_v25, %v4696_v14  ;;  %5237 = vmatprep.mubr.msk.bf16.mxu0 %vm6334_vm6, %v6609_v59 }
 0x2b0   : > { %v4699_v58 = vpop.f32.mrb[56].mxu1 }
 0x2b1   : > { %v4700_v33 = vpop.f32.mrb[57].mxu1 }
 0x2b2   : > { %v7227_v8 = vadd.f32 %v4700_v33, %v4699_v58  ;;  %v4702_v53 = vpop.f32.mrb[58].mxu1 }
 0x2b3   : > { %v4703_v35 = vpop.f32.mrb[59].mxu1  ;;  %5238 = vmatmul.mubr.msk.bf16.gmra.mrb[28].mxu0 %vm6334_vm6, %v6637_v40  ;;  %v5685_v40 = vld [vmem:[#allocation9 + $0x20] sm:$0xff]  }
 0x2b4   : > { %v7232_v38 = vadd.f32 %v4703_v35, %v4702_v53  ;;  %5241 = vmatprep.mubr.msk.bf16.mxu0 %vm6334_vm6, %v6685_v11  ;;  %5265 = vmatprep.subr.bf16.mxu1 %v5685_v40  ;;  %v5688_v35 = vld [vmem:[#allocation9 + $0x38] sm:$0xff]  }
 0x2b5   : > { %5266 = vmatpush3.bf16.msra.mxu1 %v5685_v40 }
 0x2b8   : > { %v4705_v59 = vpop.f32.mrb[60].mxu1 }
 0x2b9   : > { %v4706_v30 = vpop.f32.mrb[61].mxu1 }
 0x2ba   : > { %v7237_v26 = vadd.f32 %v4706_v30, %v4705_v59  ;;  %v4708_v55 = vpop.f32.mrb[62].mxu1 }
 0x2bb   : > { %v4709_v44 = vpop.f32.mrb[63].mxu1  ;;  %5242 = vmatmul.mubr.msk.bf16.gmra.mrb[32].mxu0 %vm6334_vm6, %v6714_v24 }
 0x2bc   : > { %v7242_v31 = vadd.f32 %v4709_v44, %v4708_v55  ;;  %5245 = vmatprep.mubr.msk.bf16.mxu0 %vm6334_vm6, %v6748_v41 }
 0x2c0   : > { %v4711_v61 = vpop.f32.mrb[64].mxu1 }
 0x2c1   : > { %v4712_v11 = vpop.f32.mrb[65].mxu1 }
 0x2c2   : > { %v7247_v63 = vadd.f32 %v4712_v11, %v4711_v61  ;;  %v4714_v49 = vpop.f32.mrb[66].mxu1 }
 0x2c3   : > { %v4715_v46 = vpop.f32.mrb[67].mxu1  ;;  %5246 = vmatmul.mubr.msk.bf16.gmra.mrb[36].mxu0 %vm6334_vm6, %v6782_v2  ;;  %v5686_v2 = vld [vmem:[#allocation9 + $0x28] sm:$0xff]  }
 0x2c4   : > { %v7252_v24 = vadd.f32 %v4715_v46, %v4714_v49  ;;  %5249 = vmatprep.mubr.msk.bf16.mxu0 %vm6334_vm6, %v6796_v36  ;;  %5267 = vmatprep.subr.bf16.mxu1 %v5686_v2 }
 0x2c5   : > { %5268 = vmatpush3.bf16.msra.mxu1 %v5686_v2 }
 0x2c6   : > { %5269 = vmatprep.subr.bf16.mxu1 %v5687_v0 }
 0x2c8   : > { %v4717_v41 = vpop.f32.mrb[68].mxu1 }
 0x2c9   : > { %v4718_v15 = vpop.f32.mrb[69].mxu1  ;;  %5270 = vmatpush3.bf16.msra.mxu1 %v5687_v0 }
 0x2ca   : > { %v7257_v23 = vadd.f32 %v4718_v15, %v4717_v41  ;;  %v4720_v52 = vpop.f32.mrb[70].mxu1  ;;  %5271 = vmatprep.subr.bf16.mxu1 %v5688_v35 }
 0x2cb   : > { %v4721_v7 = vpop.f32.mrb[71].mxu1  ;;  %5250 = vmatmul.mubr.msk.bf16.gmra.mrb[40].mxu0 %vm6334_vm6, %v6819_v43 }
 0x2cc   : > { %v7262_v29 = vadd.f32 %v4721_v7, %v4720_v52  ;;  %5253 = vmatprep.mubr.msk.bf16.mxu0 %vm6334_vm6, %v6864_v20 }
 0x2cd   : > { %5272 = vmatpush3.bf16.msra.mxu1 %v5688_v35 }
 0x2d0   : > { %v4723_v45 = vpop.f32.mrb[72].mxu1 }
 0x2d1   : > { %v4724_v36 = vpop.f32.mrb[73].mxu1 }
 0x2d2   : > { %v7267_v4 = vadd.f32 %v4724_v36, %v4723_v45  ;;  %v4726_v9 = vpop.f32.mrb[74].mxu1 }
 0x2d3   : > { %v4727_v16 = vpop.f32.mrb[75].mxu1  ;;  %5254 = vmatmul.mubr.msk.bf16.gmra.mrb[44].mxu0 %vm6334_vm6, %v6955_v28 }
 0x2d4   : > { %v7272_v43 = vadd.f32 %v4727_v16, %v4726_v9 }
 0x2d8   : > { %v4729_v13 = vpop.f32.mrb[76].mxu1 }
 0x2d9   : > { %v4730_v42 = vpop.f32.mrb[77].mxu1 }
 0x2da   : > { %v7274_v57 = vadd.f32 %v4730_v42, %v4729_v13  ;;  %v4732_v20 = vpop.f32.mrb[78].mxu1 }
 0x2db   : > { %v4733_v51 = vpop.f32.mrb[79].mxu1 }
 0x2dc   : > { %v7276_v32 = vadd.f32 %v4733_v51, %v4732_v20 }
 0x2e0   : > { %v4735_v22 = vpop.f32.mrb[80].mxu1 }
 0x2e1   : > { %v4736_v1 = vpop.f32.mrb[81].mxu1 }
 0x2e2   : > { %v7278_v14 = vadd.f32 %v4736_v1, %v4735_v22  ;;  %v4738_v25 = vpop.f32.mrb[82].mxu1 }
 0x2e3   : > { %v4739_v56 = vpop.f32.mrb[83].mxu1 }
 0x2e4   : > { %v7280_v28 = vadd.f32 %v4739_v56, %v4738_v25 }
 0x2e8   : > { %v4781_v21 = vpop.f32.mrb[84].mxu1 }
 0x2e9   : > { %v4782_v58 = vpop.f32.mrb[85].mxu1 }
 0x2ea   : > { %v4783_v33 = vadd.f32 %v4782_v58, %v4781_v21  ;;  %v4784_v53 = vpop.f32.mrb[86].mxu1 }
 0x2eb   : > { %v4785_v59 = vpop.f32.mrb[87].mxu1 }
 0x2ec   : > { %v5324_v30 = vadd.f32 %v4783_v33, %v7128_v47  ;;  %v4786_v55 = vadd.f32 %v4785_v59, %v4784_v53 }
 0x2ee   : > { %v5330_v44 = vadd.f32 %v4786_v55, %v7130_v17  ;;  %v4917_v40 = vpop.f32.mrb[48].mxu0 }
 0x2ef   : > { %v4918_v61 = vpop.f32.mrb[49].mxu0 }
 0x2f0   : > { %v4787_v11 = vpop.f32.mrb[88].mxu1  ;;  %v4919_v49 = vadd.f32 %v4918_v61, %v4917_v40  ;;  %v4920_v46 = vpop.f32.mrb[50].mxu0 }
 0x2f1   : > { %v4788_v41 = vpop.f32.mrb[89].mxu1  ;;  %v4921_v15 = vpop.f32.mrb[51].mxu0 }
 0x2f2   : > { %v4789_v52 = vadd.f32 %v4788_v41, %v4787_v11  ;;  %v4790_v7 = vpop.f32.mrb[90].mxu1  ;;  %v4922_v2 = vadd.f32 %v4921_v15, %v4920_v46  ;;  %v7284_v45 = vadd.f32 %v5324_v30, %v4919_v49 }
 0x2f3   : > { %v4791_v36 = vpop.f32.mrb[91].mxu1 }
 0x2f4   : > { %v5321_v47 = vadd.f32 %v4789_v52, %v7140_v6  ;;  %v4792_v9 = vadd.f32 %v4791_v36, %v4790_v7  ;;  %v7287_v16 = vadd.f32 %v5330_v44, %v4922_v2 }
 0x2f6   : > { %v5327_v17 = vadd.f32 %v4792_v9, %v7145_v39  ;;  %v4923_v13 = vpop.f32.mrb[52].mxu0 }
 0x2f7   : > { %v4924_v42 = vpop.f32.mrb[53].mxu0 }
 0x2f8   : > { %v4793_v20 = vpop.f32.mrb[92].mxu1  ;;  %v4925_v51 = vadd.f32 %v4924_v42, %v4923_v13  ;;  %v4926_v0 = vpop.f32.mrb[54].mxu0 }
 0x2f9   : > { %v4794_v22 = vpop.f32.mrb[93].mxu1  ;;  %v4927_v1 = vpop.f32.mrb[55].mxu0 }
 0x2fa   : > { %v4795_v25 = vadd.f32 %v4794_v22, %v4793_v20  ;;  %v4796_v56 = vpop.f32.mrb[94].mxu1  ;;  %v4928_v21 = vadd.f32 %v4927_v1, %v4926_v0  ;;  %v7290_v58 = vadd.f32 %v5321_v47, %v4925_v51 }
 0x2fb   : > { %v4797_v33 = vpop.f32.mrb[95].mxu1 }
 0x2fc   : > { %v5336_v6 = vadd.f32 %v4795_v25, %v7152_v62  ;;  %v4798_v53 = vadd.f32 %v4797_v33, %v4796_v56  ;;  %v7293_v35 = vadd.f32 %v5327_v17, %v4928_v21 }
 0x2fe   : > { %v5342_v39 = vadd.f32 %v4798_v53, %v7157_v37  ;;  %v4929_v59 = vpop.f32.mrb[56].mxu0 }
 0x2ff   : > { %v4930_v30 = vpop.f32.mrb[57].mxu0 }
 0x300   : > { %v4799_v55 = vpop.f32.mrb[96].mxu1  ;;  %v4931_v44 = vadd.f32 %v4930_v30, %v4929_v59  ;;  %v4932_v40 = vpop.f32.mrb[58].mxu0 }
 0x301   : > { %v4800_v61 = vpop.f32.mrb[97].mxu1  ;;  %v4933_v11 = vpop.f32.mrb[59].mxu0 }
 0x302   : > { %v4801_v49 = vadd.f32 %v4800_v61, %v4799_v55  ;;  %v4802_v46 = vpop.f32.mrb[98].mxu1  ;;  %v4934_v41 = vadd.f32 %v4933_v11, %v4932_v40  ;;  %v7296_v15 = vadd.f32 %v5336_v6, %v4931_v44 }
 0x303   : > { %v4803_v52 = vpop.f32.mrb[99].mxu1 }
 0x304   : > { %v5333_v62 = vadd.f32 %v4801_v49, %v7164_v12  ;;  %v4804_v7 = vadd.f32 %v4803_v52, %v4802_v46  ;;  %v7299_v2 = vadd.f32 %v5342_v39, %v4934_v41 }
 0x306   : > { %v5339_v37 = vadd.f32 %v4804_v7, %v7169_v50  ;;  %v4935_v36 = vpop.f32.mrb[60].mxu0 }
 0x307   : > { %v4936_v47 = vpop.f32.mrb[61].mxu0 }
 0x308   : > { %v4805_v9 = vpop.f32.mrb[100].mxu1  ;;  %v4937_v17 = vadd.f32 %v4936_v47, %v4935_v36  ;;  %v4938_v13 = vpop.f32.mrb[62].mxu0 }
 0x309   : > { %v4806_v42 = vpop.f32.mrb[101].mxu1  ;;  %v4939_v20 = vpop.f32.mrb[63].mxu0 }
 0x30a   : > { %v4807_v51 = vadd.f32 %v4806_v42, %v4805_v9  ;;  %v4808_v0 = vpop.f32.mrb[102].mxu1  ;;  %v4940_v22 = vadd.f32 %v4939_v20, %v4938_v13  ;;  %v7302_v1 = vadd.f32 %v5333_v62, %v4937_v17 }
 0x30b   : > { %v4809_v25 = vpop.f32.mrb[103].mxu1 }
 0x30c   : > { %v5348_v12 = vadd.f32 %v4807_v51, %v7176_v34  ;;  %v4810_v56 = vadd.f32 %v4809_v25, %v4808_v0  ;;  %v7305_v21 = vadd.f32 %v5339_v37, %v4940_v22 }
 0x30e   : > { %v5354_v50 = vadd.f32 %v4810_v56, %v7181_v10  ;;  %v4941_v33 = vpop.f32.mrb[64].mxu0 }
 0x30f   : > { %v4942_v6 = vpop.f32.mrb[65].mxu0 }
 0x310   : > { %v4811_v53 = vpop.f32.mrb[104].mxu1  ;;  %v4943_v39 = vadd.f32 %v4942_v6, %v4941_v33  ;;  %v4944_v59 = vpop.f32.mrb[66].mxu0 }
 0x311   : > { %v4812_v30 = vpop.f32.mrb[105].mxu1  ;;  %v4945_v55 = vpop.f32.mrb[67].mxu0 }
 0x312   : > { %v4813_v44 = vadd.f32 %v4812_v30, %v4811_v53  ;;  %v4814_v40 = vpop.f32.mrb[106].mxu1  ;;  %v4946_v61 = vadd.f32 %v4945_v55, %v4944_v59  ;;  %v7308_v11 = vadd.f32 %v5348_v12, %v4943_v39 }
 0x313   : > { %v4815_v49 = vpop.f32.mrb[107].mxu1 }
 0x314   : > { %v5345_v34 = vadd.f32 %v4813_v44, %v7187_v54  ;;  %v4816_v46 = vadd.f32 %v4815_v49, %v4814_v40  ;;  %v7311_v41 = vadd.f32 %v5354_v50, %v4946_v61 }
 0x316   : > { %v5351_v10 = vadd.f32 %v4816_v46, %v7192_v18  ;;  %v4947_v52 = vpop.f32.mrb[68].mxu0 }
 0x317   : > { %v4948_v62 = vpop.f32.mrb[69].mxu0 }
 0x318   : > { %v4817_v7 = vpop.f32.mrb[108].mxu1  ;;  %v4949_v37 = vadd.f32 %v4948_v62, %v4947_v52  ;;  %v4950_v36 = vpop.f32.mrb[70].mxu0 }
 0x319   : > { %v4818_v47 = vpop.f32.mrb[109].mxu1  ;;  %v4951_v9 = vpop.f32.mrb[71].mxu0 }
 0x31a   : > { %v4819_v17 = vadd.f32 %v4818_v47, %v4817_v7  ;;  %v4820_v13 = vpop.f32.mrb[110].mxu1  ;;  %v4952_v42 = vadd.f32 %v4951_v9, %v4950_v36  ;;  %v7314_v20 = vadd.f32 %v5345_v34, %v4949_v37 }
 0x31b   : > { %v4821_v51 = vpop.f32.mrb[111].mxu1 }
 0x31c   : > { %v5360_v54 = vadd.f32 %v4819_v17, %v7197_v27  ;;  %v4822_v0 = vadd.f32 %v4821_v51, %v4820_v13  ;;  %v7317_v22 = vadd.f32 %v5351_v10, %v4952_v42 }
 0x31e   : > { %v5366_v18 = vadd.f32 %v4822_v0, %v7202_v60  ;;  %v4953_v25 = vpop.f32.mrb[72].mxu0 }
 0x31f   : > { %v4954_v12 = vpop.f32.mrb[73].mxu0 }
 0x320   : > { %v4823_v56 = vpop.f32.mrb[112].mxu1  ;;  %v4955_v50 = vadd.f32 %v4954_v12, %v4953_v25  ;;  %v4956_v33 = vpop.f32.mrb[74].mxu0 }
 0x321   : > { %v4824_v6 = vpop.f32.mrb[113].mxu1  ;;  %v4957_v53 = vpop.f32.mrb[75].mxu0 }
 0x322   : > { %v4825_v39 = vadd.f32 %v4824_v6, %v4823_v56  ;;  %v4826_v59 = vpop.f32.mrb[114].mxu1  ;;  %v4958_v30 = vadd.f32 %v4957_v53, %v4956_v33  ;;  %v7320_v55 = vadd.f32 %v5360_v54, %v4955_v50 }
 0x323   : > { %v4827_v44 = vpop.f32.mrb[115].mxu1 }
 0x324   : > { %v5357_v27 = vadd.f32 %v4825_v39, %v7207_v3  ;;  %v4828_v40 = vadd.f32 %v4827_v44, %v4826_v59  ;;  %v7323_v61 = vadd.f32 %v5366_v18, %v4958_v30 }
 0x326   : > { %v5363_v60 = vadd.f32 %v4828_v40, %v7212_v5  ;;  %v4959_v49 = vpop.f32.mrb[76].mxu0 }
 0x327   : > { %v4960_v34 = vpop.f32.mrb[77].mxu0 }
 0x328   : > { %v4829_v46 = vpop.f32.mrb[116].mxu1  ;;  %v4961_v10 = vadd.f32 %v4960_v34, %v4959_v49  ;;  %v4962_v52 = vpop.f32.mrb[78].mxu0 }
 0x329   : > { %v4830_v62 = vpop.f32.mrb[117].mxu1  ;;  %v4963_v7 = vpop.f32.mrb[79].mxu0 }
 0x32a   : > { %v4831_v37 = vadd.f32 %v4830_v62, %v4829_v46  ;;  %v4832_v36 = vpop.f32.mrb[118].mxu1  ;;  %v4964_v47 = vadd.f32 %v4963_v7, %v4962_v52  ;;  %v7326_v9 = vadd.f32 %v5357_v27, %v4961_v10 }
 0x32b   : > { %v4833_v17 = vpop.f32.mrb[119].mxu1 }
 0x32c   : > { %v5372_v3 = vadd.f32 %v4831_v37, %v7217_v19  ;;  %v4834_v13 = vadd.f32 %v4833_v17, %v4832_v36  ;;  %v7329_v42 = vadd.f32 %v5363_v60, %v4964_v47 }
 0x32e   : > { %v5378_v5 = vadd.f32 %v4834_v13, %v7222_v48  ;;  %v4965_v51 = vpop.f32.mrb[80].mxu0 }
 0x32f   : > { %v4966_v54 = vpop.f32.mrb[81].mxu0 }
 0x330   : > { %v4835_v0 = vpop.f32.mrb[120].mxu1  ;;  %v4967_v18 = vadd.f32 %v4966_v54, %v4965_v51  ;;  %v4968_v25 = vpop.f32.mrb[82].mxu0 }
 0x331   : > { %v4836_v12 = vpop.f32.mrb[121].mxu1  ;;  %v4969_v56 = vpop.f32.mrb[83].mxu0 }
 0x332   : > { %v4837_v50 = vadd.f32 %v4836_v12, %v4835_v0  ;;  %v4838_v33 = vpop.f32.mrb[122].mxu1  ;;  %v4970_v6 = vadd.f32 %v4969_v56, %v4968_v25  ;;  %v7332_v53 = vadd.f32 %v5372_v3, %v4967_v18 }
 0x333   : > { %v4839_v39 = vpop.f32.mrb[123].mxu1 }
 0x334   : > { %v5369_v19 = vadd.f32 %v4837_v50, %v7227_v8  ;;  %v4840_v59 = vadd.f32 %v4839_v39, %v4838_v33  ;;  %v7335_v30 = vadd.f32 %v5378_v5, %v4970_v6 }
 0x336   : > { %v5375_v48 = vadd.f32 %v4840_v59, %v7232_v38  ;;  %v4971_v44 = vpop.f32.mrb[84].mxu0 }
 0x337   : > { %v4972_v27 = vpop.f32.mrb[85].mxu0 }
 0x338   : > { %v4841_v40 = vpop.f32.mrb[124].mxu1  ;;  %v4973_v60 = vadd.f32 %v4972_v27, %v4971_v44  ;;  %v4974_v49 = vpop.f32.mrb[86].mxu0 }
 0x339   : > { %v4842_v34 = vpop.f32.mrb[125].mxu1  ;;  %v4975_v46 = vpop.f32.mrb[87].mxu0 }
 0x33a   : > { %v4843_v10 = vadd.f32 %v4842_v34, %v4841_v40  ;;  %v4844_v52 = vpop.f32.mrb[126].mxu1  ;;  %v4976_v62 = vadd.f32 %v4975_v46, %v4974_v49  ;;  %v7338_v7 = vadd.f32 %v5369_v19, %v4973_v60 }
 0x33b   : > { %v4845_v37 = vpop.f32.mrb[127].mxu1 }
 0x33c   : > { %v5384_v8 = vadd.f32 %v4843_v10, %v7237_v26  ;;  %v4846_v36 = vadd.f32 %v4845_v37, %v4844_v52  ;;  %v7341_v47 = vadd.f32 %v5375_v48, %v4976_v62 }
 0x33e   : > { %v5390_v38 = vadd.f32 %v4846_v36, %v7242_v31  ;;  %v4977_v17 = vpop.f32.mrb[88].mxu0 }
 0x33f   : > { %v4978_v3 = vpop.f32.mrb[89].mxu0 }
 0x340   : > { %v4847_v13 = vpop.f32.mrb[128].mxu1  ;;  %v4979_v5 = vadd.f32 %v4978_v3, %v4977_v17  ;;  %v4980_v51 = vpop.f32.mrb[90].mxu0 }
 0x341   : > { %v4848_v54 = vpop.f32.mrb[129].mxu1  ;;  %v4981_v0 = vpop.f32.mrb[91].mxu0 }
 0x342   : > { %v4849_v18 = vadd.f32 %v4848_v54, %v4847_v13  ;;  %v4850_v25 = vpop.f32.mrb[130].mxu1  ;;  %v4982_v12 = vadd.f32 %v4981_v0, %v4980_v51  ;;  %v7344_v56 = vadd.f32 %v5384_v8, %v4979_v5 }
 0x343   : > { %v4851_v50 = vpop.f32.mrb[131].mxu1 }
 0x344   : > { %v5381_v26 = vadd.f32 %v4849_v18, %v7247_v63  ;;  %v4852_v33 = vadd.f32 %v4851_v50, %v4850_v25  ;;  %v7347_v6 = vadd.f32 %v5390_v38, %v4982_v12 }
 0x346   : > { %v5387_v31 = vadd.f32 %v4852_v33, %v7252_v24  ;;  %v4983_v39 = vpop.f32.mrb[92].mxu0 }
 0x347   : > { %v4984_v19 = vpop.f32.mrb[93].mxu0 }
 0x348   : > { %v4853_v59 = vpop.f32.mrb[132].mxu1  ;;  %v4985_v48 = vadd.f32 %v4984_v19, %v4983_v39  ;;  %v4986_v44 = vpop.f32.mrb[94].mxu0 }
 0x349   : > { %v4854_v27 = vpop.f32.mrb[133].mxu1  ;;  %v4987_v40 = vpop.f32.mrb[95].mxu0 }
 0x34a   : > { %v4855_v60 = vadd.f32 %v4854_v27, %v4853_v59  ;;  %v4856_v49 = vpop.f32.mrb[134].mxu1  ;;  %v4988_v34 = vadd.f32 %v4987_v40, %v4986_v44  ;;  %v7350_v46 = vadd.f32 %v5381_v26, %v4985_v48 }
 0x34b   : > { %v4857_v10 = vpop.f32.mrb[135].mxu1 }
 0x34c   : > { %v5396_v63 = vadd.f32 %v4855_v60, %v7257_v23  ;;  %v4858_v52 = vadd.f32 %v4857_v10, %v4856_v49  ;;  %v7353_v62 = vadd.f32 %v5387_v31, %v4988_v34 }
 0x34e   : > { %v5402_v24 = vadd.f32 %v4858_v52, %v7262_v29  ;;  %v4989_v37 = vpop.f32.mrb[96].mxu0 }
 0x34f   : > { %v4990_v8 = vpop.f32.mrb[97].mxu0 }
 0x350   : > { %v4859_v36 = vpop.f32.mrb[136].mxu1  ;;  %v4991_v38 = vadd.f32 %v4990_v8, %v4989_v37  ;;  %v4992_v17 = vpop.f32.mrb[98].mxu0 }
 0x351   : > { %v4860_v3 = vpop.f32.mrb[137].mxu1  ;;  %v4993_v13 = vpop.f32.mrb[99].mxu0 }
 0x352   : > { %v4861_v5 = vadd.f32 %v4860_v3, %v4859_v36  ;;  %v4862_v51 = vpop.f32.mrb[138].mxu1  ;;  %v4994_v54 = vadd.f32 %v4993_v13, %v4992_v17  ;;  %v7356_v0 = vadd.f32 %v5396_v63, %v4991_v38 }
 0x353   : > { %v4863_v18 = vpop.f32.mrb[139].mxu1 }
 0x354   : > { %v5393_v23 = vadd.f32 %v4861_v5, %v7267_v4  ;;  %v4864_v25 = vadd.f32 %v4863_v18, %v4862_v51  ;;  %v7359_v12 = vadd.f32 %v5402_v24, %v4994_v54 }
 0x356   : > { %v5399_v29 = vadd.f32 %v4864_v25, %v7272_v43  ;;  %v4995_v50 = vpop.f32.mrb[100].mxu0 }
 0x357   : > { %v4996_v26 = vpop.f32.mrb[101].mxu0 }
 0x358   : > { %v4865_v33 = vpop.f32.mrb[140].mxu1  ;;  %v4997_v31 = vadd.f32 %v4996_v26, %v4995_v50  ;;  %v4998_v39 = vpop.f32.mrb[102].mxu0 }
 0x359   : > { %v4866_v19 = vpop.f32.mrb[141].mxu1  ;;  %v4999_v59 = vpop.f32.mrb[103].mxu0 }
 0x35a   : > { %v4867_v48 = vadd.f32 %v4866_v19, %v4865_v33  ;;  %v4868_v44 = vpop.f32.mrb[142].mxu1  ;;  %v5000_v27 = vadd.f32 %v4999_v59, %v4998_v39  ;;  %v7362_v40 = vadd.f32 %v5393_v23, %v4997_v31 }
 0x35b   : > { %v4869_v60 = vpop.f32.mrb[143].mxu1 }
 0x35c   : > { %v5408_v4 = vadd.f32 %v4867_v48, %v7274_v57  ;;  %v4870_v49 = vadd.f32 %v4869_v60, %v4868_v44  ;;  %v7365_v34 = vadd.f32 %v5399_v29, %v5000_v27 }
 0x35e   : > { %v5414_v43 = vadd.f32 %v4870_v49, %v7276_v32  ;;  %v5001_v10 = vpop.f32.mrb[104].mxu0 }
 0x35f   : > { %v5002_v63 = vpop.f32.mrb[105].mxu0 }
 0x360   : > { %v4871_v52 = vpop.f32.mrb[144].mxu1  ;;  %v5003_v24 = vadd.f32 %v5002_v63, %v5001_v10  ;;  %v5004_v37 = vpop.f32.mrb[106].mxu0 }
 0x361   : > { %v4872_v8 = vpop.f32.mrb[145].mxu1  ;;  %v5005_v36 = vpop.f32.mrb[107].mxu0 }
 0x362   : > { %v4873_v38 = vadd.f32 %v4872_v8, %v4871_v52  ;;  %v4874_v17 = vpop.f32.mrb[146].mxu1  ;;  %v5006_v3 = vadd.f32 %v5005_v36, %v5004_v37  ;;  %v7368_v13 = vadd.f32 %v5408_v4, %v5003_v24 }
 0x363   : > { %v4875_v5 = vpop.f32.mrb[147].mxu1 }
 0x364   : > { %v5405_v57 = vadd.f32 %v4873_v38, %v7278_v14  ;;  %v4876_v51 = vadd.f32 %v4875_v5, %v4874_v17  ;;  %v7371_v54 = vadd.f32 %v5414_v43, %v5006_v3  ;;  %v7381_v14 = vld [vmem:[%s7655_s5] ss:$0 sm:$0xff] }
 0x366   : > { %v5411_v32 = vadd.f32 %v4876_v51, %v7280_v28  ;;  %v5007_v18 = vpop.f32.mrb[108].mxu0  ;;  %v7387_v28 = vld [vmem:[%s7754_s11] ss:$0 sm:$0xff]  ;;  %s5835_s11 = scalar_lea.vmem %s7599_s25, 2048 }
 0x367   : > { %v5008_v23 = vpop.f32.mrb[109].mxu0  ;;  %p5836_p13 = scmp.ne.s32.totalorder %s7599_s25, %s5835_s11 }
 0x368   : > { %v5009_v25 = vadd.f32 %v5008_v23, %v5007_v18  ;;  %v5010_v29 = vpop.f32.mrb[110].mxu0 }
 0x369   : > { %v5011_v50 = vpop.f32.mrb[111].mxu0  ;;  %p5837_p6 = pnand %p5836_p13, %p6154_p10 }
 0x36a   : > { %v5012_v26 = vadd.f32 %v5011_v50, %v5010_v29  ;;  %v7374_v33 = vadd.f32 %v5405_v57, %v5009_v25 }
 0x36b   : > { %p5838_p3 = pneg %p5837_p6 }
 0x36c   : > { %v7376_v31 = vadd.f32 %v5411_v32, %v5012_v26 }
 0x36e   : > { %v5227_v39 = vpop.f32.mrb[16].mxu0 }
 0x36f   : > { %v5323_v19 = vadd.f32 %v7290_v58, %v5227_v39  ;;  %v2943_v59 = vpop.f32.mrb[17].mxu0 }
 0x370   : > { %v5326_v48 = vadd.f32 %v7284_v45, %v2943_v59  ;;  %v5228_v44 = vpop.f32.mrb[18].mxu0 }
 0x371   : > { %v3111_v27 = vmul.f32 %v5323_v19, %v7381_v14  ;;  %v5329_v60 = vadd.f32 %v7293_v35, %v5228_v44  ;;  %v2946_v4 = vpop.f32.mrb[19].mxu0 }
 0x372   : > { %v3109_v49 = vmul.f32 %v5326_v48, %v7381_v14  ;;  %v5332_v43 = vadd.f32 %v7287_v16, %v2946_v4 }
 0x373   : > { %v3150_v58 = vadd.f32 %v7387_v28, %v3111_v27  ;;  %v3112_v10 = vmul.f32 %v5329_v60, %v7381_v14 }
 0x374   : > { %v3148_v63 = vadd.f32 %v7387_v28, %v3109_v49  ;;  %v3110_v52 = vmul.f32 %v5332_v43, %v7381_v14 }
 0x375   : > { %v3151_v45 = vadd.f32 %v7387_v28, %v3112_v10  ;;  %v3182_v8 = vmax.f32 %v3150_v58, 0.0 }
 0x376   : > { %v3149_v24 = vadd.f32 %v7387_v28, %v3110_v52  ;;  %v5231_v37 = vpop.f32.mrb[20].mxu0  ;;  %v3180_v17 = vmax.f32 %v3148_v63, 0.0 }
 0x377   : > { %v3183_v35 = vmax.f32 %v3151_v45, 0.0  ;;  %v5335_v36 = vadd.f32 %v7302_v1, %v5231_v37  ;;  %v2959_v38 = vpop.f32.mrb[21].mxu0 }
 0x378   : > { %v3181_v16 = vmax.f32 %v3149_v24, 0.0  ;;  %v5338_v3 = vadd.f32 %v7296_v15, %v2959_v38  ;;  %v5232_v5 = vpop.f32.mrb[22].mxu0 }
 0x379   : > { %v3213_v57 = vpack.c.bf16 %v3183_v35, %v3182_v8  ;;  %v3115_v51 = vmul.f32 %v5335_v36, %v7381_v14  ;;  %v5341_v32 = vadd.f32 %v7305_v21, %v5232_v5  ;;  %v2962_v18 = vpop.f32.mrb[23].mxu0 }
 0x37a   : > { %v3113_v23 = vmul.f32 %v5338_v3, %v7381_v14  ;;  %v5344_v25 = vadd.f32 %v7299_v2, %v2962_v18  ;;  %v3212_v29 = vpack.c.bf16 %v3181_v16, %v3180_v17 }
 0x37b   : > { %v3154_v50 = vadd.f32 %v7387_v28, %v3115_v51  ;;  %v3116_v1 = vmul.f32 %v5341_v32, %v7381_v14 }
 0x37c   : > { %v3152_v26 = vadd.f32 %v7387_v28, %v3113_v23  ;;  %v3114_v15 = vmul.f32 %v5344_v25, %v7381_v14  ;;  %5273 = vmatprep.mubr.bf16.mxu1 %v3212_v29 }
 0x37d   : > { %v3155_v39 = vadd.f32 %v7387_v28, %v3116_v1  ;;  %5274 = vmatmul.mubr.bf16.vlgmr.msra.gmra.mrb[148].mxu1 %v3213_v57  ;;  %v3186_v59 = vmax.f32 %v3154_v50, 0.0 }
 0x37e   : > { %v3153_v21 = vadd.f32 %v7387_v28, %v3114_v15  ;;  %v5235_v19 = vpop.f32.mrb[24].mxu0  ;;  %v3184_v27 = vmax.f32 %v3152_v26, 0.0 }
 0x37f   : > { %v3187_v48 = vmax.f32 %v3155_v39, 0.0  ;;  %v5347_v2 = vadd.f32 %v7314_v20, %v5235_v19  ;;  %v2975_v44 = vpop.f32.mrb[25].mxu0 }
 0x380   : > { %v3185_v60 = vmax.f32 %v3153_v21, 0.0  ;;  %v5350_v4 = vadd.f32 %v7308_v11, %v2975_v44  ;;  %v5236_v49 = vpop.f32.mrb[26].mxu0 }
 0x381   : > { %v3119_v43 = vmul.f32 %v5347_v2, %v7381_v14  ;;  %v5353_v58 = vadd.f32 %v7317_v22, %v5236_v49  ;;  %v2978_v10 = vpop.f32.mrb[27].mxu0  ;;  %v3215_v63 = vpack.c.bf16 %v3187_v48, %v3186_v59 }
 0x382   : > { %v3117_v52 = vmul.f32 %v5350_v4, %v7381_v14  ;;  %v5356_v45 = vadd.f32 %v7311_v41, %v2978_v10  ;;  %v3214_v24 = vpack.c.bf16 %v3185_v60, %v3184_v27 }
 0x383   : > { %v3158_v37 = vadd.f32 %v7387_v28, %v3119_v43  ;;  %v3120_v20 = vmul.f32 %v5353_v58, %v7381_v14 }
 0x384   : > { %v3156_v8 = vadd.f32 %v7387_v28, %v3117_v52  ;;  %v3118_v11 = vmul.f32 %v5356_v45, %v7381_v14  ;;  %5277 = vmatprep.mubr.bf16.mxu1 %v3214_v24 }
 0x385   : > { %v3159_v35 = vadd.f32 %v7387_v28, %v3120_v20  ;;  %5278 = vmatmul.mubr.bf16.gmra.mrb[152].mxu1 %v3215_v63  ;;  %v3190_v38 = vmax.f32 %v3158_v37, 0.0 }
 0x386   : > { %v3157_v22 = vadd.f32 %v7387_v28, %v3118_v11  ;;  %v5239_v36 = vpop.f32.mrb[28].mxu0  ;;  %v3188_v3 = vmax.f32 %v3156_v8, 0.0 }
 0x387   : > { %v3191_v17 = vmax.f32 %v3159_v35, 0.0  ;;  %v5359_v41 = vadd.f32 %v7326_v9, %v5239_v36  ;;  %v2991_v16 = vpop.f32.mrb[29].mxu0 }
 0x388   : > { %v3189_v5 = vmax.f32 %v3157_v22, 0.0  ;;  %v5362_v57 = vadd.f32 %v7320_v55, %v2991_v16  ;;  %v5240_v51 = vpop.f32.mrb[30].mxu0 }
 0x389   : > { %v3123_v32 = vmul.f32 %v5359_v41, %v7381_v14  ;;  %v5365_v18 = vadd.f32 %v7329_v42, %v5240_v51  ;;  %v2994_v23 = vpop.f32.mrb[31].mxu0  ;;  %v3217_v25 = vpack.c.bf16 %v3191_v17, %v3190_v38 }
 0x38a   : > { %v3121_v29 = vmul.f32 %v5362_v57, %v7381_v14  ;;  %v5368_v50 = vadd.f32 %v7323_v61, %v2994_v23  ;;  %v3216_v1 = vpack.c.bf16 %v3189_v5, %v3188_v3 }
 0x38b   : > { %v3162_v26 = vadd.f32 %v7387_v28, %v3123_v32  ;;  %v3124_v9 = vmul.f32 %v5365_v18, %v7381_v14 }
 0x38c   : > { %v3160_v15 = vadd.f32 %v7387_v28, %v3121_v29  ;;  %v3122_v55 = vmul.f32 %v5368_v50, %v7381_v14  ;;  %5281 = vmatprep.mubr.bf16.mxu1 %v3216_v1 }
 0x38d   : > { %v3163_v39 = vadd.f32 %v7387_v28, %v3124_v9  ;;  %5282 = vmatmul.mubr.bf16.gmra.mrb[156].mxu1 %v3217_v25  ;;  %v3194_v19 = vmax.f32 %v3162_v26, 0.0 }
 0x38e   : > { %v3161_v42 = vadd.f32 %v7387_v28, %v3122_v55  ;;  %v5243_v21 = vpop.f32.mrb[32].mxu0  ;;  %v3192_v2 = vmax.f32 %v3160_v15, 0.0 }
 0x38f   : > { %v3195_v59 = vmax.f32 %v3163_v39, 0.0  ;;  %v5371_v61 = vadd.f32 %v7338_v7, %v5243_v21  ;;  %v3007_v48 = vpop.f32.mrb[33].mxu0 }
 0x390   : > { %v3193_v44 = vmax.f32 %v3161_v42, 0.0  ;;  %v5374_v27 = vadd.f32 %v7332_v53, %v3007_v48  ;;  %v5244_v60 = vpop.f32.mrb[34].mxu0 }
 0x391   : > { %v3127_v4 = vmul.f32 %v5371_v61, %v7381_v14  ;;  %v5377_v49 = vadd.f32 %v7341_v47, %v5244_v60  ;;  %v3010_v43 = vpop.f32.mrb[35].mxu0  ;;  %v3219_v58 = vpack.c.bf16 %v3195_v59, %v3194_v19 }
 0x392   : > { %v3125_v10 = vmul.f32 %v5374_v27, %v7381_v14  ;;  %v5380_v63 = vadd.f32 %v7335_v30, %v3010_v43  ;;  %v3218_v52 = vpack.c.bf16 %v3193_v44, %v3192_v2 }
 0x393   : > { %v3166_v45 = vadd.f32 %v7387_v28, %v3127_v4  ;;  %v3128_v7 = vmul.f32 %v5377_v49, %v7381_v14 }
 0x394   : > { %v3164_v24 = vadd.f32 %v7387_v28, %v3125_v10  ;;  %v3126_v53 = vmul.f32 %v5380_v63, %v7381_v14  ;;  %5285 = vmatprep.mubr.bf16.mxu1 %v3218_v52 }
 0x395   : > { %v3167_v37 = vadd.f32 %v7387_v28, %v3128_v7  ;;  %5286 = vmatmul.mubr.bf16.gmra.mrb[160].mxu1 %v3219_v58  ;;  %v3198_v8 = vmax.f32 %v3166_v45, 0.0 }
 0x396   : > { %v3165_v47 = vadd.f32 %v7387_v28, %v3126_v53  ;;  %v5247_v20 = vpop.f32.mrb[36].mxu0  ;;  %v3196_v22 = vmax.f32 %v3164_v24, 0.0 }
 0x397   : > { %v3199_v11 = vmax.f32 %v3167_v37, 0.0  ;;  %v5383_v30 = vadd.f32 %v7350_v46, %v5247_v20  ;;  %v3023_v35 = vpop.f32.mrb[37].mxu0 }
 0x398   : > { %v3197_v36 = vmax.f32 %v3165_v47, 0.0  ;;  %v5386_v38 = vadd.f32 %v7344_v56, %v3023_v35  ;;  %v5248_v17 = vpop.f32.mrb[38].mxu0 }
 0x399   : > { %v3131_v41 = vmul.f32 %v5383_v30, %v7381_v14  ;;  %v5389_v16 = vadd.f32 %v7353_v62, %v5248_v17  ;;  %v3026_v3 = vpop.f32.mrb[39].mxu0  ;;  %v3221_v5 = vpack.c.bf16 %v3199_v11, %v3198_v8 }
 0x39a   : > { %v3129_v57 = vmul.f32 %v5386_v38, %v7381_v14  ;;  %v5392_v51 = vadd.f32 %v7347_v6, %v3026_v3  ;;  %v3220_v32 = vpack.c.bf16 %v3197_v36, %v3196_v22  ;;  %v7492_v3 = vld [vmem:[%s7756_s21] ss:$0 sm:$0xff] }
 0x39b   : > { %v3170_v18 = vadd.f32 %v7387_v28, %v3131_v41  ;;  %v3132_v46 = vmul.f32 %v5389_v16, %v7381_v14 }
 0x39c   : > { %v3168_v23 = vadd.f32 %v7387_v28, %v3129_v57  ;;  %v3130_v56 = vmul.f32 %v5392_v51, %v7381_v14  ;;  %5289 = vmatprep.mubr.bf16.mxu1 %v3220_v32  ;;  %v5706_v32 = vld [vmem:[%s6221_s30] sm:$0xff]  }
 0x39d   : > { %v3171_v25 = vadd.f32 %v7387_v28, %v3132_v46  ;;  %5290 = vmatmul.mubr.bf16.gmra.mrb[164].mxu1 %v3221_v5  ;;  %v3202_v50 = vmax.f32 %v3170_v18, 0.0  ;;  %v3531_v18 = vunpack.c.l.bf16 %v5706_v32 }
 0x39e   : > { %v3169_v62 = vadd.f32 %v7387_v28, %v3130_v56  ;;  %v5251_v29 = vpop.f32.mrb[40].mxu0  ;;  %v3200_v9 = vmax.f32 %v3168_v23, 0.0 }
 0x39f   : > { %v3203_v1 = vmax.f32 %v3171_v25, 0.0  ;;  %v5395_v6 = vadd.f32 %v7362_v40, %v5251_v29  ;;  %v3039_v26 = vpop.f32.mrb[41].mxu0 }
 0x3a0   : > { %v3201_v15 = vmax.f32 %v3169_v62, 0.0  ;;  %v5398_v55 = vadd.f32 %v7356_v0, %v3039_v26  ;;  %v5252_v39 = vpop.f32.mrb[42].mxu0 }
 0x3a1   : > { %v3135_v42 = vmul.f32 %v5395_v6, %v7381_v14  ;;  %v5401_v21 = vadd.f32 %v7365_v34, %v5252_v39  ;;  %v3042_v19 = vpop.f32.mrb[43].mxu0  ;;  %v3223_v59 = vpack.c.bf16 %v3203_v1, %v3202_v50  ;;  %v3532_v50 = vunpack.c.h.bf16 %v5706_v32 }
 0x3a2   : > { %v3133_v61 = vmul.f32 %v5398_v55, %v7381_v14  ;;  %v5404_v48 = vadd.f32 %v7359_v12, %v3042_v19  ;;  %v3222_v2 = vpack.c.bf16 %v3201_v15, %v3200_v9  ;;  %v5707_v19 = vld [vmem:[%s6221_s30 + $0x18] sm:$0xff]  }
 0x3a3   : > { %v3174_v44 = vadd.f32 %v7387_v28, %v3135_v42  ;;  %v3136_v40 = vmul.f32 %v5401_v21, %v7381_v14 }
 0x3a4   : > { %v3172_v27 = vadd.f32 %v7387_v28, %v3133_v61  ;;  %v3134_v0 = vmul.f32 %v5404_v48, %v7381_v14  ;;  %5293 = vmatprep.mubr.bf16.mxu1 %v3222_v2 }
 0x3a5   : > { %v3175_v60 = vadd.f32 %v7387_v28, %v3136_v40  ;;  %5294 = vmatmul.mubr.bf16.gmra.mrb[168].mxu1 %v3223_v59  ;;  %v3206_v49 = vmax.f32 %v3174_v44, 0.0  ;;  %v3537_v59 = vunpack.c.l.bf16 %v5707_v19  ;;  %v5708_v40 = vld [vmem:[%s6221_s30 + $0x10] sm:$0xff]  }
 0x3a6   : > { %v3173_v34 = vadd.f32 %v7387_v28, %v3134_v0  ;;  %v5255_v4 = vpop.f32.mrb[44].mxu0  ;;  %v3204_v10 = vmax.f32 %v3172_v27, 0.0  ;;  %v3535_v27 = vunpack.c.l.bf16 %v5708_v40 }
 0x3a7   : > { %v3207_v43 = vmax.f32 %v3175_v60, 0.0  ;;  %v5407_v12 = vadd.f32 %v7374_v33, %v5255_v4  ;;  %v3055_v58 = vpop.f32.mrb[45].mxu0 }
 0x3a8   : > { %v3205_v63 = vmax.f32 %v3173_v34, 0.0  ;;  %v5410_v52 = vadd.f32 %v7368_v13, %v3055_v58  ;;  %v5256_v45 = vpop.f32.mrb[46].mxu0 }
 0x3a9   : > { %v3139_v7 = vmul.f32 %v5407_v12, %v7381_v14  ;;  %v5413_v24 = vadd.f32 %v7376_v31, %v5256_v45  ;;  %v3058_v53 = vpop.f32.mrb[47].mxu0  ;;  %v3225_v37 = vpack.c.bf16 %v3207_v43, %v3206_v49  ;;  %v3538_v49 = vunpack.c.h.bf16 %v5707_v19  ;;  %v5712_v19 = vld [vmem:[%s6221_s30 + $0x30] sm:$0xff]  }
 0x3aa   : > { %v3137_v47 = vmul.f32 %v5410_v52, %v7381_v14  ;;  %v5416_v20 = vadd.f32 %v7371_v54, %v3058_v53  ;;  %v3224_v8 = vpack.c.bf16 %v3205_v63, %v3204_v10  ;;  %v3536_v63 = vunpack.c.h.bf16 %v5708_v40 }
 0x3ab   : > { %v3178_v11 = vadd.f32 %v7387_v28, %v3139_v7  ;;  %v3140_v33 = vmul.f32 %v5413_v24, %v7381_v14 }
 0x3ac   : > { %v3176_v30 = vadd.f32 %v7387_v28, %v3137_v47  ;;  %v3138_v13 = vmul.f32 %v5416_v20, %v7381_v14  ;;  %5297 = vmatprep.mubr.bf16.mxu1 %v3224_v8  ;;  %v7487_v14 = vld [vmem:[%s7755_s16] ss:$0 sm:$0xff]  ;;  %s5841_s16 = scalar_lea.vmem %s5840_s13, 4096 }
 0x3ad   : > { %v3179_v35 = vadd.f32 %v7387_v28, %v3140_v33  ;;  %5298 = vmatmul.mubr.bf16.gmra.mrb[172].mxu1 %v3225_v37  ;;  %v3210_v22 = vmax.f32 %v3178_v11, 0.0  ;;  %v5709_v33 = vld [vmem:[%s6221_s30 + $0x28] sm:$0xff]   ;;  %p5843_p7 = scmp.lt.s32.totalorder %s5841_s16, %s5835_s11 }
 0x3ae   : > { %v3177_v31 = vadd.f32 %v7387_v28, %v3138_v13  ;;  %v3208_v54 = vmax.f32 %v3176_v30, 0.0  ;;  %v5705_v28 = vld [vmem:[%s6221_s30 + $0x8] sm:$0xff]   ;;  %v3541_v30 = vunpack.c.l.bf16 %v5709_v33 }
 0x3af   : > { %v3211_v36 = vmax.f32 %v3179_v35, 0.0  ;;  %v3533_v5 = vunpack.c.l.bf16 %v5705_v28  ;;  %v3534_v56 = vunpack.c.h.bf16 %v5705_v28  ;;  %v3542_v28 = vunpack.c.h.bf16 %v5709_v33  ;;  %v5714_v33 = vld [vmem:[%s6221_s30 + $0x40] sm:$0xff]   ;;  %p5844_p9 = por %p5843_p7, %p5842_p5 }
 0x3b0   : > { %v3209_v38 = vmax.f32 %v3177_v31, 0.0 }
 0x3b1   : > { %v3227_v17 = vpack.c.bf16 %v3211_v36, %v3210_v22  ;;  %v5710_v36 = vld [vmem:[%s6221_s30 + $0x20] sm:$0xff]   ;;  %p5845_p0 = pnand %p5844_p9, %p5838_p3 }
 0x3b2   : > { %v3226_v41 = vpack.c.bf16 %v3209_v38, %v3208_v54  ;;  %v3539_v54 = vunpack.c.l.bf16 %v5710_v36 }
 0x3b4   : > { %5301 = vmatprep.mubr.bf16.mxu1 %v3226_v41 }
 0x3b5   : > { %5302 = vmatmul.mubr.bf16.gmra.mrb[176].mxu1 %v3227_v17 }
 0x450   : > { %v5275_v16 = vpop.f32.mrb[148].mxu1 }
 0x451   : > { %v3462_v57 = vmul.f32 %v5275_v16, %v7487_v14  ;;  %v3326_v51 = vpop.f32.mrb[149].mxu1 }
 0x452   : > { %v3460_v46 = vmul.f32 %v7487_v14, %v3326_v51  ;;  %v5276_v23 = vpop.f32.mrb[150].mxu1 }
 0x453   : > { %v3501_v25 = vadd.f32 %v7492_v3, %v3462_v57  ;;  %v3463_v62 = vmul.f32 %v5276_v23, %v7487_v14  ;;  %v3329_v29 = vpop.f32.mrb[151].mxu1 }
 0x454   : > { %v3499_v1 = vadd.f32 %v7492_v3, %v3460_v46  ;;  %v3461_v6 = vmul.f32 %v7487_v14, %v3329_v29 }
 0x455   : > { %v3565_v26 = vadd.f32 %v3533_v5, %v3501_v25  ;;  %v3502_v9 = vadd.f32 %v7492_v3, %v3463_v62 }
 0x456   : > { %v3563_v15 = vadd.f32 %v3531_v18, %v3499_v1  ;;  %v3500_v55 = vadd.f32 %v7492_v3, %v3461_v6  ;;  %v3540_v18 = vunpack.c.h.bf16 %v5710_v36 }
 0x457   : > { %v3566_v39 = vadd.f32 %v3534_v56, %v3502_v9  ;;  %v3597_v61 = vmax.f32 %v3565_v26, 0.0  ;;  %v5711_v9 = vld [vmem:[%s6221_s30 + $0x38] sm:$0xff]  }
 0x458   : > { %v3564_v42 = vadd.f32 %v3532_v50, %v3500_v55  ;;  %v5279_v21 = vpop.f32.mrb[152].mxu1  ;;  %v3595_v0 = vmax.f32 %v3563_v15, 0.0  ;;  %v3545_v15 = vunpack.c.l.bf16 %v5711_v9  ;;  %v3546_v40 = vunpack.c.h.bf16 %v5711_v9  ;;  %v5716_v9 = vld [vmem:[%s6221_s30 + $0x50] sm:$0xff]  }
 0x459   : > { %v3598_v48 = vmax.f32 %v3566_v39, 0.0  ;;  %v3466_v2 = vmul.f32 %v5279_v21, %v7487_v14  ;;  %v3342_v44 = vpop.f32.mrb[153].mxu1 }
 0x45a   : > { %v3596_v60 = vmax.f32 %v3564_v42, 0.0  ;;  %v3464_v34 = vmul.f32 %v7487_v14, %v3342_v44  ;;  %v5280_v4 = vpop.f32.mrb[154].mxu1 }
 0x45b   : > { %v4132_v43 = vpack.c.bf16 %v3598_v48, %v3597_v61  ;;  %v3505_v12 = vadd.f32 %v7492_v3, %v3466_v2  ;;  %v3467_v58 = vmul.f32 %v5280_v4, %v7487_v14  ;;  %v3345_v10 = vpop.f32.mrb[155].mxu1  ;;  %v3544_v4 = vunpack.c.h.bf16 %v5712_v19 }
 0x45c   : > { %v4127_v52 = vpack.c.bf16 %v3596_v60, %v3595_v0  ;;  %v3503_v45 = vadd.f32 %v7492_v3, %v3464_v34  ;;  %v3465_v7 = vmul.f32 %v7487_v14, %v3345_v10 }
 0x45d   : > { %4204 = vst [vmem:[%s7514_s23 + $0x8] sm:$0xff] %v4132_v43   ;;  %v3569_v24 = vadd.f32 %v3537_v59, %v3505_v12  ;;  %v3506_v53 = vadd.f32 %v7492_v3, %v3467_v58  ;;  %v3543_v59 = vunpack.c.l.bf16 %v5712_v19 }
 0x45e   : > { %4128 = vst [vmem:[%s7514_s23] sm:$0xff] %v4127_v52   ;;  %v3567_v37 = vadd.f32 %v3535_v27, %v3503_v45  ;;  %v3504_v47 = vadd.f32 %v7492_v3, %v3465_v7 }
 0x45f   : > { %v3570_v20 = vadd.f32 %v3538_v49, %v3506_v53  ;;  %v3601_v13 = vmax.f32 %v3569_v24, 0.0  ;;  %v5713_v53 = vld [vmem:[%s6221_s30 + $0x48] sm:$0xff]  }
 0x460   : > { %v3568_v8 = vadd.f32 %v3536_v63, %v3504_v47  ;;  %v5283_v11 = vpop.f32.mrb[156].mxu1  ;;  %v3599_v38 = vmax.f32 %v3567_v37, 0.0  ;;  %v3549_v37 = vunpack.c.l.bf16 %v5713_v53  ;;  %v3550_v36 = vunpack.c.h.bf16 %v5713_v53  ;;  %v5718_v53 = vld [vmem:[%s6221_s30 + $0x60] sm:$0xff]  }
 0x461   : > { %v3602_v35 = vmax.f32 %v3570_v20, 0.0  ;;  %v3470_v31 = vmul.f32 %v5283_v11, %v7487_v14  ;;  %v3358_v22 = vpop.f32.mrb[157].mxu1 }
 0x462   : > { %v3600_v17 = vmax.f32 %v3568_v8, 0.0  ;;  %v3468_v41 = vmul.f32 %v7487_v14, %v3358_v22  ;;  %v5284_v16 = vpop.f32.mrb[158].mxu1 }
 0x463   : > { %v4142_v5 = vpack.c.bf16 %v3602_v35, %v3601_v13  ;;  %v3509_v57 = vadd.f32 %v7492_v3, %v3470_v31  ;;  %v3471_v51 = vmul.f32 %v5284_v16, %v7487_v14  ;;  %v3361_v32 = vpop.f32.mrb[159].mxu1  ;;  %v3548_v16 = vunpack.c.h.bf16 %v5714_v33 }
 0x464   : > { %v4137_v46 = vpack.c.bf16 %v3600_v17, %v3599_v38  ;;  %v3507_v23 = vadd.f32 %v7492_v3, %v3468_v41  ;;  %v3469_v56 = vmul.f32 %v7487_v14, %v3361_v32 }
 0x465   : > { %4206 = vst [vmem:[%s7514_s23 + $0x18] sm:$0xff] %v4142_v5   ;;  %v3573_v25 = vadd.f32 %v3541_v30, %v3509_v57  ;;  %v3510_v62 = vadd.f32 %v7492_v3, %v3471_v51  ;;  %v3547_v30 = vunpack.c.l.bf16 %v5714_v33 }
 0x466   : > { %4205 = vst [vmem:[%s7514_s23 + $0x10] sm:$0xff] %v4137_v46   ;;  %v3571_v29 = vadd.f32 %v3539_v54, %v3507_v23  ;;  %v3508_v50 = vadd.f32 %v7492_v3, %v3469_v56 }
 0x467   : > { %v3574_v1 = vadd.f32 %v3542_v28, %v3510_v62  ;;  %v3605_v55 = vmax.f32 %v3573_v25, 0.0  ;;  %v5715_v62 = vld [vmem:[%s6221_s30 + $0x58] sm:$0xff]  }
 0x468   : > { %v3572_v6 = vadd.f32 %v3540_v18, %v3508_v50  ;;  %v5287_v26 = vpop.f32.mrb[160].mxu1  ;;  %v3603_v61 = vmax.f32 %v3571_v29, 0.0  ;;  %v3553_v29 = vunpack.c.l.bf16 %v5715_v62  ;;  %v3554_v19 = vunpack.c.h.bf16 %v5715_v62  ;;  %v5720_v62 = vld [vmem:[%s6221_s30 + $0x70] sm:$0xff]  }
 0x469   : > { %v3606_v39 = vmax.f32 %v3574_v1, 0.0  ;;  %v3474_v42 = vmul.f32 %v5287_v26, %v7487_v14  ;;  %v3374_v21 = vpop.f32.mrb[161].mxu1 }
 0x46a   : > { %v3604_v48 = vmax.f32 %v3572_v6, 0.0  ;;  %v3472_v2 = vmul.f32 %v7487_v14, %v3374_v21  ;;  %v5288_v44 = vpop.f32.mrb[162].mxu1 }
 0x46b   : > { %v4152_v27 = vpack.c.bf16 %v3606_v39, %v3605_v55  ;;  %v3513_v0 = vadd.f32 %v7492_v3, %v3474_v42  ;;  %v3475_v60 = vmul.f32 %v5288_v44, %v7487_v14  ;;  %v3377_v34 = vpop.f32.mrb[163].mxu1  ;;  %v3552_v44 = vunpack.c.h.bf16 %v5716_v9 }
 0x46c   : > { %v4147_v49 = vpack.c.bf16 %v3604_v48, %v3603_v61  ;;  %v3511_v43 = vadd.f32 %v7492_v3, %v3472_v2  ;;  %v3473_v12 = vmul.f32 %v7487_v14, %v3377_v34 }
 0x46d   : > { %4208 = vst [vmem:[%s7514_s23 + $0x28] sm:$0xff] %v4152_v27   ;;  %v3577_v58 = vadd.f32 %v3545_v15, %v3513_v0  ;;  %v3514_v10 = vadd.f32 %v7492_v3, %v3475_v60  ;;  %v3551_v15 = vunpack.c.l.bf16 %v5716_v9 }
 0x46e   : > { %4207 = vst [vmem:[%s7514_s23 + $0x20] sm:$0xff] %v4147_v49   ;;  %v3575_v63 = vadd.f32 %v3543_v59, %v3511_v43  ;;  %v3512_v52 = vadd.f32 %v7492_v3, %v3473_v12 }
 0x46f   : > { %v3578_v45 = vadd.f32 %v3546_v40, %v3514_v10  ;;  %v3609_v47 = vmax.f32 %v3577_v58, 0.0  ;;  %v5717_v10 = vld [vmem:[%s6221_s30 + $0x68] sm:$0xff]  }
 0x470   : > { %v3576_v7 = vadd.f32 %v3544_v4, %v3512_v52  ;;  %v5291_v24 = vpop.f32.mrb[164].mxu1  ;;  %v3607_v13 = vmax.f32 %v3575_v63, 0.0  ;;  %v3557_v63 = vunpack.c.l.bf16 %v5717_v10  ;;  %v3558_v33 = vunpack.c.h.bf16 %v5717_v10 }
 0x471   : > { %v3610_v20 = vmax.f32 %v3578_v45, 0.0  ;;  %v3478_v8 = vmul.f32 %v5291_v24, %v7487_v14  ;;  %v3390_v11 = vpop.f32.mrb[165].mxu1 }
 0x472   : > { %v3608_v35 = vmax.f32 %v3576_v7, 0.0  ;;  %v3476_v31 = vmul.f32 %v7487_v14, %v3390_v11  ;;  %v5292_v22 = vpop.f32.mrb[166].mxu1 }
 0x473   : > { %v4162_v54 = vpack.c.bf16 %v3610_v20, %v3609_v47  ;;  %v3517_v38 = vadd.f32 %v7492_v3, %v3478_v8  ;;  %v3479_v17 = vmul.f32 %v5292_v22, %v7487_v14  ;;  %v3393_v41 = vpop.f32.mrb[167].mxu1  ;;  %v3556_v22 = vunpack.c.h.bf16 %v5718_v53 }
 0x474   : > { %v4157_v28 = vpack.c.bf16 %v3608_v35, %v3607_v13  ;;  %v3515_v5 = vadd.f32 %v7492_v3, %v3476_v31  ;;  %v3477_v57 = vmul.f32 %v7487_v14, %v3393_v41 }
 0x475   : > { %4210 = vst [vmem:[%s7514_s23 + $0x38] sm:$0xff] %v4162_v54   ;;  %v3581_v51 = vadd.f32 %v3549_v37, %v3517_v38  ;;  %v3518_v32 = vadd.f32 %v7492_v3, %v3479_v17  ;;  %v3555_v37 = vunpack.c.l.bf16 %v5718_v53 }
 0x476   : > { %4209 = vst [vmem:[%s7514_s23 + $0x30] sm:$0xff] %v4157_v28   ;;  %v3579_v18 = vadd.f32 %v3547_v30, %v3515_v5  ;;  %v3516_v46 = vadd.f32 %v7492_v3, %v3477_v57 }
 0x477   : > { %v3582_v23 = vadd.f32 %v3550_v36, %v3518_v32  ;;  %v3613_v50 = vmax.f32 %v3581_v51, 0.0  ;;  %v5719_v32 = vld [vmem:[%s6221_s30 + $0x78] sm:$0xff]   ;;  %s4123_s30 = sshll.u32 %s7757_s20, 11 }
 0x478   : > { %v3580_v56 = vadd.f32 %v3548_v16, %v3516_v46  ;;  %v5295_v25 = vpop.f32.mrb[168].mxu1  ;;  %v3611_v55 = vmax.f32 %v3579_v18, 0.0  ;;  %v3561_v18 = vunpack.c.l.bf16 %v5719_v32  ;;  %v3562_v9 = vunpack.c.h.bf16 %v5719_v32  ;;  %s7597_s27 = scalar_lea.hbm %s7758_s22, %s4123_s30 }
 0x479   : > { %v3614_v1 = vmax.f32 %v3582_v23, 0.0  ;;  %v3482_v6 = vmul.f32 %v5295_v25, %v7487_v14  ;;  %v3406_v26 = vpop.f32.mrb[169].mxu1 }
 0x47a   : > { %v3612_v39 = vmax.f32 %v3580_v56, 0.0  ;;  %v3480_v42 = vmul.f32 %v7487_v14, %v3406_v26  ;;  %v5296_v21 = vpop.f32.mrb[170].mxu1 }
 0x47b   : > { %v4172_v59 = vpack.c.bf16 %v3614_v1, %v3613_v50  ;;  %v3521_v61 = vadd.f32 %v7492_v3, %v3482_v6  ;;  %v3483_v48 = vmul.f32 %v5296_v21, %v7487_v14  ;;  %v3409_v2 = vpop.f32.mrb[171].mxu1  ;;  %v3560_v21 = vunpack.c.h.bf16 %v5720_v62 }
 0x47c   : > { %v4167_v40 = vpack.c.bf16 %v3612_v39, %v3611_v55  ;;  %v3519_v27 = vadd.f32 %v7492_v3, %v3480_v42  ;;  %v3481_v0 = vmul.f32 %v7487_v14, %v3409_v2 }
 0x47d   : > { %4212 = vst [vmem:[%s7514_s23 + $0x48] sm:$0xff] %v4172_v59   ;;  %v3585_v60 = vadd.f32 %v3553_v29, %v3521_v61  ;;  %v3522_v34 = vadd.f32 %v7492_v3, %v3483_v48  ;;  %v3559_v29 = vunpack.c.l.bf16 %v5720_v62 }
 0x47e   : > { %4211 = vst [vmem:[%s7514_s23 + $0x40] sm:$0xff] %v4167_v40   ;;  %v3583_v4 = vadd.f32 %v3551_v15, %v3519_v27  ;;  %v3520_v49 = vadd.f32 %v7492_v3, %v3481_v0 }
 0x47f   : > { %v3586_v43 = vadd.f32 %v3554_v19, %v3522_v34  ;;  %v3617_v52 = vmax.f32 %v3585_v60, 0.0 }
 0x480   : > { %v3584_v12 = vadd.f32 %v3552_v44, %v3520_v49  ;;  %v5299_v58 = vpop.f32.mrb[172].mxu1  ;;  %v3615_v47 = vmax.f32 %v3583_v4, 0.0 }
 0x481   : > { %v3618_v45 = vmax.f32 %v3586_v43, 0.0  ;;  %v3486_v7 = vmul.f32 %v5299_v58, %v7487_v14  ;;  %v3422_v24 = vpop.f32.mrb[173].mxu1 }
 0x482   : > { %v3616_v20 = vmax.f32 %v3584_v12, 0.0  ;;  %v3484_v8 = vmul.f32 %v7487_v14, %v3422_v24  ;;  %v5300_v11 = vpop.f32.mrb[174].mxu1 }
 0x483   : > { %v4182_v30 = vpack.c.bf16 %v3618_v45, %v3617_v52  ;;  %v3525_v13 = vadd.f32 %v7492_v3, %v3486_v7  ;;  %v3487_v35 = vmul.f32 %v5300_v11, %v7487_v14  ;;  %v3425_v31 = vpop.f32.mrb[175].mxu1 }
 0x484   : > { %v4177_v36 = vpack.c.bf16 %v3616_v20, %v3615_v47  ;;  %v3523_v54 = vadd.f32 %v7492_v3, %v3484_v8  ;;  %v3485_v38 = vmul.f32 %v7487_v14, %v3425_v31 }
 0x485   : > { %4214 = vst [vmem:[%s7514_s23 + $0x58] sm:$0xff] %v4182_v30   ;;  %v3589_v17 = vadd.f32 %v3557_v63, %v3525_v13  ;;  %v3526_v41 = vadd.f32 %v7492_v3, %v3487_v35 }
 0x486   : > { %4213 = vst [vmem:[%s7514_s23 + $0x50] sm:$0xff] %v4177_v36   ;;  %v3587_v16 = vadd.f32 %v3555_v37, %v3523_v54  ;;  %v3524_v28 = vadd.f32 %v7492_v3, %v3485_v38 }
 0x487   : > { %v3590_v5 = vadd.f32 %v3558_v33, %v3526_v41  ;;  %v3621_v46 = vmax.f32 %v3589_v17, 0.0 }
 0x488   : > { %v3588_v57 = vadd.f32 %v3556_v22, %v3524_v28  ;;  %v5303_v51 = vpop.f32.mrb[176].mxu1  ;;  %v3619_v50 = vmax.f32 %v3587_v16, 0.0 }
 0x489   : > { %v3622_v23 = vmax.f32 %v3590_v5, 0.0  ;;  %v3490_v56 = vmul.f32 %v5303_v51, %v7487_v14  ;;  %v3438_v25 = vpop.f32.mrb[177].mxu1 }
 0x48a   : > { %v3620_v1 = vmax.f32 %v3588_v57, 0.0  ;;  %v3488_v6 = vmul.f32 %v7487_v14, %v3438_v25  ;;  %v5304_v26 = vpop.f32.mrb[178].mxu1 }
 0x48b   : > { %v4192_v15 = vpack.c.bf16 %v3622_v23, %v3621_v46  ;;  %v3529_v55 = vadd.f32 %v7492_v3, %v3490_v56  ;;  %v3491_v39 = vmul.f32 %v5304_v26, %v7487_v14  ;;  %v3441_v42 = vpop.f32.mrb[179].mxu1 }
 0x48c   : > { %v4187_v19 = vpack.c.bf16 %v3620_v1, %v3619_v50  ;;  %v3527_v59 = vadd.f32 %v7492_v3, %v3488_v6  ;;  %v3489_v61 = vmul.f32 %v7487_v14, %v3441_v42 }
 0x48d   : > { %4216 = vst [vmem:[%s7514_s23 + $0x68] sm:$0xff] %v4192_v15   ;;  %v3593_v48 = vadd.f32 %v3561_v18, %v3529_v55  ;;  %v3530_v2 = vadd.f32 %v7492_v3, %v3491_v39 }
 0x48e   : > { %4215 = vst [vmem:[%s7514_s23 + $0x60] sm:$0xff] %v4187_v19   ;;  %v3591_v44 = vadd.f32 %v3559_v29, %v3527_v59  ;;  %v3528_v40 = vadd.f32 %v7492_v3, %v3489_v61 }
 0x48f   : > { %v3594_v27 = vadd.f32 %v3562_v9, %v3530_v2  ;;  %v3625_v60 = vmax.f32 %v3593_v48, 0.0 }
 0x490   : > { %v3592_v0 = vadd.f32 %v3560_v21, %v3528_v40  ;;  %v3623_v4 = vmax.f32 %v3591_v44, 0.0 }
 0x491   : > { %v3626_v34 = vmax.f32 %v3594_v27, 0.0 }
 0x492   : > { %v3624_v14 = vmax.f32 %v3592_v0, 0.0 }
 0x493   : > { %v4202_v49 = vpack.c.bf16 %v3626_v34, %v3625_v60 }
 0x494   : > { %v4197_v3 = vpack.c.bf16 %v3624_v14, %v3623_v4 }
 0x495   : > { %4218 = vst [vmem:[%s7514_s23 + $0x78] sm:$0xff] %v4202_v49  }
 0x496   : > { %4217 = vst [vmem:[%s7514_s23 + $0x70] sm:$0xff] %v4197_v3  }
 0x497   : > { %5848 = shalt.err (!%p5845_p0)
}
 0x498   : > { %s5849_s12 = scalar_lea.hbm %s7597_s27, 2048  ;;  %s5853_s23 = scalar_lea.hbm %s7758_s22, 4096 }
 0x499   : > { %p5850_p4 = scmp.ne.s32.totalorder %s7597_s27, %s5849_s12  ;;  %p5854_p12 = scmp.lt.u32.totalorder %s7597_s27, %s7758_s22 }
 0x49a   : > { %p5855_p1 = scmp.lt.u32.totalorder %s5853_s23, %s5849_s12  ;;  %p5857_p13 = scmp.lt.u32.totalorder %s5849_s12, %s7597_s27 }
 0x49b   : > { %p5851_p2 = pnand %p5850_p4, %p6154_p10 }
 0x49c   : > { %p5856_p11 = por %p5855_p1, %p5854_p12 }
 0x49d   : > { %p5852_p8 = pneg %p5851_p2 }
 0x49e   : > { %p5858_p6 = por %p5857_p13, %p5856_p11 }
 0x4a0   : > { %p5859_p3 = pnand %p5858_p6, %p5852_p8 }
 0x4a2   : > { %5862 = shalt.err (!%p5859_p3)
}
 0x4a3   : > { %s5937_s24 = smov 64   ;;  %s5938_s19 = smov 4  }
 0x4a4   : > { %5495 = dma.vmem_to_hbm [thread:$0]  (%p6154_p10), %s7599_s25, 2048, %s7597_s27, %s3788_s6, %s5937_s24, %s5937_s24, %s5938_s19  }
 0x4a5 PF: > { %s7759_s11 = sld [smem:[#allocation16_spill]]  ;;  %s7760_s9 = sld [smem:[#allocation18_spill]] }
 0x4a6   : > { %p7762_p7 = scmp.ge.s32.totalorder %s5925_s18, 2 }
 0x4ab   : > { %s3819_s13 = sand.u32 1, %s7759_s11   ;;  %p7761_p5 = scmp.ne.s32.totalorder %s7760_s9, 0 }
 0x4ac   : > { %s3820_s16 = scalar_lea.sflag [#allocation5], %s3819_s13 }
 0x4ad   : > { %p5512_p9 = pnand %p7762_p7, %p7761_p5 }
 0x4af   : > { %5900 = dma.done.wait (!%p5512_p9), %s3820_s16, 2048  }
 0x4b0   : > { %5902 = vsyncadd (!%p5512_p9), %s3820_s16, 4294965248  ;;  %s28_s18 = sadd.s32 1, %s5925_s18   ;;  %s7763_s13 = smov %s5909_s14 }
 0x4b1   : > { %p25_p0 = scmp.ge.s32.totalorder %s28_s18, 4   ;;  %s7764_s14 = smov %s5913_s15 }
 0x4b2   : > { %s7765_s15 = smov %s6166_s26  ;;  %s7766_s16 = smov %s5921_s17 }
 0x4b3   : > { %s7767_s17 = smov %s7769_s28  ;;  %27 = sbr.rel (!%p25_p0) target bundleno = 13 (0xd), region = 124 }
 0x4ba   :  { %3825 = vsyncpa [#allocation4], 1 }
 0x4bb   :  { %3827 = vsyncpa [#allocation4 + $0x1], 1 }
 0x4bc   :  { %3828 = vsyncpa [#allocation7], 1 }
 0x4bd   :  { %3829 = vsyncpa [#allocation10], 1 }
 0x4be   :  { %3830 = vsyncpa [#allocation5], 1 }
 0x4bf   :  { %3832 = vsyncpa [#allocation5 + $0x1], 1 }

</bundles_post_ra>
